<compile_context>
chip_gen: v7x
topology: tpu7x:2x2x1
jax: 0.10.0
libtpu: 0.0.40
codegen_flags: <defaults>
</compile_context>

<pallas_src>
import functools
import math

import jax
import jax.numpy as jnp
from jax.experimental import pallas as pl
from jax.experimental.pallas import tpu as pltpu


# Order of the stacked per-layer parameters (must match the kernel unpack).
LAYER_PARAM_NAMES = (
    "sa_w_qkv", "sa_b_qkv", "sa_wo", "sa_bo", "ln1_g", "ln1_b",
    "ca_wq", "ca_bq", "ca_w_kv", "ca_b_kv", "ca_wo", "ca_bo", "ln2_g", "ln2_b",
    "ff_w1", "ff_b1", "ff_w2", "ff_b2", "ln3_g", "ln3_b",
)


def _round_up(x, m):
    return ((x + m - 1) // m) * m


# ----------------------------------------------------------------------------
# The fused decoder kernel (one grid step == one batch element)
# ----------------------------------------------------------------------------

def _decoder_kernel(x_ref, enc_ref, tb_ref, sb_ref, *rest,
                    num_layers, num_heads, d_model):
    (sa_wqkv, sa_bqkv, sa_wo, sa_bo, ln1_g, ln1_b,
     ca_wq, ca_bq, ca_wkv, ca_bkv, ca_wo, ca_bo, ln2_g, ln2_b,
     ff_w1, ff_b1, ff_w2, ff_b2, ln3_g, ln3_b,
     lnf_g, lnf_b, out_w, out_b, o_ref) = rest

    dk = d_model // num_heads
    d_pad = x_ref.shape[2]

    # Lane mask over the padded feature axis (real lanes < d_model); hoisted
    # once per kernel invocation.
    lane = jax.lax.broadcasted_iota(jnp.int32, (1, d_pad), 1)
    feat_mask = (lane < d_model).astype(jnp.float32)
    inv_d = jnp.float32(1.0 / d_model)

    def layer_norm(y, g, b):
        # y: (S, d_pad) f32.  Statistics over the first d_model lanes only;
        # gamma/beta are zero in the padded lanes so the output pads stay 0.
        ym = y * feat_mask
        mean = jnp.sum(ym, axis=-1, keepdims=True) * inv_d
        yc = (ym - mean) * feat_mask
        var = jnp.sum(yc * yc, axis=-1, keepdims=True) * inv_d
        yn = yc * jax.lax.rsqrt(var + 1e-5)
        return yn * g + b

    def mha(q, k, v, bias, wo):
        # q: (S, D) f32 (already scaled by 1/sqrt(dk) via folded weights),
        # k, v: (Sk, D) f32, bias: (S, Sk) f32 additive mask,
        # wo: (D, d_pad) f32.  Each head's result is folded directly into the
        # lane-dense output projection -> no (S, D) concat is materialised.
        out = None
        for h in range(num_heads):
            sl = slice(h * dk, (h + 1) * dk)
            s = jnp.dot(q[:, sl], k[:, sl].T, preferred_element_type=jnp.float32)
            s = s + bias
            s = s - jnp.max(s, axis=-1, keepdims=True)
            p = jnp.exp(s)
            p = p / jnp.sum(p, axis=-1, keepdims=True)
            hv = jnp.dot(p, v[:, sl], preferred_element_type=jnp.float32)
            contrib = jnp.dot(hv, wo[sl, :], preferred_element_type=jnp.float32)
            out = contrib if out is None else out + contrib
        return out  # (S, d_pad) f32

    x = x_ref[0]            # (S, d_pad) f32 residual stream (pads are zero)
    enc = enc_ref[0]        # (Se, d_pad) bf16
    tgt_bias = tb_ref[0]    # (S, S)  f32 additive mask
    src_bias = sb_ref[0]    # (S, Se) f32 additive mask

    for l in range(num_layers):
        # --- masked self-attention + add & norm (fused) -----------------
        xb = x.astype(jnp.bfloat16)
        qkv = jnp.dot(xb, sa_wqkv[l],
                      preferred_element_type=jnp.float32) + sa_bqkv[l]
        q = qkv[:, :d_model]
        k = qkv[:, d_model:2 * d_model]
        v = qkv[:, 2 * d_model:]
        y = mha(q, k, v, tgt_bias, sa_wo[l]) + sa_bo[l] + x
        x = layer_norm(y, ln1_g[l], ln1_b[l])

        # --- encoder-decoder attention + add & norm (fused) -------------
        xb = x.astype(jnp.bfloat16)
        q = jnp.dot(xb, ca_wq[l],
                    preferred_element_type=jnp.float32) + ca_bq[l]
        kv = jnp.dot(enc, ca_wkv[l],
                     preferred_element_type=jnp.float32) + ca_bkv[l]
        y = mha(q, kv[:, :d_model], kv[:, d_model:], src_bias,
                ca_wo[l]) + ca_bo[l] + x
        x = layer_norm(y, ln2_g[l], ln2_b[l])

        # --- position-wise feed-forward + add & norm (fused) ------------
        xb = x.astype(jnp.bfloat16)
        h1 = jnp.dot(xb, ff_w1[l],
                     preferred_element_type=jnp.float32) + ff_b1[l]
        h1 = jnp.maximum(h1, 0.0)
        y = jnp.dot(h1.astype(jnp.bfloat16), ff_w2[l],
                    preferred_element_type=jnp.float32) + ff_b2[l] + x
        x = layer_norm(y, ln3_g[l], ln3_b[l])

    # --- final LayerNorm + lane-dense (128-padded) vocab projection -----
    xn = layer_norm(x, lnf_g[...], lnf_b[...])
    logits = jnp.dot(xn.astype(jnp.bfloat16), out_w[...],
                     preferred_element_type=jnp.float32) + out_b[...]
    o_ref[0] = logits.astype(o_ref.dtype)


# ----------------------------------------------------------------------------
# Wrapper: embedding + PE in plain JAX, masks -> additive bias, one pallas_call
# ----------------------------------------------------------------------------

def _mask_to_bias(mask, B, Sq, Sk):
    """PyTorch {0,1} mask (B,1,Sq,Sk)/(B,1,1,Sk)/None -> additive (B,Sq,Sk) f32."""
    if mask is None:
        return jnp.zeros((B, Sq, Sk), jnp.float32)
    m = mask.astype(jnp.float32)
    if m.ndim > 4:
        m = m.squeeze(2)
    if m.ndim == 4:
        m = m[:, 0]                       # drop head dim (broadcast over heads)
    m = jnp.broadcast_to(m, (B, Sq, Sk))
    return jnp.where(m == 0.0, jnp.float32(-1e9), jnp.float32(0.0))


def decoder_forward(params, tokens, enc_output, src_mask, tgt_mask, *,
                    num_heads, num_layers, d_model, vocab_size):
    B, S = tokens.shape
    Se = enc_output.shape[1]
    Dp = params["lnf_g"].shape[-1]        # padded feature dim (multiple of 128)
    Vp = params["out_b"].shape[-1]        # padded vocab dim   (multiple of 128)

    # Embedding gather + positional-encoding add (plain JAX), pad to Dp lanes.
    x = params["embedding"][tokens] + params["pe"][:S][None, :, :]
    x = jnp.pad(x, ((0, 0), (0, 0), (0, Dp - d_model))).astype(jnp.float32)
    enc = jnp.pad(enc_output.astype(jnp.float32),
                  ((0, 0), (0, 0), (0, Dp - d_model))).astype(jnp.bfloat16)

    tgt_bias = _mask_to_bias(tgt_mask, B, S, S)
    src_bias = _mask_to_bias(src_mask, B, S, Se)

    weights = [params[n] for n in LAYER_PARAM_NAMES] + [
        params["lnf_g"], params["lnf_b"], params["out_w"], params["out_b"]]

    in_specs = [
        pl.BlockSpec((1, S, Dp), lambda b: (b, 0, 0)),
        pl.BlockSpec((1, Se, Dp), lambda b: (b, 0, 0)),
        pl.BlockSpec((1, S, S), lambda b: (b, 0, 0)),
        pl.BlockSpec((1, S, Se), lambda b: (b, 0, 0)),
    ] + [
        # Full-array blocks with constant index maps: weights are DMA'd once
        # and stay VMEM-resident across the (parallel) batch grid.
        pl.BlockSpec(w.shape, lambda b, n=w.ndim: (0,) * n) for w in weights
    ]

    out = pl.pallas_call(
        functools.partial(_decoder_kernel, num_layers=num_layers,
                          num_heads=num_heads, d_model=d_model),
        grid=(B,),
        in_specs=in_specs,
        out_specs=pl.BlockSpec((1, S, Vp), lambda b: (b, 0, 0)),
        out_shape=jax.ShapeDtypeStruct((B, S, Vp), jnp.float32),
        compiler_params=pltpu.CompilerParams(
            dimension_semantics=("parallel",),
            vmem_limit_bytes=64 * 1024 * 1024),
    )(x, enc, tgt_bias, src_bias, *weights)

    return out[:, :, :vocab_size]


# ----------------------------------------------------------------------------
# Parameters (matches nn.Linear / nn.LayerNorm defaults), lane-padded + stacked
# ----------------------------------------------------------------------------

def positional_encoding(d_model, max_len):
    # Reproduces the PyTorch loop: even i -> sin(pos/10000^(i/d)),
    # odd j -> cos(pos/10000^(j/d)).
    pos = jnp.arange(max_len, dtype=jnp.float32)[:, None]
    idx = jnp.arange(d_model, dtype=jnp.float32)[None, :]
    angle = pos / jnp.power(10000.0, idx / d_model)
    pe = jnp.where((jnp.arange(d_model)[None, :] % 2) == 0,
                   jnp.sin(angle), jnp.cos(angle))
    return pe  # (max_len, d_model)


def _init_linear(key, fan_in, fan_out):
    k1, k2 = jax.random.split(key)
    bound = 1.0 / math.sqrt(fan_in)
    w = jax.random.uniform(k1, (fan_in, fan_out), jnp.float32, -bound, bound)
    b = jax.random.uniform(k2, (fan_out,), jnp.float32, -bound, bound)
    return w, b


def init_params(key, vocab_size, d_model, num_heads, num_layers, d_ff, max_len):
    dk = d_model // num_heads
    scale = 1.0 / math.sqrt(dk)           # folded into the Q projection
    Dp = _round_up(d_model, 128)
    Fp = _round_up(d_ff, 128)
    Vp = _round_up(vocab_size, 128)

    def pad2(a, rows, cols, dtype):
        out = jnp.zeros((rows, cols), jnp.float32)
        out = out.at[:a.shape[0], :a.shape[1]].set(a)
        return out.astype(dtype)

    def padrow(v, cols):
        out = jnp.zeros((1, cols), jnp.float32)
        return out.at[0, :v.shape[0]].set(v)

    ones_d = jnp.ones((d_model,), jnp.float32)
    zeros_d = jnp.zeros((d_model,), jnp.float32)

    keys = jax.random.split(key, 2 + num_layers)
    params = {}
    params["embedding"] = jax.random.normal(keys[0], (vocab_size, d_model),
                                            jnp.float32)
    params["pe"] = positional_encoding(d_model, max_len)

    ow, ob = _init_linear(keys[1], d_model, vocab_size)
    params["out_w"] = pad2(ow, Dp, Vp, jnp.bfloat16)
    params["out_b"] = padrow(ob, Vp)
    params["lnf_g"] = padrow(ones_d, Dp)
    params["lnf_b"] = padrow(zeros_d, Dp)

    per_layer = {name: [] for name in LAYER_PARAM_NAMES}
    for li in range(num_layers):
        lk = jax.random.split(keys[2 + li], 10)

        # self-attention: fused QKV (Q pre-scaled by 1/sqrt(dk))
        wq, bq = _init_linear(lk[0], d_model, d_model)
        wk, bk = _init_linear(lk[1], d_model, d_model)
        wv, bv = _init_linear(lk[2], d_model, d_model)
        wo, bo = _init_linear(lk[3], d_model, d_model)
        per_layer["sa_w_qkv"].append(
            pad2(jnp.concatenate([wq * scale, wk, wv], 1), Dp, 3 * d_model,
                 jnp.bfloat16))
        per_layer["sa_b_qkv"].append(
            padrow(jnp.concatenate([bq * scale, bk, bv]), 3 * d_model))
        per_layer["sa_wo"].append(pad2(wo, d_model, Dp, jnp.float32))
        per_layer["sa_bo"].append(padrow(bo, Dp))
        per_layer["ln1_g"].append(padrow(ones_d, Dp))
        per_layer["ln1_b"].append(padrow(zeros_d, Dp))

        # cross-attention: separate (pre-scaled) Q, fused KV
        wq, bq = _init_linear(lk[4], d_model, d_model)
        wk, bk = _init_linear(lk[5], d_model, d_model)
        wv, bv = _init_linear(lk[6], d_model, d_model)
        wo, bo = _init_linear(lk[7], d_model, d_model)
        per_layer["ca_wq"].append(pad2(wq * scale, Dp, d_model, jnp.bfloat16))
        per_layer["ca_bq"].append(padrow(bq * scale, d_model))
        per_layer["ca_w_kv"].append(
            pad2(jnp.concatenate([wk, wv], 1), Dp, 2 * d_model, jnp.bfloat16))
        per_layer["ca_b_kv"].append(padrow(jnp.concatenate([bk, bv]),
                                           2 * d_model))
        per_layer["ca_wo"].append(pad2(wo, d_model, Dp, jnp.float32))
        per_layer["ca_bo"].append(padrow(bo, Dp))
        per_layer["ln2_g"].append(padrow(ones_d, Dp))
        per_layer["ln2_b"].append(padrow(zeros_d, Dp))

        # feed-forward (d_ff padded to a 128 multiple, zero-padded weights)
        w1, b1 = _init_linear(lk[8], d_model, d_ff)
        w2, b2 = _init_linear(lk[9], d_ff, d_model)
        per_layer["ff_w1"].append(pad2(w1, Dp, Fp, jnp.bfloat16))
        per_layer["ff_b1"].append(padrow(b1, Fp))
        per_layer["ff_w2"].append(pad2(w2, Fp, Dp, jnp.bfloat16))
        per_layer["ff_b2"].append(padrow(b2, Dp))
        per_layer["ln3_g"].append(padrow(ones_d, Dp))
        per_layer["ln3_b"].append(padrow(zeros_d, Dp))

    for name, lst in per_layer.items():
        params[name] = jnp.stack(lst, axis=0)
    return params


# ----------------------------------------------------------------------------
# Main
# ----------------------------------------------------------------------------

if __name__ == "__main__":
    vocab_size = 50
    d_model = 32
    num_heads = 4
    num_layers = 2
    d_ff = 64
    max_len = 64
    B, S = 2, 8

    key = jax.random.PRNGKey(0)
    k_tok, k_enc, k_par = jax.random.split(key, 3)

    params = init_params(k_par, vocab_size, d_model, num_heads, num_layers,
                         d_ff, max_len)

    tokens = jax.random.randint(k_tok, (B, S), 0, vocab_size, dtype=jnp.int32)
    enc_output = jax.random.normal(k_enc, (B, S, d_model), jnp.float32)

    # tgt mask: causal [B, 1, S, S]; src mask: all-ones [B, 1, 1, S]
    causal = jnp.tril(jnp.ones((S, S), jnp.float32))
    tgt_mask = jnp.broadcast_to(causal[None, None, :, :], (B, 1, S, S))
    src_mask = jnp.ones((B, 1, 1, S), jnp.float32)

    fwd = jax.jit(functools.partial(decoder_forward, num_heads=num_heads,
                                    num_layers=num_layers, d_model=d_model,
                                    vocab_size=vocab_size))
    logits = fwd(params, tokens, enc_output, src_mask, tgt_mask)
    jax.block_until_ready(logits)

    assert logits.shape == (B, S, vocab_size)
    assert bool(jnp.all(jnp.isfinite(logits)))
    print("KERNEL_OK")
</pallas_src>

<mosaic_0001>
module attributes {stable_mosaic.version = 11 : i64} {
  func.func @_decoder_kernel(%arg0: i32, %arg1: memref<1x8x128xf32, #tpu.memory_space<vmem>>, %arg2: memref<1x8x128xbf16, #tpu.memory_space<vmem>>, %arg3: memref<1x8x8xf32, #tpu.memory_space<vmem>>, %arg4: memref<1x8x8xf32, #tpu.memory_space<vmem>>, %arg5: memref<2x128x96xbf16, #tpu.memory_space<vmem>>, %arg6: memref<2x1x96xf32, #tpu.memory_space<vmem>>, %arg7: memref<2x32x128xf32, #tpu.memory_space<vmem>>, %arg8: memref<2x1x128xf32, #tpu.memory_space<vmem>>, %arg9: memref<2x1x128xf32, #tpu.memory_space<vmem>>, %arg10: memref<2x1x128xf32, #tpu.memory_space<vmem>>, %arg11: memref<2x128x32xbf16, #tpu.memory_space<vmem>>, %arg12: memref<2x1x32xf32, #tpu.memory_space<vmem>>, %arg13: memref<2x128x64xbf16, #tpu.memory_space<vmem>>, %arg14: memref<2x1x64xf32, #tpu.memory_space<vmem>>, %arg15: memref<2x32x128xf32, #tpu.memory_space<vmem>>, %arg16: memref<2x1x128xf32, #tpu.memory_space<vmem>>, %arg17: memref<2x1x128xf32, #tpu.memory_space<vmem>>, %arg18: memref<2x1x128xf32, #tpu.memory_space<vmem>>, %arg19: memref<2x128x128xbf16, #tpu.memory_space<vmem>>, %arg20: memref<2x1x128xf32, #tpu.memory_space<vmem>>, %arg21: memref<2x128x128xbf16, #tpu.memory_space<vmem>>, %arg22: memref<2x1x128xf32, #tpu.memory_space<vmem>>, %arg23: memref<2x1x128xf32, #tpu.memory_space<vmem>>, %arg24: memref<2x1x128xf32, #tpu.memory_space<vmem>>, %arg25: memref<1x128xf32, #tpu.memory_space<vmem>>, %arg26: memref<1x128xf32, #tpu.memory_space<vmem>>, %arg27: memref<128x128xbf16, #tpu.memory_space<vmem>>, %arg28: memref<1x128xf32, #tpu.memory_space<vmem>>, %arg29: memref<1x8x128xf32, #tpu.memory_space<vmem>>) attributes {dimension_semantics = [#tpu.dimension_semantics<parallel>], iteration_bounds = array<i64: 2>, scalar_prefetch = 0 : i64, scratch_operands = 0 : i64, tpu.core_type = #tpu.core_type<tc>, window_params = [{transform_indices = @transform_0, window_bounds = array<i64: 1, 8, 128>}, {transform_indices = @transform_1, window_bounds = array<i64: 1, 8, 128>}, {transform_indices = @transform_2, window_bounds = array<i64: 1, 8, 8>}, {transform_indices = @transform_3, window_bounds = array<i64: 1, 8, 8>}, {pipeline_mode = #tpu.pipeline_mode<synchronous>, transform_indices = @transform_4, window_bounds = array<i64: 2, 128, 96>}, {pipeline_mode = #tpu.pipeline_mode<synchronous>, transform_indices = @transform_5, window_bounds = array<i64: 2, 1, 96>}, {pipeline_mode = #tpu.pipeline_mode<synchronous>, transform_indices = @transform_6, window_bounds = array<i64: 2, 32, 128>}, {pipeline_mode = #tpu.pipeline_mode<synchronous>, transform_indices = @transform_7, window_bounds = array<i64: 2, 1, 128>}, {pipeline_mode = #tpu.pipeline_mode<synchronous>, transform_indices = @transform_8, window_bounds = array<i64: 2, 1, 128>}, {pipeline_mode = #tpu.pipeline_mode<synchronous>, transform_indices = @transform_9, window_bounds = array<i64: 2, 1, 128>}, {pipeline_mode = #tpu.pipeline_mode<synchronous>, transform_indices = @transform_10, window_bounds = array<i64: 2, 128, 32>}, {pipeline_mode = #tpu.pipeline_mode<synchronous>, transform_indices = @transform_11, window_bounds = array<i64: 2, 1, 32>}, {pipeline_mode = #tpu.pipeline_mode<synchronous>, transform_indices = @transform_12, window_bounds = array<i64: 2, 128, 64>}, {pipeline_mode = #tpu.pipeline_mode<synchronous>, transform_indices = @transform_13, window_bounds = array<i64: 2, 1, 64>}, {pipeline_mode = #tpu.pipeline_mode<synchronous>, transform_indices = @transform_14, window_bounds = array<i64: 2, 32, 128>}, {pipeline_mode = #tpu.pipeline_mode<synchronous>, transform_indices = @transform_15, window_bounds = array<i64: 2, 1, 128>}, {pipeline_mode = #tpu.pipeline_mode<synchronous>, transform_indices = @transform_16, window_bounds = array<i64: 2, 1, 128>}, {pipeline_mode = #tpu.pipeline_mode<synchronous>, transform_indices = @transform_17, window_bounds = array<i64: 2, 1, 128>}, {pipeline_mode = #tpu.pipeline_mode<synchronous>, transform_indices = @transform_18, window_bounds = array<i64: 2, 128, 128>}, {pipeline_mode = #tpu.pipeline_mode<synchronous>, transform_indices = @transform_19, window_bounds = array<i64: 2, 1, 128>}, {pipeline_mode = #tpu.pipeline_mode<synchronous>, transform_indices = @transform_20, window_bounds = array<i64: 2, 128, 128>}, {pipeline_mode = #tpu.pipeline_mode<synchronous>, transform_indices = @transform_21, window_bounds = array<i64: 2, 1, 128>}, {pipeline_mode = #tpu.pipeline_mode<synchronous>, transform_indices = @transform_22, window_bounds = array<i64: 2, 1, 128>}, {pipeline_mode = #tpu.pipeline_mode<synchronous>, transform_indices = @transform_23, window_bounds = array<i64: 2, 1, 128>}, {pipeline_mode = #tpu.pipeline_mode<synchronous>, transform_indices = @transform_24, window_bounds = array<i64: 1, 128>}, {pipeline_mode = #tpu.pipeline_mode<synchronous>, transform_indices = @transform_25, window_bounds = array<i64: 1, 128>}, {pipeline_mode = #tpu.pipeline_mode<synchronous>, transform_indices = @transform_26, window_bounds = array<i64: 128, 128>}, {pipeline_mode = #tpu.pipeline_mode<synchronous>, transform_indices = @transform_27, window_bounds = array<i64: 1, 128>}, {transform_indices = @transform_28, window_bounds = array<i64: 1, 8, 128>}]} {
    %0 = tpu.iota {dimensions = array<i32: 1>} : vector<1x128xi32>
    %c32_i32 = arith.constant 32 : i32
    %1 = vector.broadcast %c32_i32 : i32 to vector<1x128xi32>
    %2 = arith.cmpi slt, %0, %1 : vector<1x128xi32>
    %3 = arith.extui %2 : vector<1x128xi1> to vector<1x128xi32>
    %4 = arith.sitofp %3 : vector<1x128xi32> to vector<1x128xf32>
    %c0 = arith.constant 0 : index
    %c0_0 = arith.constant 0 : index
    %c0_1 = arith.constant 0 : index
    %5 = vector.load %arg1[%c0, %c0_0, %c0_1] : memref<1x8x128xf32, #tpu.memory_space<vmem>>, vector<1x8x128xf32>
    %6 = vector.shape_cast %5 : vector<1x8x128xf32> to vector<8x128xf32>
    %c0_2 = arith.constant 0 : index
    %c0_3 = arith.constant 0 : index
    %c0_4 = arith.constant 0 : index
    %7 = vector.load %arg2[%c0_2, %c0_3, %c0_4] : memref<1x8x128xbf16, #tpu.memory_space<vmem>>, vector<1x8x128xbf16>
    %8 = vector.shape_cast %7 : vector<1x8x128xbf16> to vector<8x128xbf16>
    %c0_5 = arith.constant 0 : index
    %c0_6 = arith.constant 0 : index
    %c0_7 = arith.constant 0 : index
    %9 = vector.load %arg3[%c0_5, %c0_6, %c0_7] : memref<1x8x8xf32, #tpu.memory_space<vmem>>, vector<1x8x8xf32>
    %10 = vector.shape_cast %9 : vector<1x8x8xf32> to vector<8x8xf32>
    %c0_8 = arith.constant 0 : index
    %c0_9 = arith.constant 0 : index
    %c0_10 = arith.constant 0 : index
    %11 = vector.load %arg4[%c0_8, %c0_9, %c0_10] : memref<1x8x8xf32, #tpu.memory_space<vmem>>, vector<1x8x8xf32>
    %12 = vector.shape_cast %11 : vector<1x8x8xf32> to vector<8x8xf32>
    %13 = arith.truncf %6 : vector<8x128xf32> to vector<8x128xbf16>
    %c0_11 = arith.constant 0 : index
    %c0_12 = arith.constant 0 : index
    %c0_13 = arith.constant 0 : index
    %14 = vector.load %arg5[%c0_11, %c0_12, %c0_13] : memref<2x128x96xbf16, #tpu.memory_space<vmem>>, vector<1x128x96xbf16>
    %15 = vector.shape_cast %14 : vector<1x128x96xbf16> to vector<128x96xbf16>
    %cst = arith.constant dense<0.000000e+00> : vector<8x96xf32>
    %16 = tpu.matmul %13, %15, %cst {dimension_numbers = #tpu.dot_dimension_numbers<[1], [0], [0], [1], [0, 0, 1, 1], [], []>} : vector<8x128xbf16>, vector<128x96xbf16>, vector<8x96xf32> -> vector<8x96xf32>
    %c0_14 = arith.constant 0 : index
    %c0_15 = arith.constant 0 : index
    %c0_16 = arith.constant 0 : index
    %17 = vector.load %arg6[%c0_14, %c0_15, %c0_16] : memref<2x1x96xf32, #tpu.memory_space<vmem>>, vector<1x1x96xf32>
    %18 = vector.shape_cast %17 : vector<1x1x96xf32> to vector<1x96xf32>
    %19 = vector.broadcast %18 : vector<1x96xf32> to vector<8x96xf32>
    %20 = arith.addf %16, %19 : vector<8x96xf32>
    %21 = vector.extract_strided_slice %20 {offsets = [0, 0], sizes = [8, 32], strides = [1, 1]} : vector<8x96xf32> to vector<8x32xf32>
    %22 = vector.extract_strided_slice %20 {offsets = [0, 32], sizes = [8, 32], strides = [1, 1]} : vector<8x96xf32> to vector<8x32xf32>
    %23 = vector.extract_strided_slice %20 {offsets = [0, 64], sizes = [8, 32], strides = [1, 1]} : vector<8x96xf32> to vector<8x32xf32>
    %c0_17 = arith.constant 0 : index
    %c0_18 = arith.constant 0 : index
    %c0_19 = arith.constant 0 : index
    %24 = vector.load %arg7[%c0_17, %c0_18, %c0_19] : memref<2x32x128xf32, #tpu.memory_space<vmem>>, vector<1x32x128xf32>
    %25 = vector.shape_cast %24 : vector<1x32x128xf32> to vector<32x128xf32>
    %26 = vector.extract_strided_slice %21 {offsets = [0, 0], sizes = [8, 8], strides = [1, 1]} : vector<8x32xf32> to vector<8x8xf32>
    %27 = vector.extract_strided_slice %22 {offsets = [0, 0], sizes = [8, 8], strides = [1, 1]} : vector<8x32xf32> to vector<8x8xf32>
    %28 = tpu.transpose %27, [1, 0] : vector<8x8xf32> -> vector<8x8xf32>
    %cst_20 = arith.constant dense<0.000000e+00> : vector<8x8xf32>
    %29 = tpu.matmul %26, %28, %cst_20 {dimension_numbers = #tpu.dot_dimension_numbers<[1], [0], [0], [1], [0, 0, 1, 1], [], []>} : vector<8x8xf32>, vector<8x8xf32>, vector<8x8xf32> -> vector<8x8xf32>
    %30 = arith.addf %29, %10 : vector<8x8xf32>
    %cst_21 = arith.constant dense<0xFF800000> : vector<8xf32>
    %31 = vector.multi_reduction <maximumf>, %30, %cst_21 [1] : vector<8x8xf32> to vector<8xf32>
    %32 = vector.shape_cast %31 : vector<8xf32> to vector<8x1xf32>
    %33 = vector.broadcast %32 : vector<8x1xf32> to vector<8x8xf32>
    %34 = arith.subf %30, %33 : vector<8x8xf32>
    %35 = math.exp %34 : vector<8x8xf32>
    %cst_22 = arith.constant dense<0.000000e+00> : vector<8xf32>
    %36 = vector.multi_reduction <add>, %35, %cst_22 [1] : vector<8x8xf32> to vector<8xf32>
    %37 = vector.shape_cast %36 : vector<8xf32> to vector<8x1xf32>
    %38 = vector.broadcast %37 : vector<8x1xf32> to vector<8x8xf32>
    %39 = arith.divf %35, %38 : vector<8x8xf32>
    %40 = vector.extract_strided_slice %23 {offsets = [0, 0], sizes = [8, 8], strides = [1, 1]} : vector<8x32xf32> to vector<8x8xf32>
    %cst_23 = arith.constant dense<0.000000e+00> : vector<8x8xf32>
    %41 = tpu.matmul %39, %40, %cst_23 {dimension_numbers = #tpu.dot_dimension_numbers<[1], [0], [0], [1], [0, 0, 1, 1], [], []>} : vector<8x8xf32>, vector<8x8xf32>, vector<8x8xf32> -> vector<8x8xf32>
    %42 = vector.extract_strided_slice %25 {offsets = [0, 0], sizes = [8, 128], strides = [1, 1]} : vector<32x128xf32> to vector<8x128xf32>
    %cst_24 = arith.constant dense<0.000000e+00> : vector<8x128xf32>
    %43 = tpu.matmul %41, %42, %cst_24 {dimension_numbers = #tpu.dot_dimension_numbers<[1], [0], [0], [1], [0, 0, 1, 1], [], []>} : vector<8x8xf32>, vector<8x128xf32>, vector<8x128xf32> -> vector<8x128xf32>
    %44 = vector.extract_strided_slice %21 {offsets = [0, 8], sizes = [8, 8], strides = [1, 1]} : vector<8x32xf32> to vector<8x8xf32>
    %45 = vector.extract_strided_slice %22 {offsets = [0, 8], sizes = [8, 8], strides = [1, 1]} : vector<8x32xf32> to vector<8x8xf32>
    %46 = tpu.transpose %45, [1, 0] : vector<8x8xf32> -> vector<8x8xf32>
    %cst_25 = arith.constant dense<0.000000e+00> : vector<8x8xf32>
    %47 = tpu.matmul %44, %46, %cst_25 {dimension_numbers = #tpu.dot_dimension_numbers<[1], [0], [0], [1], [0, 0, 1, 1], [], []>} : vector<8x8xf32>, vector<8x8xf32>, vector<8x8xf32> -> vector<8x8xf32>
    %48 = arith.addf %47, %10 : vector<8x8xf32>
    %cst_26 = arith.constant dense<0xFF800000> : vector<8xf32>
    %49 = vector.multi_reduction <maximumf>, %48, %cst_26 [1] : vector<8x8xf32> to vector<8xf32>
    %50 = vector.shape_cast %49 : vector<8xf32> to vector<8x1xf32>
    %51 = vector.broadcast %50 : vector<8x1xf32> to vector<8x8xf32>
    %52 = arith.subf %48, %51 : vector<8x8xf32>
    %53 = math.exp %52 : vector<8x8xf32>
    %cst_27 = arith.constant dense<0.000000e+00> : vector<8xf32>
    %54 = vector.multi_reduction <add>, %53, %cst_27 [1] : vector<8x8xf32> to vector<8xf32>
    %55 = vector.shape_cast %54 : vector<8xf32> to vector<8x1xf32>
    %56 = vector.broadcast %55 : vector<8x1xf32> to vector<8x8xf32>
    %57 = arith.divf %53, %56 : vector<8x8xf32>
    %58 = vector.extract_strided_slice %23 {offsets = [0, 8], sizes = [8, 8], strides = [1, 1]} : vector<8x32xf32> to vector<8x8xf32>
    %cst_28 = arith.constant dense<0.000000e+00> : vector<8x8xf32>
    %59 = tpu.matmul %57, %58, %cst_28 {dimension_numbers = #tpu.dot_dimension_numbers<[1], [0], [0], [1], [0, 0, 1, 1], [], []>} : vector<8x8xf32>, vector<8x8xf32>, vector<8x8xf32> -> vector<8x8xf32>
    %60 = vector.extract_strided_slice %25 {offsets = [8, 0], sizes = [8, 128], strides = [1, 1]} : vector<32x128xf32> to vector<8x128xf32>
    %cst_29 = arith.constant dense<0.000000e+00> : vector<8x128xf32>
    %61 = tpu.matmul %59, %60, %cst_29 {dimension_numbers = #tpu.dot_dimension_numbers<[1], [0], [0], [1], [0, 0, 1, 1], [], []>} : vector<8x8xf32>, vector<8x128xf32>, vector<8x128xf32> -> vector<8x128xf32>
    %62 = arith.addf %43, %61 : vector<8x128xf32>
    %63 = vector.extract_strided_slice %21 {offsets = [0, 16], sizes = [8, 8], strides = [1, 1]} : vector<8x32xf32> to vector<8x8xf32>
    %64 = vector.extract_strided_slice %22 {offsets = [0, 16], sizes = [8, 8], strides = [1, 1]} : vector<8x32xf32> to vector<8x8xf32>
    %65 = tpu.transpose %64, [1, 0] : vector<8x8xf32> -> vector<8x8xf32>
    %cst_30 = arith.constant dense<0.000000e+00> : vector<8x8xf32>
    %66 = tpu.matmul %63, %65, %cst_30 {dimension_numbers = #tpu.dot_dimension_numbers<[1], [0], [0], [1], [0, 0, 1, 1], [], []>} : vector<8x8xf32>, vector<8x8xf32>, vector<8x8xf32> -> vector<8x8xf32>
    %67 = arith.addf %66, %10 : vector<8x8xf32>
    %cst_31 = arith.constant dense<0xFF800000> : vector<8xf32>
    %68 = vector.multi_reduction <maximumf>, %67, %cst_31 [1] : vector<8x8xf32> to vector<8xf32>
    %69 = vector.shape_cast %68 : vector<8xf32> to vector<8x1xf32>
    %70 = vector.broadcast %69 : vector<8x1xf32> to vector<8x8xf32>
    %71 = arith.subf %67, %70 : vector<8x8xf32>
    %72 = math.exp %71 : vector<8x8xf32>
    %cst_32 = arith.constant dense<0.000000e+00> : vector<8xf32>
    %73 = vector.multi_reduction <add>, %72, %cst_32 [1] : vector<8x8xf32> to vector<8xf32>
    %74 = vector.shape_cast %73 : vector<8xf32> to vector<8x1xf32>
    %75 = vector.broadcast %74 : vector<8x1xf32> to vector<8x8xf32>
    %76 = arith.divf %72, %75 : vector<8x8xf32>
    %77 = vector.extract_strided_slice %23 {offsets = [0, 16], sizes = [8, 8], strides = [1, 1]} : vector<8x32xf32> to vector<8x8xf32>
    %cst_33 = arith.constant dense<0.000000e+00> : vector<8x8xf32>
    %78 = tpu.matmul %76, %77, %cst_33 {dimension_numbers = #tpu.dot_dimension_numbers<[1], [0], [0], [1], [0, 0, 1, 1], [], []>} : vector<8x8xf32>, vector<8x8xf32>, vector<8x8xf32> -> vector<8x8xf32>
    %79 = vector.extract_strided_slice %25 {offsets = [16, 0], sizes = [8, 128], strides = [1, 1]} : vector<32x128xf32> to vector<8x128xf32>
    %cst_34 = arith.constant dense<0.000000e+00> : vector<8x128xf32>
    %80 = tpu.matmul %78, %79, %cst_34 {dimension_numbers = #tpu.dot_dimension_numbers<[1], [0], [0], [1], [0, 0, 1, 1], [], []>} : vector<8x8xf32>, vector<8x128xf32>, vector<8x128xf32> -> vector<8x128xf32>
    %81 = arith.addf %62, %80 : vector<8x128xf32>
    %82 = vector.extract_strided_slice %21 {offsets = [0, 24], sizes = [8, 8], strides = [1, 1]} : vector<8x32xf32> to vector<8x8xf32>
    %83 = vector.extract_strided_slice %22 {offsets = [0, 24], sizes = [8, 8], strides = [1, 1]} : vector<8x32xf32> to vector<8x8xf32>
    %84 = tpu.transpose %83, [1, 0] : vector<8x8xf32> -> vector<8x8xf32>
    %cst_35 = arith.constant dense<0.000000e+00> : vector<8x8xf32>
    %85 = tpu.matmul %82, %84, %cst_35 {dimension_numbers = #tpu.dot_dimension_numbers<[1], [0], [0], [1], [0, 0, 1, 1], [], []>} : vector<8x8xf32>, vector<8x8xf32>, vector<8x8xf32> -> vector<8x8xf32>
    %86 = arith.addf %85, %10 : vector<8x8xf32>
    %cst_36 = arith.constant dense<0xFF800000> : vector<8xf32>
    %87 = vector.multi_reduction <maximumf>, %86, %cst_36 [1] : vector<8x8xf32> to vector<8xf32>
    %88 = vector.shape_cast %87 : vector<8xf32> to vector<8x1xf32>
    %89 = vector.broadcast %88 : vector<8x1xf32> to vector<8x8xf32>
    %90 = arith.subf %86, %89 : vector<8x8xf32>
    %91 = math.exp %90 : vector<8x8xf32>
    %cst_37 = arith.constant dense<0.000000e+00> : vector<8xf32>
    %92 = vector.multi_reduction <add>, %91, %cst_37 [1] : vector<8x8xf32> to vector<8xf32>
    %93 = vector.shape_cast %92 : vector<8xf32> to vector<8x1xf32>
    %94 = vector.broadcast %93 : vector<8x1xf32> to vector<8x8xf32>
    %95 = arith.divf %91, %94 : vector<8x8xf32>
    %96 = vector.extract_strided_slice %23 {offsets = [0, 24], sizes = [8, 8], strides = [1, 1]} : vector<8x32xf32> to vector<8x8xf32>
    %cst_38 = arith.constant dense<0.000000e+00> : vector<8x8xf32>
    %97 = tpu.matmul %95, %96, %cst_38 {dimension_numbers = #tpu.dot_dimension_numbers<[1], [0], [0], [1], [0, 0, 1, 1], [], []>} : vector<8x8xf32>, vector<8x8xf32>, vector<8x8xf32> -> vector<8x8xf32>
    %98 = vector.extract_strided_slice %25 {offsets = [24, 0], sizes = [8, 128], strides = [1, 1]} : vector<32x128xf32> to vector<8x128xf32>
    %cst_39 = arith.constant dense<0.000000e+00> : vector<8x128xf32>
    %99 = tpu.matmul %97, %98, %cst_39 {dimension_numbers = #tpu.dot_dimension_numbers<[1], [0], [0], [1], [0, 0, 1, 1], [], []>} : vector<8x8xf32>, vector<8x128xf32>, vector<8x128xf32> -> vector<8x128xf32>
    %100 = arith.addf %81, %99 : vector<8x128xf32>
    %c0_40 = arith.constant 0 : index
    %c0_41 = arith.constant 0 : index
    %c0_42 = arith.constant 0 : index
    %101 = vector.load %arg8[%c0_40, %c0_41, %c0_42] : memref<2x1x128xf32, #tpu.memory_space<vmem>>, vector<1x1x128xf32>
    %102 = vector.shape_cast %101 : vector<1x1x128xf32> to vector<1x128xf32>
    %103 = vector.broadcast %102 : vector<1x128xf32> to vector<8x128xf32>
    %104 = arith.addf %100, %103 : vector<8x128xf32>
    %105 = arith.addf %104, %6 : vector<8x128xf32>
    %c0_43 = arith.constant 0 : index
    %c0_44 = arith.constant 0 : index
    %c0_45 = arith.constant 0 : index
    %106 = vector.load %arg9[%c0_43, %c0_44, %c0_45] : memref<2x1x128xf32, #tpu.memory_space<vmem>>, vector<1x1x128xf32>
    %107 = vector.shape_cast %106 : vector<1x1x128xf32> to vector<1x128xf32>
    %c0_46 = arith.constant 0 : index
    %c0_47 = arith.constant 0 : index
    %c0_48 = arith.constant 0 : index
    %108 = vector.load %arg10[%c0_46, %c0_47, %c0_48] : memref<2x1x128xf32, #tpu.memory_space<vmem>>, vector<1x1x128xf32>
    %109 = vector.shape_cast %108 : vector<1x1x128xf32> to vector<1x128xf32>
    %110 = vector.broadcast %4 : vector<1x128xf32> to vector<8x128xf32>
    %111 = arith.mulf %105, %110 : vector<8x128xf32>
    %cst_49 = arith.constant dense<0.000000e+00> : vector<8xf32>
    %112 = vector.multi_reduction <add>, %111, %cst_49 [1] : vector<8x128xf32> to vector<8xf32>
    %113 = vector.shape_cast %112 : vector<8xf32> to vector<8x1xf32>
    %cst_50 = arith.constant 3.125000e-02 : f32
    %114 = vector.broadcast %cst_50 : f32 to vector<8x1xf32>
    %115 = arith.mulf %113, %114 : vector<8x1xf32>
    %116 = vector.broadcast %115 : vector<8x1xf32> to vector<8x128xf32>
    %117 = arith.subf %111, %116 : vector<8x128xf32>
    %118 = vector.broadcast %4 : vector<1x128xf32> to vector<8x128xf32>
    %119 = arith.mulf %117, %118 : vector<8x128xf32>
    %120 = arith.mulf %119, %119 : vector<8x128xf32>
    %cst_51 = arith.constant dense<0.000000e+00> : vector<8xf32>
    %121 = vector.multi_reduction <add>, %120, %cst_51 [1] : vector<8x128xf32> to vector<8xf32>
    %122 = vector.shape_cast %121 : vector<8xf32> to vector<8x1xf32>
    %cst_52 = arith.constant 3.125000e-02 : f32
    %123 = vector.broadcast %cst_52 : f32 to vector<8x1xf32>
    %124 = arith.mulf %122, %123 : vector<8x1xf32>
    %cst_53 = arith.constant 9.99999974E-6 : f32
    %125 = vector.broadcast %cst_53 : f32 to vector<8x1xf32>
    %126 = arith.addf %124, %125 : vector<8x1xf32>
    %127 = math.rsqrt %126 : vector<8x1xf32>
    %128 = vector.broadcast %127 : vector<8x1xf32> to vector<8x128xf32>
    %129 = arith.mulf %119, %128 : vector<8x128xf32>
    %130 = vector.broadcast %107 : vector<1x128xf32> to vector<8x128xf32>
    %131 = arith.mulf %129, %130 : vector<8x128xf32>
    %132 = vector.broadcast %109 : vector<1x128xf32> to vector<8x128xf32>
    %133 = arith.addf %131, %132 : vector<8x128xf32>
    %134 = arith.truncf %133 : vector<8x128xf32> to vector<8x128xbf16>
    %c0_54 = arith.constant 0 : index
    %c0_55 = arith.constant 0 : index
    %c0_56 = arith.constant 0 : index
    %135 = vector.load %arg11[%c0_54, %c0_55, %c0_56] : memref<2x128x32xbf16, #tpu.memory_space<vmem>>, vector<1x128x32xbf16>
    %136 = vector.shape_cast %135 : vector<1x128x32xbf16> to vector<128x32xbf16>
    %cst_57 = arith.constant dense<0.000000e+00> : vector<8x32xf32>
    %137 = tpu.matmul %134, %136, %cst_57 {dimension_numbers = #tpu.dot_dimension_numbers<[1], [0], [0], [1], [0, 0, 1, 1], [], []>} : vector<8x128xbf16>, vector<128x32xbf16>, vector<8x32xf32> -> vector<8x32xf32>
    %c0_58 = arith.constant 0 : index
    %c0_59 = arith.constant 0 : index
    %c0_60 = arith.constant 0 : index
    %138 = vector.load %arg12[%c0_58, %c0_59, %c0_60] : memref<2x1x32xf32, #tpu.memory_space<vmem>>, vector<1x1x32xf32>
    %139 = vector.shape_cast %138 : vector<1x1x32xf32> to vector<1x32xf32>
    %140 = vector.broadcast %139 : vector<1x32xf32> to vector<8x32xf32>
    %141 = arith.addf %137, %140 : vector<8x32xf32>
    %c0_61 = arith.constant 0 : index
    %c0_62 = arith.constant 0 : index
    %c0_63 = arith.constant 0 : index
    %142 = vector.load %arg13[%c0_61, %c0_62, %c0_63] : memref<2x128x64xbf16, #tpu.memory_space<vmem>>, vector<1x128x64xbf16>
    %143 = vector.shape_cast %142 : vector<1x128x64xbf16> to vector<128x64xbf16>
    %cst_64 = arith.constant dense<0.000000e+00> : vector<8x64xf32>
    %144 = tpu.matmul %8, %143, %cst_64 {dimension_numbers = #tpu.dot_dimension_numbers<[1], [0], [0], [1], [0, 0, 1, 1], [], []>} : vector<8x128xbf16>, vector<128x64xbf16>, vector<8x64xf32> -> vector<8x64xf32>
    %c0_65 = arith.constant 0 : index
    %c0_66 = arith.constant 0 : index
    %c0_67 = arith.constant 0 : index
    %145 = vector.load %arg14[%c0_65, %c0_66, %c0_67] : memref<2x1x64xf32, #tpu.memory_space<vmem>>, vector<1x1x64xf32>
    %146 = vector.shape_cast %145 : vector<1x1x64xf32> to vector<1x64xf32>
    %147 = vector.broadcast %146 : vector<1x64xf32> to vector<8x64xf32>
    %148 = arith.addf %144, %147 : vector<8x64xf32>
    %149 = vector.extract_strided_slice %148 {offsets = [0, 0], sizes = [8, 32], strides = [1, 1]} : vector<8x64xf32> to vector<8x32xf32>
    %150 = vector.extract_strided_slice %148 {offsets = [0, 32], sizes = [8, 32], strides = [1, 1]} : vector<8x64xf32> to vector<8x32xf32>
    %c0_68 = arith.constant 0 : index
    %c0_69 = arith.constant 0 : index
    %c0_70 = arith.constant 0 : index
    %151 = vector.load %arg15[%c0_68, %c0_69, %c0_70] : memref<2x32x128xf32, #tpu.memory_space<vmem>>, vector<1x32x128xf32>
    %152 = vector.shape_cast %151 : vector<1x32x128xf32> to vector<32x128xf32>
    %153 = vector.extract_strided_slice %141 {offsets = [0, 0], sizes = [8, 8], strides = [1, 1]} : vector<8x32xf32> to vector<8x8xf32>
    %154 = vector.extract_strided_slice %149 {offsets = [0, 0], sizes = [8, 8], strides = [1, 1]} : vector<8x32xf32> to vector<8x8xf32>
    %155 = tpu.transpose %154, [1, 0] : vector<8x8xf32> -> vector<8x8xf32>
    %cst_71 = arith.constant dense<0.000000e+00> : vector<8x8xf32>
    %156 = tpu.matmul %153, %155, %cst_71 {dimension_numbers = #tpu.dot_dimension_numbers<[1], [0], [0], [1], [0, 0, 1, 1], [], []>} : vector<8x8xf32>, vector<8x8xf32>, vector<8x8xf32> -> vector<8x8xf32>
    %157 = arith.addf %156, %12 : vector<8x8xf32>
    %cst_72 = arith.constant dense<0xFF800000> : vector<8xf32>
    %158 = vector.multi_reduction <maximumf>, %157, %cst_72 [1] : vector<8x8xf32> to vector<8xf32>
    %159 = vector.shape_cast %158 : vector<8xf32> to vector<8x1xf32>
    %160 = vector.broadcast %159 : vector<8x1xf32> to vector<8x8xf32>
    %161 = arith.subf %157, %160 : vector<8x8xf32>
    %162 = math.exp %161 : vector<8x8xf32>
    %cst_73 = arith.constant dense<0.000000e+00> : vector<8xf32>
    %163 = vector.multi_reduction <add>, %162, %cst_73 [1] : vector<8x8xf32> to vector<8xf32>
    %164 = vector.shape_cast %163 : vector<8xf32> to vector<8x1xf32>
    %165 = vector.broadcast %164 : vector<8x1xf32> to vector<8x8xf32>
    %166 = arith.divf %162, %165 : vector<8x8xf32>
    %167 = vector.extract_strided_slice %150 {offsets = [0, 0], sizes = [8, 8], strides = [1, 1]} : vector<8x32xf32> to vector<8x8xf32>
    %cst_74 = arith.constant dense<0.000000e+00> : vector<8x8xf32>
    %168 = tpu.matmul %166, %167, %cst_74 {dimension_numbers = #tpu.dot_dimension_numbers<[1], [0], [0], [1], [0, 0, 1, 1], [], []>} : vector<8x8xf32>, vector<8x8xf32>, vector<8x8xf32> -> vector<8x8xf32>
    %169 = vector.extract_strided_slice %152 {offsets = [0, 0], sizes = [8, 128], strides = [1, 1]} : vector<32x128xf32> to vector<8x128xf32>
    %cst_75 = arith.constant dense<0.000000e+00> : vector<8x128xf32>
    %170 = tpu.matmul %168, %169, %cst_75 {dimension_numbers = #tpu.dot_dimension_numbers<[1], [0], [0], [1], [0, 0, 1, 1], [], []>} : vector<8x8xf32>, vector<8x128xf32>, vector<8x128xf32> -> vector<8x128xf32>
    %171 = vector.extract_strided_slice %141 {offsets = [0, 8], sizes = [8, 8], strides = [1, 1]} : vector<8x32xf32> to vector<8x8xf32>
    %172 = vector.extract_strided_slice %149 {offsets = [0, 8], sizes = [8, 8], strides = [1, 1]} : vector<8x32xf32> to vector<8x8xf32>
    %173 = tpu.transpose %172, [1, 0] : vector<8x8xf32> -> vector<8x8xf32>
    %cst_76 = arith.constant dense<0.000000e+00> : vector<8x8xf32>
    %174 = tpu.matmul %171, %173, %cst_76 {dimension_numbers = #tpu.dot_dimension_numbers<[1], [0], [0], [1], [0, 0, 1, 1], [], []>} : vector<8x8xf32>, vector<8x8xf32>, vector<8x8xf32> -> vector<8x8xf32>
    %175 = arith.addf %174, %12 : vector<8x8xf32>
    %cst_77 = arith.constant dense<0xFF800000> : vector<8xf32>
    %176 = vector.multi_reduction <maximumf>, %175, %cst_77 [1] : vector<8x8xf32> to vector<8xf32>
    %177 = vector.shape_cast %176 : vector<8xf32> to vector<8x1xf32>
    %178 = vector.broadcast %177 : vector<8x1xf32> to vector<8x8xf32>
    %179 = arith.subf %175, %178 : vector<8x8xf32>
    %180 = math.exp %179 : vector<8x8xf32>
    %cst_78 = arith.constant dense<0.000000e+00> : vector<8xf32>
    %181 = vector.multi_reduction <add>, %180, %cst_78 [1] : vector<8x8xf32> to vector<8xf32>
    %182 = vector.shape_cast %181 : vector<8xf32> to vector<8x1xf32>
    %183 = vector.broadcast %182 : vector<8x1xf32> to vector<8x8xf32>
    %184 = arith.divf %180, %183 : vector<8x8xf32>
    %185 = vector.extract_strided_slice %150 {offsets = [0, 8], sizes = [8, 8], strides = [1, 1]} : vector<8x32xf32> to vector<8x8xf32>
    %cst_79 = arith.constant dense<0.000000e+00> : vector<8x8xf32>
    %186 = tpu.matmul %184, %185, %cst_79 {dimension_numbers = #tpu.dot_dimension_numbers<[1], [0], [0], [1], [0, 0, 1, 1], [], []>} : vector<8x8xf32>, vector<8x8xf32>, vector<8x8xf32> -> vector<8x8xf32>
    %187 = vector.extract_strided_slice %152 {offsets = [8, 0], sizes = [8, 128], strides = [1, 1]} : vector<32x128xf32> to vector<8x128xf32>
    %cst_80 = arith.constant dense<0.000000e+00> : vector<8x128xf32>
    %188 = tpu.matmul %186, %187, %cst_80 {dimension_numbers = #tpu.dot_dimension_numbers<[1], [0], [0], [1], [0, 0, 1, 1], [], []>} : vector<8x8xf32>, vector<8x128xf32>, vector<8x128xf32> -> vector<8x128xf32>
    %189 = arith.addf %170, %188 : vector<8x128xf32>
    %190 = vector.extract_strided_slice %141 {offsets = [0, 16], sizes = [8, 8], strides = [1, 1]} : vector<8x32xf32> to vector<8x8xf32>
    %191 = vector.extract_strided_slice %149 {offsets = [0, 16], sizes = [8, 8], strides = [1, 1]} : vector<8x32xf32> to vector<8x8xf32>
    %192 = tpu.transpose %191, [1, 0] : vector<8x8xf32> -> vector<8x8xf32>
    %cst_81 = arith.constant dense<0.000000e+00> : vector<8x8xf32>
    %193 = tpu.matmul %190, %192, %cst_81 {dimension_numbers = #tpu.dot_dimension_numbers<[1], [0], [0], [1], [0, 0, 1, 1], [], []>} : vector<8x8xf32>, vector<8x8xf32>, vector<8x8xf32> -> vector<8x8xf32>
    %194 = arith.addf %193, %12 : vector<8x8xf32>
    %cst_82 = arith.constant dense<0xFF800000> : vector<8xf32>
    %195 = vector.multi_reduction <maximumf>, %194, %cst_82 [1] : vector<8x8xf32> to vector<8xf32>
    %196 = vector.shape_cast %195 : vector<8xf32> to vector<8x1xf32>
    %197 = vector.broadcast %196 : vector<8x1xf32> to vector<8x8xf32>
    %198 = arith.subf %194, %197 : vector<8x8xf32>
    %199 = math.exp %198 : vector<8x8xf32>
    %cst_83 = arith.constant dense<0.000000e+00> : vector<8xf32>
    %200 = vector.multi_reduction <add>, %199, %cst_83 [1] : vector<8x8xf32> to vector<8xf32>
    %201 = vector.shape_cast %200 : vector<8xf32> to vector<8x1xf32>
    %202 = vector.broadcast %201 : vector<8x1xf32> to vector<8x8xf32>
    %203 = arith.divf %199, %202 : vector<8x8xf32>
    %204 = vector.extract_strided_slice %150 {offsets = [0, 16], sizes = [8, 8], strides = [1, 1]} : vector<8x32xf32> to vector<8x8xf32>
    %cst_84 = arith.constant dense<0.000000e+00> : vector<8x8xf32>
    %205 = tpu.matmul %203, %204, %cst_84 {dimension_numbers = #tpu.dot_dimension_numbers<[1], [0], [0], [1], [0, 0, 1, 1], [], []>} : vector<8x8xf32>, vector<8x8xf32>, vector<8x8xf32> -> vector<8x8xf32>
    %206 = vector.extract_strided_slice %152 {offsets = [16, 0], sizes = [8, 128], strides = [1, 1]} : vector<32x128xf32> to vector<8x128xf32>
    %cst_85 = arith.constant dense<0.000000e+00> : vector<8x128xf32>
    %207 = tpu.matmul %205, %206, %cst_85 {dimension_numbers = #tpu.dot_dimension_numbers<[1], [0], [0], [1], [0, 0, 1, 1], [], []>} : vector<8x8xf32>, vector<8x128xf32>, vector<8x128xf32> -> vector<8x128xf32>
    %208 = arith.addf %189, %207 : vector<8x128xf32>
    %209 = vector.extract_strided_slice %141 {offsets = [0, 24], sizes = [8, 8], strides = [1, 1]} : vector<8x32xf32> to vector<8x8xf32>
    %210 = vector.extract_strided_slice %149 {offsets = [0, 24], sizes = [8, 8], strides = [1, 1]} : vector<8x32xf32> to vector<8x8xf32>
    %211 = tpu.transpose %210, [1, 0] : vector<8x8xf32> -> vector<8x8xf32>
    %cst_86 = arith.constant dense<0.000000e+00> : vector<8x8xf32>
    %212 = tpu.matmul %209, %211, %cst_86 {dimension_numbers = #tpu.dot_dimension_numbers<[1], [0], [0], [1], [0, 0, 1, 1], [], []>} : vector<8x8xf32>, vector<8x8xf32>, vector<8x8xf32> -> vector<8x8xf32>
    %213 = arith.addf %212, %12 : vector<8x8xf32>
    %cst_87 = arith.constant dense<0xFF800000> : vector<8xf32>
    %214 = vector.multi_reduction <maximumf>, %213, %cst_87 [1] : vector<8x8xf32> to vector<8xf32>
    %215 = vector.shape_cast %214 : vector<8xf32> to vector<8x1xf32>
    %216 = vector.broadcast %215 : vector<8x1xf32> to vector<8x8xf32>
    %217 = arith.subf %213, %216 : vector<8x8xf32>
    %218 = math.exp %217 : vector<8x8xf32>
    %cst_88 = arith.constant dense<0.000000e+00> : vector<8xf32>
    %219 = vector.multi_reduction <add>, %218, %cst_88 [1] : vector<8x8xf32> to vector<8xf32>
    %220 = vector.shape_cast %219 : vector<8xf32> to vector<8x1xf32>
    %221 = vector.broadcast %220 : vector<8x1xf32> to vector<8x8xf32>
    %222 = arith.divf %218, %221 : vector<8x8xf32>
    %223 = vector.extract_strided_slice %150 {offsets = [0, 24], sizes = [8, 8], strides = [1, 1]} : vector<8x32xf32> to vector<8x8xf32>
    %cst_89 = arith.constant dense<0.000000e+00> : vector<8x8xf32>
    %224 = tpu.matmul %222, %223, %cst_89 {dimension_numbers = #tpu.dot_dimension_numbers<[1], [0], [0], [1], [0, 0, 1, 1], [], []>} : vector<8x8xf32>, vector<8x8xf32>, vector<8x8xf32> -> vector<8x8xf32>
    %225 = vector.extract_strided_slice %152 {offsets = [24, 0], sizes = [8, 128], strides = [1, 1]} : vector<32x128xf32> to vector<8x128xf32>
    %cst_90 = arith.constant dense<0.000000e+00> : vector<8x128xf32>
    %226 = tpu.matmul %224, %225, %cst_90 {dimension_numbers = #tpu.dot_dimension_numbers<[1], [0], [0], [1], [0, 0, 1, 1], [], []>} : vector<8x8xf32>, vector<8x128xf32>, vector<8x128xf32> -> vector<8x128xf32>
    %227 = arith.addf %208, %226 : vector<8x128xf32>
    %c0_91 = arith.constant 0 : index
    %c0_92 = arith.constant 0 : index
    %c0_93 = arith.constant 0 : index
    %228 = vector.load %arg16[%c0_91, %c0_92, %c0_93] : memref<2x1x128xf32, #tpu.memory_space<vmem>>, vector<1x1x128xf32>
    %229 = vector.shape_cast %228 : vector<1x1x128xf32> to vector<1x128xf32>
    %230 = vector.broadcast %229 : vector<1x128xf32> to vector<8x128xf32>
    %231 = arith.addf %227, %230 : vector<8x128xf32>
    %232 = arith.addf %231, %133 : vector<8x128xf32>
    %c0_94 = arith.constant 0 : index
    %c0_95 = arith.constant 0 : index
    %c0_96 = arith.constant 0 : index
    %233 = vector.load %arg17[%c0_94, %c0_95, %c0_96] : memref<2x1x128xf32, #tpu.memory_space<vmem>>, vector<1x1x128xf32>
    %234 = vector.shape_cast %233 : vector<1x1x128xf32> to vector<1x128xf32>
    %c0_97 = arith.constant 0 : index
    %c0_98 = arith.constant 0 : index
    %c0_99 = arith.constant 0 : index
    %235 = vector.load %arg18[%c0_97, %c0_98, %c0_99] : memref<2x1x128xf32, #tpu.memory_space<vmem>>, vector<1x1x128xf32>
    %236 = vector.shape_cast %235 : vector<1x1x128xf32> to vector<1x128xf32>
    %237 = vector.broadcast %4 : vector<1x128xf32> to vector<8x128xf32>
    %238 = arith.mulf %232, %237 : vector<8x128xf32>
    %cst_100 = arith.constant dense<0.000000e+00> : vector<8xf32>
    %239 = vector.multi_reduction <add>, %238, %cst_100 [1] : vector<8x128xf32> to vector<8xf32>
    %240 = vector.shape_cast %239 : vector<8xf32> to vector<8x1xf32>
    %cst_101 = arith.constant 3.125000e-02 : f32
    %241 = vector.broadcast %cst_101 : f32 to vector<8x1xf32>
    %242 = arith.mulf %240, %241 : vector<8x1xf32>
    %243 = vector.broadcast %242 : vector<8x1xf32> to vector<8x128xf32>
    %244 = arith.subf %238, %243 : vector<8x128xf32>
    %245 = vector.broadcast %4 : vector<1x128xf32> to vector<8x128xf32>
    %246 = arith.mulf %244, %245 : vector<8x128xf32>
    %247 = arith.mulf %246, %246 : vector<8x128xf32>
    %cst_102 = arith.constant dense<0.000000e+00> : vector<8xf32>
    %248 = vector.multi_reduction <add>, %247, %cst_102 [1] : vector<8x128xf32> to vector<8xf32>
    %249 = vector.shape_cast %248 : vector<8xf32> to vector<8x1xf32>
    %cst_103 = arith.constant 3.125000e-02 : f32
    %250 = vector.broadcast %cst_103 : f32 to vector<8x1xf32>
    %251 = arith.mulf %249, %250 : vector<8x1xf32>
    %cst_104 = arith.constant 9.99999974E-6 : f32
    %252 = vector.broadcast %cst_104 : f32 to vector<8x1xf32>
    %253 = arith.addf %251, %252 : vector<8x1xf32>
    %254 = math.rsqrt %253 : vector<8x1xf32>
    %255 = vector.broadcast %254 : vector<8x1xf32> to vector<8x128xf32>
    %256 = arith.mulf %246, %255 : vector<8x128xf32>
    %257 = vector.broadcast %234 : vector<1x128xf32> to vector<8x128xf32>
    %258 = arith.mulf %256, %257 : vector<8x128xf32>
    %259 = vector.broadcast %236 : vector<1x128xf32> to vector<8x128xf32>
    %260 = arith.addf %258, %259 : vector<8x128xf32>
    %261 = arith.truncf %260 : vector<8x128xf32> to vector<8x128xbf16>
    %c0_105 = arith.constant 0 : index
    %c0_106 = arith.constant 0 : index
    %c0_107 = arith.constant 0 : index
    %262 = vector.load %arg19[%c0_105, %c0_106, %c0_107] : memref<2x128x128xbf16, #tpu.memory_space<vmem>>, vector<1x128x128xbf16>
    %263 = vector.shape_cast %262 : vector<1x128x128xbf16> to vector<128x128xbf16>
    %cst_108 = arith.constant dense<0.000000e+00> : vector<8x128xf32>
    %264 = tpu.matmul %261, %263, %cst_108 {dimension_numbers = #tpu.dot_dimension_numbers<[1], [0], [0], [1], [0, 0, 1, 1], [], []>} : vector<8x128xbf16>, vector<128x128xbf16>, vector<8x128xf32> -> vector<8x128xf32>
    %c0_109 = arith.constant 0 : index
    %c0_110 = arith.constant 0 : index
    %c0_111 = arith.constant 0 : index
    %265 = vector.load %arg20[%c0_109, %c0_110, %c0_111] : memref<2x1x128xf32, #tpu.memory_space<vmem>>, vector<1x1x128xf32>
    %266 = vector.shape_cast %265 : vector<1x1x128xf32> to vector<1x128xf32>
    %267 = vector.broadcast %266 : vector<1x128xf32> to vector<8x128xf32>
    %268 = arith.addf %264, %267 : vector<8x128xf32>
    %cst_112 = arith.constant 0.000000e+00 : f32
    %269 = vector.broadcast %cst_112 : f32 to vector<8x128xf32>
    %270 = arith.maximumf %268, %269 : vector<8x128xf32>
    %271 = arith.truncf %270 : vector<8x128xf32> to vector<8x128xbf16>
    %c0_113 = arith.constant 0 : index
    %c0_114 = arith.constant 0 : index
    %c0_115 = arith.constant 0 : index
    %272 = vector.load %arg21[%c0_113, %c0_114, %c0_115] : memref<2x128x128xbf16, #tpu.memory_space<vmem>>, vector<1x128x128xbf16>
    %273 = vector.shape_cast %272 : vector<1x128x128xbf16> to vector<128x128xbf16>
    %cst_116 = arith.constant dense<0.000000e+00> : vector<8x128xf32>
    %274 = tpu.matmul %271, %273, %cst_116 {dimension_numbers = #tpu.dot_dimension_numbers<[1], [0], [0], [1], [0, 0, 1, 1], [], []>} : vector<8x128xbf16>, vector<128x128xbf16>, vector<8x128xf32> -> vector<8x128xf32>
    %c0_117 = arith.constant 0 : index
    %c0_118 = arith.constant 0 : index
    %c0_119 = arith.constant 0 : index
    %275 = vector.load %arg22[%c0_117, %c0_118, %c0_119] : memref<2x1x128xf32, #tpu.memory_space<vmem>>, vector<1x1x128xf32>
    %276 = vector.shape_cast %275 : vector<1x1x128xf32> to vector<1x128xf32>
    %277 = vector.broadcast %276 : vector<1x128xf32> to vector<8x128xf32>
    %278 = arith.addf %274, %277 : vector<8x128xf32>
    %279 = arith.addf %278, %260 : vector<8x128xf32>
    %c0_120 = arith.constant 0 : index
    %c0_121 = arith.constant 0 : index
    %c0_122 = arith.constant 0 : index
    %280 = vector.load %arg23[%c0_120, %c0_121, %c0_122] : memref<2x1x128xf32, #tpu.memory_space<vmem>>, vector<1x1x128xf32>
    %281 = vector.shape_cast %280 : vector<1x1x128xf32> to vector<1x128xf32>
    %c0_123 = arith.constant 0 : index
    %c0_124 = arith.constant 0 : index
    %c0_125 = arith.constant 0 : index
    %282 = vector.load %arg24[%c0_123, %c0_124, %c0_125] : memref<2x1x128xf32, #tpu.memory_space<vmem>>, vector<1x1x128xf32>
    %283 = vector.shape_cast %282 : vector<1x1x128xf32> to vector<1x128xf32>
    %284 = vector.broadcast %4 : vector<1x128xf32> to vector<8x128xf32>
    %285 = arith.mulf %279, %284 : vector<8x128xf32>
    %cst_126 = arith.constant dense<0.000000e+00> : vector<8xf32>
    %286 = vector.multi_reduction <add>, %285, %cst_126 [1] : vector<8x128xf32> to vector<8xf32>
    %287 = vector.shape_cast %286 : vector<8xf32> to vector<8x1xf32>
    %cst_127 = arith.constant 3.125000e-02 : f32
    %288 = vector.broadcast %cst_127 : f32 to vector<8x1xf32>
    %289 = arith.mulf %287, %288 : vector<8x1xf32>
    %290 = vector.broadcast %289 : vector<8x1xf32> to vector<8x128xf32>
    %291 = arith.subf %285, %290 : vector<8x128xf32>
    %292 = vector.broadcast %4 : vector<1x128xf32> to vector<8x128xf32>
    %293 = arith.mulf %291, %292 : vector<8x128xf32>
    %294 = arith.mulf %293, %293 : vector<8x128xf32>
    %cst_128 = arith.constant dense<0.000000e+00> : vector<8xf32>
    %295 = vector.multi_reduction <add>, %294, %cst_128 [1] : vector<8x128xf32> to vector<8xf32>
    %296 = vector.shape_cast %295 : vector<8xf32> to vector<8x1xf32>
    %cst_129 = arith.constant 3.125000e-02 : f32
    %297 = vector.broadcast %cst_129 : f32 to vector<8x1xf32>
    %298 = arith.mulf %296, %297 : vector<8x1xf32>
    %cst_130 = arith.constant 9.99999974E-6 : f32
    %299 = vector.broadcast %cst_130 : f32 to vector<8x1xf32>
    %300 = arith.addf %298, %299 : vector<8x1xf32>
    %301 = math.rsqrt %300 : vector<8x1xf32>
    %302 = vector.broadcast %301 : vector<8x1xf32> to vector<8x128xf32>
    %303 = arith.mulf %293, %302 : vector<8x128xf32>
    %304 = vector.broadcast %281 : vector<1x128xf32> to vector<8x128xf32>
    %305 = arith.mulf %303, %304 : vector<8x128xf32>
    %306 = vector.broadcast %283 : vector<1x128xf32> to vector<8x128xf32>
    %307 = arith.addf %305, %306 : vector<8x128xf32>
    %308 = arith.truncf %307 : vector<8x128xf32> to vector<8x128xbf16>
    %c1 = arith.constant 1 : index
    %c0_131 = arith.constant 0 : index
    %c0_132 = arith.constant 0 : index
    %309 = vector.load %arg5[%c1, %c0_131, %c0_132] : memref<2x128x96xbf16, #tpu.memory_space<vmem>>, vector<1x128x96xbf16>
    %310 = vector.shape_cast %309 : vector<1x128x96xbf16> to vector<128x96xbf16>
    %cst_133 = arith.constant dense<0.000000e+00> : vector<8x96xf32>
    %311 = tpu.matmul %308, %310, %cst_133 {dimension_numbers = #tpu.dot_dimension_numbers<[1], [0], [0], [1], [0, 0, 1, 1], [], []>} : vector<8x128xbf16>, vector<128x96xbf16>, vector<8x96xf32> -> vector<8x96xf32>
    %c1_134 = arith.constant 1 : index
    %c0_135 = arith.constant 0 : index
    %c0_136 = arith.constant 0 : index
    %312 = vector.load %arg6[%c1_134, %c0_135, %c0_136] : memref<2x1x96xf32, #tpu.memory_space<vmem>>, vector<1x1x96xf32>
    %313 = vector.shape_cast %312 : vector<1x1x96xf32> to vector<1x96xf32>
    %314 = vector.broadcast %313 : vector<1x96xf32> to vector<8x96xf32>
    %315 = arith.addf %311, %314 : vector<8x96xf32>
    %316 = vector.extract_strided_slice %315 {offsets = [0, 0], sizes = [8, 32], strides = [1, 1]} : vector<8x96xf32> to vector<8x32xf32>
    %317 = vector.extract_strided_slice %315 {offsets = [0, 32], sizes = [8, 32], strides = [1, 1]} : vector<8x96xf32> to vector<8x32xf32>
    %318 = vector.extract_strided_slice %315 {offsets = [0, 64], sizes = [8, 32], strides = [1, 1]} : vector<8x96xf32> to vector<8x32xf32>
    %c1_137 = arith.constant 1 : index
    %c0_138 = arith.constant 0 : index
    %c0_139 = arith.constant 0 : index
    %319 = vector.load %arg7[%c1_137, %c0_138, %c0_139] : memref<2x32x128xf32, #tpu.memory_space<vmem>>, vector<1x32x128xf32>
    %320 = vector.shape_cast %319 : vector<1x32x128xf32> to vector<32x128xf32>
    %321 = vector.extract_strided_slice %316 {offsets = [0, 0], sizes = [8, 8], strides = [1, 1]} : vector<8x32xf32> to vector<8x8xf32>
    %322 = vector.extract_strided_slice %317 {offsets = [0, 0], sizes = [8, 8], strides = [1, 1]} : vector<8x32xf32> to vector<8x8xf32>
    %323 = tpu.transpose %322, [1, 0] : vector<8x8xf32> -> vector<8x8xf32>
    %cst_140 = arith.constant dense<0.000000e+00> : vector<8x8xf32>
    %324 = tpu.matmul %321, %323, %cst_140 {dimension_numbers = #tpu.dot_dimension_numbers<[1], [0], [0], [1], [0, 0, 1, 1], [], []>} : vector<8x8xf32>, vector<8x8xf32>, vector<8x8xf32> -> vector<8x8xf32>
    %325 = arith.addf %324, %10 : vector<8x8xf32>
    %cst_141 = arith.constant dense<0xFF800000> : vector<8xf32>
    %326 = vector.multi_reduction <maximumf>, %325, %cst_141 [1] : vector<8x8xf32> to vector<8xf32>
    %327 = vector.shape_cast %326 : vector<8xf32> to vector<8x1xf32>
    %328 = vector.broadcast %327 : vector<8x1xf32> to vector<8x8xf32>
    %329 = arith.subf %325, %328 : vector<8x8xf32>
    %330 = math.exp %329 : vector<8x8xf32>
    %cst_142 = arith.constant dense<0.000000e+00> : vector<8xf32>
    %331 = vector.multi_reduction <add>, %330, %cst_142 [1] : vector<8x8xf32> to vector<8xf32>
    %332 = vector.shape_cast %331 : vector<8xf32> to vector<8x1xf32>
    %333 = vector.broadcast %332 : vector<8x1xf32> to vector<8x8xf32>
    %334 = arith.divf %330, %333 : vector<8x8xf32>
    %335 = vector.extract_strided_slice %318 {offsets = [0, 0], sizes = [8, 8], strides = [1, 1]} : vector<8x32xf32> to vector<8x8xf32>
    %cst_143 = arith.constant dense<0.000000e+00> : vector<8x8xf32>
    %336 = tpu.matmul %334, %335, %cst_143 {dimension_numbers = #tpu.dot_dimension_numbers<[1], [0], [0], [1], [0, 0, 1, 1], [], []>} : vector<8x8xf32>, vector<8x8xf32>, vector<8x8xf32> -> vector<8x8xf32>
    %337 = vector.extract_strided_slice %320 {offsets = [0, 0], sizes = [8, 128], strides = [1, 1]} : vector<32x128xf32> to vector<8x128xf32>
    %cst_144 = arith.constant dense<0.000000e+00> : vector<8x128xf32>
    %338 = tpu.matmul %336, %337, %cst_144 {dimension_numbers = #tpu.dot_dimension_numbers<[1], [0], [0], [1], [0, 0, 1, 1], [], []>} : vector<8x8xf32>, vector<8x128xf32>, vector<8x128xf32> -> vector<8x128xf32>
    %339 = vector.extract_strided_slice %316 {offsets = [0, 8], sizes = [8, 8], strides = [1, 1]} : vector<8x32xf32> to vector<8x8xf32>
    %340 = vector.extract_strided_slice %317 {offsets = [0, 8], sizes = [8, 8], strides = [1, 1]} : vector<8x32xf32> to vector<8x8xf32>
    %341 = tpu.transpose %340, [1, 0] : vector<8x8xf32> -> vector<8x8xf32>
    %cst_145 = arith.constant dense<0.000000e+00> : vector<8x8xf32>
    %342 = tpu.matmul %339, %341, %cst_145 {dimension_numbers = #tpu.dot_dimension_numbers<[1], [0], [0], [1], [0, 0, 1, 1], [], []>} : vector<8x8xf32>, vector<8x8xf32>, vector<8x8xf32> -> vector<8x8xf32>
    %343 = arith.addf %342, %10 : vector<8x8xf32>
    %cst_146 = arith.constant dense<0xFF800000> : vector<8xf32>
    %344 = vector.multi_reduction <maximumf>, %343, %cst_146 [1] : vector<8x8xf32> to vector<8xf32>
    %345 = vector.shape_cast %344 : vector<8xf32> to vector<8x1xf32>
    %346 = vector.broadcast %345 : vector<8x1xf32> to vector<8x8xf32>
    %347 = arith.subf %343, %346 : vector<8x8xf32>
    %348 = math.exp %347 : vector<8x8xf32>
    %cst_147 = arith.constant dense<0.000000e+00> : vector<8xf32>
    %349 = vector.multi_reduction <add>, %348, %cst_147 [1] : vector<8x8xf32> to vector<8xf32>
    %350 = vector.shape_cast %349 : vector<8xf32> to vector<8x1xf32>
    %351 = vector.broadcast %350 : vector<8x1xf32> to vector<8x8xf32>
    %352 = arith.divf %348, %351 : vector<8x8xf32>
    %353 = vector.extract_strided_slice %318 {offsets = [0, 8], sizes = [8, 8], strides = [1, 1]} : vector<8x32xf32> to vector<8x8xf32>
    %cst_148 = arith.constant dense<0.000000e+00> : vector<8x8xf32>
    %354 = tpu.matmul %352, %353, %cst_148 {dimension_numbers = #tpu.dot_dimension_numbers<[1], [0], [0], [1], [0, 0, 1, 1], [], []>} : vector<8x8xf32>, vector<8x8xf32>, vector<8x8xf32> -> vector<8x8xf32>
    %355 = vector.extract_strided_slice %320 {offsets = [8, 0], sizes = [8, 128], strides = [1, 1]} : vector<32x128xf32> to vector<8x128xf32>
    %cst_149 = arith.constant dense<0.000000e+00> : vector<8x128xf32>
    %356 = tpu.matmul %354, %355, %cst_149 {dimension_numbers = #tpu.dot_dimension_numbers<[1], [0], [0], [1], [0, 0, 1, 1], [], []>} : vector<8x8xf32>, vector<8x128xf32>, vector<8x128xf32> -> vector<8x128xf32>
    %357 = arith.addf %338, %356 : vector<8x128xf32>
    %358 = vector.extract_strided_slice %316 {offsets = [0, 16], sizes = [8, 8], strides = [1, 1]} : vector<8x32xf32> to vector<8x8xf32>
    %359 = vector.extract_strided_slice %317 {offsets = [0, 16], sizes = [8, 8], strides = [1, 1]} : vector<8x32xf32> to vector<8x8xf32>
    %360 = tpu.transpose %359, [1, 0] : vector<8x8xf32> -> vector<8x8xf32>
    %cst_150 = arith.constant dense<0.000000e+00> : vector<8x8xf32>
    %361 = tpu.matmul %358, %360, %cst_150 {dimension_numbers = #tpu.dot_dimension_numbers<[1], [0], [0], [1], [0, 0, 1, 1], [], []>} : vector<8x8xf32>, vector<8x8xf32>, vector<8x8xf32> -> vector<8x8xf32>
    %362 = arith.addf %361, %10 : vector<8x8xf32>
    %cst_151 = arith.constant dense<0xFF800000> : vector<8xf32>
    %363 = vector.multi_reduction <maximumf>, %362, %cst_151 [1] : vector<8x8xf32> to vector<8xf32>
    %364 = vector.shape_cast %363 : vector<8xf32> to vector<8x1xf32>
    %365 = vector.broadcast %364 : vector<8x1xf32> to vector<8x8xf32>
    %366 = arith.subf %362, %365 : vector<8x8xf32>
    %367 = math.exp %366 : vector<8x8xf32>
    %cst_152 = arith.constant dense<0.000000e+00> : vector<8xf32>
    %368 = vector.multi_reduction <add>, %367, %cst_152 [1] : vector<8x8xf32> to vector<8xf32>
    %369 = vector.shape_cast %368 : vector<8xf32> to vector<8x1xf32>
    %370 = vector.broadcast %369 : vector<8x1xf32> to vector<8x8xf32>
    %371 = arith.divf %367, %370 : vector<8x8xf32>
    %372 = vector.extract_strided_slice %318 {offsets = [0, 16], sizes = [8, 8], strides = [1, 1]} : vector<8x32xf32> to vector<8x8xf32>
    %cst_153 = arith.constant dense<0.000000e+00> : vector<8x8xf32>
    %373 = tpu.matmul %371, %372, %cst_153 {dimension_numbers = #tpu.dot_dimension_numbers<[1], [0], [0], [1], [0, 0, 1, 1], [], []>} : vector<8x8xf32>, vector<8x8xf32>, vector<8x8xf32> -> vector<8x8xf32>
    %374 = vector.extract_strided_slice %320 {offsets = [16, 0], sizes = [8, 128], strides = [1, 1]} : vector<32x128xf32> to vector<8x128xf32>
    %cst_154 = arith.constant dense<0.000000e+00> : vector<8x128xf32>
    %375 = tpu.matmul %373, %374, %cst_154 {dimension_numbers = #tpu.dot_dimension_numbers<[1], [0], [0], [1], [0, 0, 1, 1], [], []>} : vector<8x8xf32>, vector<8x128xf32>, vector<8x128xf32> -> vector<8x128xf32>
    %376 = arith.addf %357, %375 : vector<8x128xf32>
    %377 = vector.extract_strided_slice %316 {offsets = [0, 24], sizes = [8, 8], strides = [1, 1]} : vector<8x32xf32> to vector<8x8xf32>
    %378 = vector.extract_strided_slice %317 {offsets = [0, 24], sizes = [8, 8], strides = [1, 1]} : vector<8x32xf32> to vector<8x8xf32>
    %379 = tpu.transpose %378, [1, 0] : vector<8x8xf32> -> vector<8x8xf32>
    %cst_155 = arith.constant dense<0.000000e+00> : vector<8x8xf32>
    %380 = tpu.matmul %377, %379, %cst_155 {dimension_numbers = #tpu.dot_dimension_numbers<[1], [0], [0], [1], [0, 0, 1, 1], [], []>} : vector<8x8xf32>, vector<8x8xf32>, vector<8x8xf32> -> vector<8x8xf32>
    %381 = arith.addf %380, %10 : vector<8x8xf32>
    %cst_156 = arith.constant dense<0xFF800000> : vector<8xf32>
    %382 = vector.multi_reduction <maximumf>, %381, %cst_156 [1] : vector<8x8xf32> to vector<8xf32>
    %383 = vector.shape_cast %382 : vector<8xf32> to vector<8x1xf32>
    %384 = vector.broadcast %383 : vector<8x1xf32> to vector<8x8xf32>
    %385 = arith.subf %381, %384 : vector<8x8xf32>
    %386 = math.exp %385 : vector<8x8xf32>
    %cst_157 = arith.constant dense<0.000000e+00> : vector<8xf32>
    %387 = vector.multi_reduction <add>, %386, %cst_157 [1] : vector<8x8xf32> to vector<8xf32>
    %388 = vector.shape_cast %387 : vector<8xf32> to vector<8x1xf32>
    %389 = vector.broadcast %388 : vector<8x1xf32> to vector<8x8xf32>
    %390 = arith.divf %386, %389 : vector<8x8xf32>
    %391 = vector.extract_strided_slice %318 {offsets = [0, 24], sizes = [8, 8], strides = [1, 1]} : vector<8x32xf32> to vector<8x8xf32>
    %cst_158 = arith.constant dense<0.000000e+00> : vector<8x8xf32>
    %392 = tpu.matmul %390, %391, %cst_158 {dimension_numbers = #tpu.dot_dimension_numbers<[1], [0], [0], [1], [0, 0, 1, 1], [], []>} : vector<8x8xf32>, vector<8x8xf32>, vector<8x8xf32> -> vector<8x8xf32>
    %393 = vector.extract_strided_slice %320 {offsets = [24, 0], sizes = [8, 128], strides = [1, 1]} : vector<32x128xf32> to vector<8x128xf32>
    %cst_159 = arith.constant dense<0.000000e+00> : vector<8x128xf32>
    %394 = tpu.matmul %392, %393, %cst_159 {dimension_numbers = #tpu.dot_dimension_numbers<[1], [0], [0], [1], [0, 0, 1, 1], [], []>} : vector<8x8xf32>, vector<8x128xf32>, vector<8x128xf32> -> vector<8x128xf32>
    %395 = arith.addf %376, %394 : vector<8x128xf32>
    %c1_160 = arith.constant 1 : index
    %c0_161 = arith.constant 0 : index
    %c0_162 = arith.constant 0 : index
    %396 = vector.load %arg8[%c1_160, %c0_161, %c0_162] : memref<2x1x128xf32, #tpu.memory_space<vmem>>, vector<1x1x128xf32>
    %397 = vector.shape_cast %396 : vector<1x1x128xf32> to vector<1x128xf32>
    %398 = vector.broadcast %397 : vector<1x128xf32> to vector<8x128xf32>
    %399 = arith.addf %395, %398 : vector<8x128xf32>
    %400 = arith.addf %399, %307 : vector<8x128xf32>
    %c1_163 = arith.constant 1 : index
    %c0_164 = arith.constant 0 : index
    %c0_165 = arith.constant 0 : index
    %401 = vector.load %arg9[%c1_163, %c0_164, %c0_165] : memref<2x1x128xf32, #tpu.memory_space<vmem>>, vector<1x1x128xf32>
    %402 = vector.shape_cast %401 : vector<1x1x128xf32> to vector<1x128xf32>
    %c1_166 = arith.constant 1 : index
    %c0_167 = arith.constant 0 : index
    %c0_168 = arith.constant 0 : index
    %403 = vector.load %arg10[%c1_166, %c0_167, %c0_168] : memref<2x1x128xf32, #tpu.memory_space<vmem>>, vector<1x1x128xf32>
    %404 = vector.shape_cast %403 : vector<1x1x128xf32> to vector<1x128xf32>
    %405 = vector.broadcast %4 : vector<1x128xf32> to vector<8x128xf32>
    %406 = arith.mulf %400, %405 : vector<8x128xf32>
    %cst_169 = arith.constant dense<0.000000e+00> : vector<8xf32>
    %407 = vector.multi_reduction <add>, %406, %cst_169 [1] : vector<8x128xf32> to vector<8xf32>
    %408 = vector.shape_cast %407 : vector<8xf32> to vector<8x1xf32>
    %cst_170 = arith.constant 3.125000e-02 : f32
    %409 = vector.broadcast %cst_170 : f32 to vector<8x1xf32>
    %410 = arith.mulf %408, %409 : vector<8x1xf32>
    %411 = vector.broadcast %410 : vector<8x1xf32> to vector<8x128xf32>
    %412 = arith.subf %406, %411 : vector<8x128xf32>
    %413 = vector.broadcast %4 : vector<1x128xf32> to vector<8x128xf32>
    %414 = arith.mulf %412, %413 : vector<8x128xf32>
    %415 = arith.mulf %414, %414 : vector<8x128xf32>
    %cst_171 = arith.constant dense<0.000000e+00> : vector<8xf32>
    %416 = vector.multi_reduction <add>, %415, %cst_171 [1] : vector<8x128xf32> to vector<8xf32>
    %417 = vector.shape_cast %416 : vector<8xf32> to vector<8x1xf32>
    %cst_172 = arith.constant 3.125000e-02 : f32
    %418 = vector.broadcast %cst_172 : f32 to vector<8x1xf32>
    %419 = arith.mulf %417, %418 : vector<8x1xf32>
    %cst_173 = arith.constant 9.99999974E-6 : f32
    %420 = vector.broadcast %cst_173 : f32 to vector<8x1xf32>
    %421 = arith.addf %419, %420 : vector<8x1xf32>
    %422 = math.rsqrt %421 : vector<8x1xf32>
    %423 = vector.broadcast %422 : vector<8x1xf32> to vector<8x128xf32>
    %424 = arith.mulf %414, %423 : vector<8x128xf32>
    %425 = vector.broadcast %402 : vector<1x128xf32> to vector<8x128xf32>
    %426 = arith.mulf %424, %425 : vector<8x128xf32>
    %427 = vector.broadcast %404 : vector<1x128xf32> to vector<8x128xf32>
    %428 = arith.addf %426, %427 : vector<8x128xf32>
    %429 = arith.truncf %428 : vector<8x128xf32> to vector<8x128xbf16>
    %c1_174 = arith.constant 1 : index
    %c0_175 = arith.constant 0 : index
    %c0_176 = arith.constant 0 : index
    %430 = vector.load %arg11[%c1_174, %c0_175, %c0_176] : memref<2x128x32xbf16, #tpu.memory_space<vmem>>, vector<1x128x32xbf16>
    %431 = vector.shape_cast %430 : vector<1x128x32xbf16> to vector<128x32xbf16>
    %cst_177 = arith.constant dense<0.000000e+00> : vector<8x32xf32>
    %432 = tpu.matmul %429, %431, %cst_177 {dimension_numbers = #tpu.dot_dimension_numbers<[1], [0], [0], [1], [0, 0, 1, 1], [], []>} : vector<8x128xbf16>, vector<128x32xbf16>, vector<8x32xf32> -> vector<8x32xf32>
    %c1_178 = arith.constant 1 : index
    %c0_179 = arith.constant 0 : index
    %c0_180 = arith.constant 0 : index
    %433 = vector.load %arg12[%c1_178, %c0_179, %c0_180] : memref<2x1x32xf32, #tpu.memory_space<vmem>>, vector<1x1x32xf32>
    %434 = vector.shape_cast %433 : vector<1x1x32xf32> to vector<1x32xf32>
    %435 = vector.broadcast %434 : vector<1x32xf32> to vector<8x32xf32>
    %436 = arith.addf %432, %435 : vector<8x32xf32>
    %c1_181 = arith.constant 1 : index
    %c0_182 = arith.constant 0 : index
    %c0_183 = arith.constant 0 : index
    %437 = vector.load %arg13[%c1_181, %c0_182, %c0_183] : memref<2x128x64xbf16, #tpu.memory_space<vmem>>, vector<1x128x64xbf16>
    %438 = vector.shape_cast %437 : vector<1x128x64xbf16> to vector<128x64xbf16>
    %cst_184 = arith.constant dense<0.000000e+00> : vector<8x64xf32>
    %439 = tpu.matmul %8, %438, %cst_184 {dimension_numbers = #tpu.dot_dimension_numbers<[1], [0], [0], [1], [0, 0, 1, 1], [], []>} : vector<8x128xbf16>, vector<128x64xbf16>, vector<8x64xf32> -> vector<8x64xf32>
    %c1_185 = arith.constant 1 : index
    %c0_186 = arith.constant 0 : index
    %c0_187 = arith.constant 0 : index
    %440 = vector.load %arg14[%c1_185, %c0_186, %c0_187] : memref<2x1x64xf32, #tpu.memory_space<vmem>>, vector<1x1x64xf32>
    %441 = vector.shape_cast %440 : vector<1x1x64xf32> to vector<1x64xf32>
    %442 = vector.broadcast %441 : vector<1x64xf32> to vector<8x64xf32>
    %443 = arith.addf %439, %442 : vector<8x64xf32>
    %444 = vector.extract_strided_slice %443 {offsets = [0, 0], sizes = [8, 32], strides = [1, 1]} : vector<8x64xf32> to vector<8x32xf32>
    %445 = vector.extract_strided_slice %443 {offsets = [0, 32], sizes = [8, 32], strides = [1, 1]} : vector<8x64xf32> to vector<8x32xf32>
    %c1_188 = arith.constant 1 : index
    %c0_189 = arith.constant 0 : index
    %c0_190 = arith.constant 0 : index
    %446 = vector.load %arg15[%c1_188, %c0_189, %c0_190] : memref<2x32x128xf32, #tpu.memory_space<vmem>>, vector<1x32x128xf32>
    %447 = vector.shape_cast %446 : vector<1x32x128xf32> to vector<32x128xf32>
    %448 = vector.extract_strided_slice %436 {offsets = [0, 0], sizes = [8, 8], strides = [1, 1]} : vector<8x32xf32> to vector<8x8xf32>
    %449 = vector.extract_strided_slice %444 {offsets = [0, 0], sizes = [8, 8], strides = [1, 1]} : vector<8x32xf32> to vector<8x8xf32>
    %450 = tpu.transpose %449, [1, 0] : vector<8x8xf32> -> vector<8x8xf32>
    %cst_191 = arith.constant dense<0.000000e+00> : vector<8x8xf32>
    %451 = tpu.matmul %448, %450, %cst_191 {dimension_numbers = #tpu.dot_dimension_numbers<[1], [0], [0], [1], [0, 0, 1, 1], [], []>} : vector<8x8xf32>, vector<8x8xf32>, vector<8x8xf32> -> vector<8x8xf32>
    %452 = arith.addf %451, %12 : vector<8x8xf32>
    %cst_192 = arith.constant dense<0xFF800000> : vector<8xf32>
    %453 = vector.multi_reduction <maximumf>, %452, %cst_192 [1] : vector<8x8xf32> to vector<8xf32>
    %454 = vector.shape_cast %453 : vector<8xf32> to vector<8x1xf32>
    %455 = vector.broadcast %454 : vector<8x1xf32> to vector<8x8xf32>
    %456 = arith.subf %452, %455 : vector<8x8xf32>
    %457 = math.exp %456 : vector<8x8xf32>
    %cst_193 = arith.constant dense<0.000000e+00> : vector<8xf32>
    %458 = vector.multi_reduction <add>, %457, %cst_193 [1] : vector<8x8xf32> to vector<8xf32>
    %459 = vector.shape_cast %458 : vector<8xf32> to vector<8x1xf32>
    %460 = vector.broadcast %459 : vector<8x1xf32> to vector<8x8xf32>
    %461 = arith.divf %457, %460 : vector<8x8xf32>
    %462 = vector.extract_strided_slice %445 {offsets = [0, 0], sizes = [8, 8], strides = [1, 1]} : vector<8x32xf32> to vector<8x8xf32>
    %cst_194 = arith.constant dense<0.000000e+00> : vector<8x8xf32>
    %463 = tpu.matmul %461, %462, %cst_194 {dimension_numbers = #tpu.dot_dimension_numbers<[1], [0], [0], [1], [0, 0, 1, 1], [], []>} : vector<8x8xf32>, vector<8x8xf32>, vector<8x8xf32> -> vector<8x8xf32>
    %464 = vector.extract_strided_slice %447 {offsets = [0, 0], sizes = [8, 128], strides = [1, 1]} : vector<32x128xf32> to vector<8x128xf32>
    %cst_195 = arith.constant dense<0.000000e+00> : vector<8x128xf32>
    %465 = tpu.matmul %463, %464, %cst_195 {dimension_numbers = #tpu.dot_dimension_numbers<[1], [0], [0], [1], [0, 0, 1, 1], [], []>} : vector<8x8xf32>, vector<8x128xf32>, vector<8x128xf32> -> vector<8x128xf32>
    %466 = vector.extract_strided_slice %436 {offsets = [0, 8], sizes = [8, 8], strides = [1, 1]} : vector<8x32xf32> to vector<8x8xf32>
    %467 = vector.extract_strided_slice %444 {offsets = [0, 8], sizes = [8, 8], strides = [1, 1]} : vector<8x32xf32> to vector<8x8xf32>
    %468 = tpu.transpose %467, [1, 0] : vector<8x8xf32> -> vector<8x8xf32>
    %cst_196 = arith.constant dense<0.000000e+00> : vector<8x8xf32>
    %469 = tpu.matmul %466, %468, %cst_196 {dimension_numbers = #tpu.dot_dimension_numbers<[1], [0], [0], [1], [0, 0, 1, 1], [], []>} : vector<8x8xf32>, vector<8x8xf32>, vector<8x8xf32> -> vector<8x8xf32>
    %470 = arith.addf %469, %12 : vector<8x8xf32>
    %cst_197 = arith.constant dense<0xFF800000> : vector<8xf32>
    %471 = vector.multi_reduction <maximumf>, %470, %cst_197 [1] : vector<8x8xf32> to vector<8xf32>
    %472 = vector.shape_cast %471 : vector<8xf32> to vector<8x1xf32>
    %473 = vector.broadcast %472 : vector<8x1xf32> to vector<8x8xf32>
    %474 = arith.subf %470, %473 : vector<8x8xf32>
    %475 = math.exp %474 : vector<8x8xf32>
    %cst_198 = arith.constant dense<0.000000e+00> : vector<8xf32>
    %476 = vector.multi_reduction <add>, %475, %cst_198 [1] : vector<8x8xf32> to vector<8xf32>
    %477 = vector.shape_cast %476 : vector<8xf32> to vector<8x1xf32>
    %478 = vector.broadcast %477 : vector<8x1xf32> to vector<8x8xf32>
    %479 = arith.divf %475, %478 : vector<8x8xf32>
    %480 = vector.extract_strided_slice %445 {offsets = [0, 8], sizes = [8, 8], strides = [1, 1]} : vector<8x32xf32> to vector<8x8xf32>
    %cst_199 = arith.constant dense<0.000000e+00> : vector<8x8xf32>
    %481 = tpu.matmul %479, %480, %cst_199 {dimension_numbers = #tpu.dot_dimension_numbers<[1], [0], [0], [1], [0, 0, 1, 1], [], []>} : vector<8x8xf32>, vector<8x8xf32>, vector<8x8xf32> -> vector<8x8xf32>
    %482 = vector.extract_strided_slice %447 {offsets = [8, 0], sizes = [8, 128], strides = [1, 1]} : vector<32x128xf32> to vector<8x128xf32>
    %cst_200 = arith.constant dense<0.000000e+00> : vector<8x128xf32>
    %483 = tpu.matmul %481, %482, %cst_200 {dimension_numbers = #tpu.dot_dimension_numbers<[1], [0], [0], [1], [0, 0, 1, 1], [], []>} : vector<8x8xf32>, vector<8x128xf32>, vector<8x128xf32> -> vector<8x128xf32>
    %484 = arith.addf %465, %483 : vector<8x128xf32>
    %485 = vector.extract_strided_slice %436 {offsets = [0, 16], sizes = [8, 8], strides = [1, 1]} : vector<8x32xf32> to vector<8x8xf32>
    %486 = vector.extract_strided_slice %444 {offsets = [0, 16], sizes = [8, 8], strides = [1, 1]} : vector<8x32xf32> to vector<8x8xf32>
    %487 = tpu.transpose %486, [1, 0] : vector<8x8xf32> -> vector<8x8xf32>
    %cst_201 = arith.constant dense<0.000000e+00> : vector<8x8xf32>
    %488 = tpu.matmul %485, %487, %cst_201 {dimension_numbers = #tpu.dot_dimension_numbers<[1], [0], [0], [1], [0, 0, 1, 1], [], []>} : vector<8x8xf32>, vector<8x8xf32>, vector<8x8xf32> -> vector<8x8xf32>
    %489 = arith.addf %488, %12 : vector<8x8xf32>
    %cst_202 = arith.constant dense<0xFF800000> : vector<8xf32>
    %490 = vector.multi_reduction <maximumf>, %489, %cst_202 [1] : vector<8x8xf32> to vector<8xf32>
    %491 = vector.shape_cast %490 : vector<8xf32> to vector<8x1xf32>
    %492 = vector.broadcast %491 : vector<8x1xf32> to vector<8x8xf32>
    %493 = arith.subf %489, %492 : vector<8x8xf32>
    %494 = math.exp %493 : vector<8x8xf32>
    %cst_203 = arith.constant dense<0.000000e+00> : vector<8xf32>
    %495 = vector.multi_reduction <add>, %494, %cst_203 [1] : vector<8x8xf32> to vector<8xf32>
    %496 = vector.shape_cast %495 : vector<8xf32> to vector<8x1xf32>
    %497 = vector.broadcast %496 : vector<8x1xf32> to vector<8x8xf32>
    %498 = arith.divf %494, %497 : vector<8x8xf32>
    %499 = vector.extract_strided_slice %445 {offsets = [0, 16], sizes = [8, 8], strides = [1, 1]} : vector<8x32xf32> to vector<8x8xf32>
    %cst_204 = arith.constant dense<0.000000e+00> : vector<8x8xf32>
    %500 = tpu.matmul %498, %499, %cst_204 {dimension_numbers = #tpu.dot_dimension_numbers<[1], [0], [0], [1], [0, 0, 1, 1], [], []>} : vector<8x8xf32>, vector<8x8xf32>, vector<8x8xf32> -> vector<8x8xf32>
    %501 = vector.extract_strided_slice %447 {offsets = [16, 0], sizes = [8, 128], strides = [1, 1]} : vector<32x128xf32> to vector<8x128xf32>
    %cst_205 = arith.constant dense<0.000000e+00> : vector<8x128xf32>
    %502 = tpu.matmul %500, %501, %cst_205 {dimension_numbers = #tpu.dot_dimension_numbers<[1], [0], [0], [1], [0, 0, 1, 1], [], []>} : vector<8x8xf32>, vector<8x128xf32>, vector<8x128xf32> -> vector<8x128xf32>
    %503 = arith.addf %484, %502 : vector<8x128xf32>
    %504 = vector.extract_strided_slice %436 {offsets = [0, 24], sizes = [8, 8], strides = [1, 1]} : vector<8x32xf32> to vector<8x8xf32>
    %505 = vector.extract_strided_slice %444 {offsets = [0, 24], sizes = [8, 8], strides = [1, 1]} : vector<8x32xf32> to vector<8x8xf32>
    %506 = tpu.transpose %505, [1, 0] : vector<8x8xf32> -> vector<8x8xf32>
    %cst_206 = arith.constant dense<0.000000e+00> : vector<8x8xf32>
    %507 = tpu.matmul %504, %506, %cst_206 {dimension_numbers = #tpu.dot_dimension_numbers<[1], [0], [0], [1], [0, 0, 1, 1], [], []>} : vector<8x8xf32>, vector<8x8xf32>, vector<8x8xf32> -> vector<8x8xf32>
    %508 = arith.addf %507, %12 : vector<8x8xf32>
    %cst_207 = arith.constant dense<0xFF800000> : vector<8xf32>
    %509 = vector.multi_reduction <maximumf>, %508, %cst_207 [1] : vector<8x8xf32> to vector<8xf32>
    %510 = vector.shape_cast %509 : vector<8xf32> to vector<8x1xf32>
    %511 = vector.broadcast %510 : vector<8x1xf32> to vector<8x8xf32>
    %512 = arith.subf %508, %511 : vector<8x8xf32>
    %513 = math.exp %512 : vector<8x8xf32>
    %cst_208 = arith.constant dense<0.000000e+00> : vector<8xf32>
    %514 = vector.multi_reduction <add>, %513, %cst_208 [1] : vector<8x8xf32> to vector<8xf32>
    %515 = vector.shape_cast %514 : vector<8xf32> to vector<8x1xf32>
    %516 = vector.broadcast %515 : vector<8x1xf32> to vector<8x8xf32>
    %517 = arith.divf %513, %516 : vector<8x8xf32>
    %518 = vector.extract_strided_slice %445 {offsets = [0, 24], sizes = [8, 8], strides = [1, 1]} : vector<8x32xf32> to vector<8x8xf32>
    %cst_209 = arith.constant dense<0.000000e+00> : vector<8x8xf32>
    %519 = tpu.matmul %517, %518, %cst_209 {dimension_numbers = #tpu.dot_dimension_numbers<[1], [0], [0], [1], [0, 0, 1, 1], [], []>} : vector<8x8xf32>, vector<8x8xf32>, vector<8x8xf32> -> vector<8x8xf32>
    %520 = vector.extract_strided_slice %447 {offsets = [24, 0], sizes = [8, 128], strides = [1, 1]} : vector<32x128xf32> to vector<8x128xf32>
    %cst_210 = arith.constant dense<0.000000e+00> : vector<8x128xf32>
    %521 = tpu.matmul %519, %520, %cst_210 {dimension_numbers = #tpu.dot_dimension_numbers<[1], [0], [0], [1], [0, 0, 1, 1], [], []>} : vector<8x8xf32>, vector<8x128xf32>, vector<8x128xf32> -> vector<8x128xf32>
    %522 = arith.addf %503, %521 : vector<8x128xf32>
    %c1_211 = arith.constant 1 : index
    %c0_212 = arith.constant 0 : index
    %c0_213 = arith.constant 0 : index
    %523 = vector.load %arg16[%c1_211, %c0_212, %c0_213] : memref<2x1x128xf32, #tpu.memory_space<vmem>>, vector<1x1x128xf32>
    %524 = vector.shape_cast %523 : vector<1x1x128xf32> to vector<1x128xf32>
    %525 = vector.broadcast %524 : vector<1x128xf32> to vector<8x128xf32>
    %526 = arith.addf %522, %525 : vector<8x128xf32>
    %527 = arith.addf %526, %428 : vector<8x128xf32>
    %c1_214 = arith.constant 1 : index
    %c0_215 = arith.constant 0 : index
    %c0_216 = arith.constant 0 : index
    %528 = vector.load %arg17[%c1_214, %c0_215, %c0_216] : memref<2x1x128xf32, #tpu.memory_space<vmem>>, vector<1x1x128xf32>
    %529 = vector.shape_cast %528 : vector<1x1x128xf32> to vector<1x128xf32>
    %c1_217 = arith.constant 1 : index
    %c0_218 = arith.constant 0 : index
    %c0_219 = arith.constant 0 : index
    %530 = vector.load %arg18[%c1_217, %c0_218, %c0_219] : memref<2x1x128xf32, #tpu.memory_space<vmem>>, vector<1x1x128xf32>
    %531 = vector.shape_cast %530 : vector<1x1x128xf32> to vector<1x128xf32>
    %532 = vector.broadcast %4 : vector<1x128xf32> to vector<8x128xf32>
    %533 = arith.mulf %527, %532 : vector<8x128xf32>
    %cst_220 = arith.constant dense<0.000000e+00> : vector<8xf32>
    %534 = vector.multi_reduction <add>, %533, %cst_220 [1] : vector<8x128xf32> to vector<8xf32>
    %535 = vector.shape_cast %534 : vector<8xf32> to vector<8x1xf32>
    %cst_221 = arith.constant 3.125000e-02 : f32
    %536 = vector.broadcast %cst_221 : f32 to vector<8x1xf32>
    %537 = arith.mulf %535, %536 : vector<8x1xf32>
    %538 = vector.broadcast %537 : vector<8x1xf32> to vector<8x128xf32>
    %539 = arith.subf %533, %538 : vector<8x128xf32>
    %540 = vector.broadcast %4 : vector<1x128xf32> to vector<8x128xf32>
    %541 = arith.mulf %539, %540 : vector<8x128xf32>
    %542 = arith.mulf %541, %541 : vector<8x128xf32>
    %cst_222 = arith.constant dense<0.000000e+00> : vector<8xf32>
    %543 = vector.multi_reduction <add>, %542, %cst_222 [1] : vector<8x128xf32> to vector<8xf32>
    %544 = vector.shape_cast %543 : vector<8xf32> to vector<8x1xf32>
    %cst_223 = arith.constant 3.125000e-02 : f32
    %545 = vector.broadcast %cst_223 : f32 to vector<8x1xf32>
    %546 = arith.mulf %544, %545 : vector<8x1xf32>
    %cst_224 = arith.constant 9.99999974E-6 : f32
    %547 = vector.broadcast %cst_224 : f32 to vector<8x1xf32>
    %548 = arith.addf %546, %547 : vector<8x1xf32>
    %549 = math.rsqrt %548 : vector<8x1xf32>
    %550 = vector.broadcast %549 : vector<8x1xf32> to vector<8x128xf32>
    %551 = arith.mulf %541, %550 : vector<8x128xf32>
    %552 = vector.broadcast %529 : vector<1x128xf32> to vector<8x128xf32>
    %553 = arith.mulf %551, %552 : vector<8x128xf32>
    %554 = vector.broadcast %531 : vector<1x128xf32> to vector<8x128xf32>
    %555 = arith.addf %553, %554 : vector<8x128xf32>
    %556 = arith.truncf %555 : vector<8x128xf32> to vector<8x128xbf16>
    %c1_225 = arith.constant 1 : index
    %c0_226 = arith.constant 0 : index
    %c0_227 = arith.constant 0 : index
    %557 = vector.load %arg19[%c1_225, %c0_226, %c0_227] : memref<2x128x128xbf16, #tpu.memory_space<vmem>>, vector<1x128x128xbf16>
    %558 = vector.shape_cast %557 : vector<1x128x128xbf16> to vector<128x128xbf16>
    %cst_228 = arith.constant dense<0.000000e+00> : vector<8x128xf32>
    %559 = tpu.matmul %556, %558, %cst_228 {dimension_numbers = #tpu.dot_dimension_numbers<[1], [0], [0], [1], [0, 0, 1, 1], [], []>} : vector<8x128xbf16>, vector<128x128xbf16>, vector<8x128xf32> -> vector<8x128xf32>
    %c1_229 = arith.constant 1 : index
    %c0_230 = arith.constant 0 : index
    %c0_231 = arith.constant 0 : index
    %560 = vector.load %arg20[%c1_229, %c0_230, %c0_231] : memref<2x1x128xf32, #tpu.memory_space<vmem>>, vector<1x1x128xf32>
    %561 = vector.shape_cast %560 : vector<1x1x128xf32> to vector<1x128xf32>
    %562 = vector.broadcast %561 : vector<1x128xf32> to vector<8x128xf32>
    %563 = arith.addf %559, %562 : vector<8x128xf32>
    %cst_232 = arith.constant 0.000000e+00 : f32
    %564 = vector.broadcast %cst_232 : f32 to vector<8x128xf32>
    %565 = arith.maximumf %563, %564 : vector<8x128xf32>
    %566 = arith.truncf %565 : vector<8x128xf32> to vector<8x128xbf16>
    %c1_233 = arith.constant 1 : index
    %c0_234 = arith.constant 0 : index
    %c0_235 = arith.constant 0 : index
    %567 = vector.load %arg21[%c1_233, %c0_234, %c0_235] : memref<2x128x128xbf16, #tpu.memory_space<vmem>>, vector<1x128x128xbf16>
    %568 = vector.shape_cast %567 : vector<1x128x128xbf16> to vector<128x128xbf16>
    %cst_236 = arith.constant dense<0.000000e+00> : vector<8x128xf32>
    %569 = tpu.matmul %566, %568, %cst_236 {dimension_numbers = #tpu.dot_dimension_numbers<[1], [0], [0], [1], [0, 0, 1, 1], [], []>} : vector<8x128xbf16>, vector<128x128xbf16>, vector<8x128xf32> -> vector<8x128xf32>
    %c1_237 = arith.constant 1 : index
    %c0_238 = arith.constant 0 : index
    %c0_239 = arith.constant 0 : index
    %570 = vector.load %arg22[%c1_237, %c0_238, %c0_239] : memref<2x1x128xf32, #tpu.memory_space<vmem>>, vector<1x1x128xf32>
    %571 = vector.shape_cast %570 : vector<1x1x128xf32> to vector<1x128xf32>
    %572 = vector.broadcast %571 : vector<1x128xf32> to vector<8x128xf32>
    %573 = arith.addf %569, %572 : vector<8x128xf32>
    %574 = arith.addf %573, %555 : vector<8x128xf32>
    %c1_240 = arith.constant 1 : index
    %c0_241 = arith.constant 0 : index
    %c0_242 = arith.constant 0 : index
    %575 = vector.load %arg23[%c1_240, %c0_241, %c0_242] : memref<2x1x128xf32, #tpu.memory_space<vmem>>, vector<1x1x128xf32>
    %576 = vector.shape_cast %575 : vector<1x1x128xf32> to vector<1x128xf32>
    %c1_243 = arith.constant 1 : index
    %c0_244 = arith.constant 0 : index
    %c0_245 = arith.constant 0 : index
    %577 = vector.load %arg24[%c1_243, %c0_244, %c0_245] : memref<2x1x128xf32, #tpu.memory_space<vmem>>, vector<1x1x128xf32>
    %578 = vector.shape_cast %577 : vector<1x1x128xf32> to vector<1x128xf32>
    %579 = vector.broadcast %4 : vector<1x128xf32> to vector<8x128xf32>
    %580 = arith.mulf %574, %579 : vector<8x128xf32>
    %cst_246 = arith.constant dense<0.000000e+00> : vector<8xf32>
    %581 = vector.multi_reduction <add>, %580, %cst_246 [1] : vector<8x128xf32> to vector<8xf32>
    %582 = vector.shape_cast %581 : vector<8xf32> to vector<8x1xf32>
    %cst_247 = arith.constant 3.125000e-02 : f32
    %583 = vector.broadcast %cst_247 : f32 to vector<8x1xf32>
    %584 = arith.mulf %582, %583 : vector<8x1xf32>
    %585 = vector.broadcast %584 : vector<8x1xf32> to vector<8x128xf32>
    %586 = arith.subf %580, %585 : vector<8x128xf32>
    %587 = vector.broadcast %4 : vector<1x128xf32> to vector<8x128xf32>
    %588 = arith.mulf %586, %587 : vector<8x128xf32>
    %589 = arith.mulf %588, %588 : vector<8x128xf32>
    %cst_248 = arith.constant dense<0.000000e+00> : vector<8xf32>
    %590 = vector.multi_reduction <add>, %589, %cst_248 [1] : vector<8x128xf32> to vector<8xf32>
    %591 = vector.shape_cast %590 : vector<8xf32> to vector<8x1xf32>
    %cst_249 = arith.constant 3.125000e-02 : f32
    %592 = vector.broadcast %cst_249 : f32 to vector<8x1xf32>
    %593 = arith.mulf %591, %592 : vector<8x1xf32>
    %cst_250 = arith.constant 9.99999974E-6 : f32
    %594 = vector.broadcast %cst_250 : f32 to vector<8x1xf32>
    %595 = arith.addf %593, %594 : vector<8x1xf32>
    %596 = math.rsqrt %595 : vector<8x1xf32>
    %597 = vector.broadcast %596 : vector<8x1xf32> to vector<8x128xf32>
    %598 = arith.mulf %588, %597 : vector<8x128xf32>
    %599 = vector.broadcast %576 : vector<1x128xf32> to vector<8x128xf32>
    %600 = arith.mulf %598, %599 : vector<8x128xf32>
    %601 = vector.broadcast %578 : vector<1x128xf32> to vector<8x128xf32>
    %602 = arith.addf %600, %601 : vector<8x128xf32>
    %c0_251 = arith.constant 0 : index
    %c0_252 = arith.constant 0 : index
    %603 = vector.load %arg25[%c0_251, %c0_252] : memref<1x128xf32, #tpu.memory_space<vmem>>, vector<1x128xf32>
    %c0_253 = arith.constant 0 : index
    %c0_254 = arith.constant 0 : index
    %604 = vector.load %arg26[%c0_253, %c0_254] : memref<1x128xf32, #tpu.memory_space<vmem>>, vector<1x128xf32>
    %605 = vector.broadcast %4 : vector<1x128xf32> to vector<8x128xf32>
    %606 = arith.mulf %602, %605 : vector<8x128xf32>
    %cst_255 = arith.constant dense<0.000000e+00> : vector<8xf32>
    %607 = vector.multi_reduction <add>, %606, %cst_255 [1] : vector<8x128xf32> to vector<8xf32>
    %608 = vector.shape_cast %607 : vector<8xf32> to vector<8x1xf32>
    %cst_256 = arith.constant 3.125000e-02 : f32
    %609 = vector.broadcast %cst_256 : f32 to vector<8x1xf32>
    %610 = arith.mulf %608, %609 : vector<8x1xf32>
    %611 = vector.broadcast %610 : vector<8x1xf32> to vector<8x128xf32>
    %612 = arith.subf %606, %611 : vector<8x128xf32>
    %613 = vector.broadcast %4 : vector<1x128xf32> to vector<8x128xf32>
    %614 = arith.mulf %612, %613 : vector<8x128xf32>
    %615 = arith.mulf %614, %614 : vector<8x128xf32>
    %cst_257 = arith.constant dense<0.000000e+00> : vector<8xf32>
    %616 = vector.multi_reduction <add>, %615, %cst_257 [1] : vector<8x128xf32> to vector<8xf32>
    %617 = vector.shape_cast %616 : vector<8xf32> to vector<8x1xf32>
    %cst_258 = arith.constant 3.125000e-02 : f32
    %618 = vector.broadcast %cst_258 : f32 to vector<8x1xf32>
    %619 = arith.mulf %617, %618 : vector<8x1xf32>
    %cst_259 = arith.constant 9.99999974E-6 : f32
    %620 = vector.broadcast %cst_259 : f32 to vector<8x1xf32>
    %621 = arith.addf %619, %620 : vector<8x1xf32>
    %622 = math.rsqrt %621 : vector<8x1xf32>
    %623 = vector.broadcast %622 : vector<8x1xf32> to vector<8x128xf32>
    %624 = arith.mulf %614, %623 : vector<8x128xf32>
    %625 = vector.broadcast %603 : vector<1x128xf32> to vector<8x128xf32>
    %626 = arith.mulf %624, %625 : vector<8x128xf32>
    %627 = vector.broadcast %604 : vector<1x128xf32> to vector<8x128xf32>
    %628 = arith.addf %626, %627 : vector<8x128xf32>
    %629 = arith.truncf %628 : vector<8x128xf32> to vector<8x128xbf16>
    %c0_260 = arith.constant 0 : index
    %c0_261 = arith.constant 0 : index
    %630 = vector.load %arg27[%c0_260, %c0_261] : memref<128x128xbf16, #tpu.memory_space<vmem>>, vector<128x128xbf16>
    %cst_262 = arith.constant dense<0.000000e+00> : vector<8x128xf32>
    %631 = tpu.matmul %629, %630, %cst_262 {dimension_numbers = #tpu.dot_dimension_numbers<[1], [0], [0], [1], [0, 0, 1, 1], [], []>} : vector<8x128xbf16>, vector<128x128xbf16>, vector<8x128xf32> -> vector<8x128xf32>
    %c0_263 = arith.constant 0 : index
    %c0_264 = arith.constant 0 : index
    %632 = vector.load %arg28[%c0_263, %c0_264] : memref<1x128xf32, #tpu.memory_space<vmem>>, vector<1x128xf32>
    %633 = vector.broadcast %632 : vector<1x128xf32> to vector<8x128xf32>
    %634 = arith.addf %631, %633 : vector<8x128xf32>
    %c0_265 = arith.constant 0 : index
    %c0_266 = arith.constant 0 : index
    %c0_267 = arith.constant 0 : index
    %635 = vector.load %arg29[%c0_265, %c0_266, %c0_267] : memref<1x8x128xf32, #tpu.memory_space<vmem>>, vector<1x8x128xf32>
    %636 = vector.shape_cast %635 : vector<1x8x128xf32> to vector<8x128xf32>
    %637 = vector.shape_cast %634 : vector<8x128xf32> to vector<1x8x128xf32>
    tpu.vector_store %arg29[%c0_265, %c0_266, %c0_267], %637 {strides = array<i32>} : memref<1x8x128xf32, #tpu.memory_space<vmem>>, vector<1x8x128xf32>,
    return
  }
  func.func @transform_0(%arg0: i32) -> (i32, i32, i32) {
    %c0_i32 = arith.constant 0 : i32
    %c0_i32_0 = arith.constant 0 : i32
    %c0_i32_1 = arith.constant 0 : i32
    return %arg0, %c0_i32, %c0_i32_0 : i32, i32, i32
  }
  func.func @transform_1(%arg0: i32) -> (i32, i32, i32) {
    %c0_i32 = arith.constant 0 : i32
    %c0_i32_0 = arith.constant 0 : i32
    %c0_i32_1 = arith.constant 0 : i32
    return %arg0, %c0_i32, %c0_i32_0 : i32, i32, i32
  }
  func.func @transform_2(%arg0: i32) -> (i32, i32, i32) {
    %c0_i32 = arith.constant 0 : i32
    %c0_i32_0 = arith.constant 0 : i32
    %c0_i32_1 = arith.constant 0 : i32
    return %arg0, %c0_i32, %c0_i32_0 : i32, i32, i32
  }
  func.func @transform_3(%arg0: i32) -> (i32, i32, i32) {
    %c0_i32 = arith.constant 0 : i32
    %c0_i32_0 = arith.constant 0 : i32
    %c0_i32_1 = arith.constant 0 : i32
    return %arg0, %c0_i32, %c0_i32_0 : i32, i32, i32
  }
  func.func @transform_4(%arg0: i32) -> (i32, i32, i32) {
    %c0_i32 = arith.constant 0 : i32
    %c0_i32_0 = arith.constant 0 : i32
    %c0_i32_1 = arith.constant 0 : i32
    %c0_i32_2 = arith.constant 0 : i32
    return %c0_i32, %c0_i32_0, %c0_i32_1 : i32, i32, i32
  }
  func.func @transform_5(%arg0: i32) -> (i32, i32, i32) {
    %c0_i32 = arith.constant 0 : i32
    %c0_i32_0 = arith.constant 0 : i32
    %c0_i32_1 = arith.constant 0 : i32
    %c0_i32_2 = arith.constant 0 : i32
    return %c0_i32, %c0_i32_0, %c0_i32_1 : i32, i32, i32
  }
  func.func @transform_6(%arg0: i32) -> (i32, i32, i32) {
    %c0_i32 = arith.constant 0 : i32
    %c0_i32_0 = arith.constant 0 : i32
    %c0_i32_1 = arith.constant 0 : i32
    %c0_i32_2 = arith.constant 0 : i32
    return %c0_i32, %c0_i32_0, %c0_i32_1 : i32, i32, i32
  }
  func.func @transform_7(%arg0: i32) -> (i32, i32, i32) {
    %c0_i32 = arith.constant 0 : i32
    %c0_i32_0 = arith.constant 0 : i32
    %c0_i32_1 = arith.constant 0 : i32
    %c0_i32_2 = arith.constant 0 : i32
    return %c0_i32, %c0_i32_0, %c0_i32_1 : i32, i32, i32
  }
  func.func @transform_8(%arg0: i32) -> (i32, i32, i32) {
    %c0_i32 = arith.constant 0 : i32
    %c0_i32_0 = arith.constant 0 : i32
    %c0_i32_1 = arith.constant 0 : i32
    %c0_i32_2 = arith.constant 0 : i32
    return %c0_i32, %c0_i32_0, %c0_i32_1 : i32, i32, i32
  }
  func.func @transform_9(%arg0: i32) -> (i32, i32, i32) {
    %c0_i32 = arith.constant 0 : i32
    %c0_i32_0 = arith.constant 0 : i32
    %c0_i32_1 = arith.constant 0 : i32
    %c0_i32_2 = arith.constant 0 : i32
    return %c0_i32, %c0_i32_0, %c0_i32_1 : i32, i32, i32
  }
  func.func @transform_10(%arg0: i32) -> (i32, i32, i32) {
    %c0_i32 = arith.constant 0 : i32
    %c0_i32_0 = arith.constant 0 : i32
    %c0_i32_1 = arith.constant 0 : i32
    %c0_i32_2 = arith.constant 0 : i32
    return %c0_i32, %c0_i32_0, %c0_i32_1 : i32, i32, i32
  }
  func.func @transform_11(%arg0: i32) -> (i32, i32, i32) {
    %c0_i32 = arith.constant 0 : i32
    %c0_i32_0 = arith.constant 0 : i32
    %c0_i32_1 = arith.constant 0 : i32
    %c0_i32_2 = arith.constant 0 : i32
    return %c0_i32, %c0_i32_0, %c0_i32_1 : i32, i32, i32
  }
  func.func @transform_12(%arg0: i32) -> (i32, i32, i32) {
    %c0_i32 = arith.constant 0 : i32
    %c0_i32_0 = arith.constant 0 : i32
    %c0_i32_1 = arith.constant 0 : i32
    %c0_i32_2 = arith.constant 0 : i32
    return %c0_i32, %c0_i32_0, %c0_i32_1 : i32, i32, i32
  }
  func.func @transform_13(%arg0: i32) -> (i32, i32, i32) {
    %c0_i32 = arith.constant 0 : i32
    %c0_i32_0 = arith.constant 0 : i32
    %c0_i32_1 = arith.constant 0 : i32
    %c0_i32_2 = arith.constant 0 : i32
    return %c0_i32, %c0_i32_0, %c0_i32_1 : i32, i32, i32
  }
  func.func @transform_14(%arg0: i32) -> (i32, i32, i32) {
    %c0_i32 = arith.constant 0 : i32
    %c0_i32_0 = arith.constant 0 : i32
    %c0_i32_1 = arith.constant 0 : i32
    %c0_i32_2 = arith.constant 0 : i32
    return %c0_i32, %c0_i32_0, %c0_i32_1 : i32, i32, i32
  }
  func.func @transform_15(%arg0: i32) -> (i32, i32, i32) {
    %c0_i32 = arith.constant 0 : i32
    %c0_i32_0 = arith.constant 0 : i32
    %c0_i32_1 = arith.constant 0 : i32
    %c0_i32_2 = arith.constant 0 : i32
    return %c0_i32, %c0_i32_0, %c0_i32_1 : i32, i32, i32
  }
  func.func @transform_16(%arg0: i32) -> (i32, i32, i32) {
    %c0_i32 = arith.constant 0 : i32
    %c0_i32_0 = arith.constant 0 : i32
    %c0_i32_1 = arith.constant 0 : i32
    %c0_i32_2 = arith.constant 0 : i32
    return %c0_i32, %c0_i32_0, %c0_i32_1 : i32, i32, i32
  }
  func.func @transform_17(%arg0: i32) -> (i32, i32, i32) {
    %c0_i32 = arith.constant 0 : i32
    %c0_i32_0 = arith.constant 0 : i32
    %c0_i32_1 = arith.constant 0 : i32
    %c0_i32_2 = arith.constant 0 : i32
    return %c0_i32, %c0_i32_0, %c0_i32_1 : i32, i32, i32
  }
  func.func @transform_18(%arg0: i32) -> (i32, i32, i32) {
    %c0_i32 = arith.constant 0 : i32
    %c0_i32_0 = arith.constant 0 : i32
    %c0_i32_1 = arith.constant 0 : i32
    %c0_i32_2 = arith.constant 0 : i32
    return %c0_i32, %c0_i32_0, %c0_i32_1 : i32, i32, i32
  }
  func.func @transform_19(%arg0: i32) -> (i32, i32, i32) {
    %c0_i32 = arith.constant 0 : i32
    %c0_i32_0 = arith.constant 0 : i32
    %c0_i32_1 = arith.constant 0 : i32
    %c0_i32_2 = arith.constant 0 : i32
    return %c0_i32, %c0_i32_0, %c0_i32_1 : i32, i32, i32
  }
  func.func @transform_20(%arg0: i32) -> (i32, i32, i32) {
    %c0_i32 = arith.constant 0 : i32
    %c0_i32_0 = arith.constant 0 : i32
    %c0_i32_1 = arith.constant 0 : i32
    %c0_i32_2 = arith.constant 0 : i32
    return %c0_i32, %c0_i32_0, %c0_i32_1 : i32, i32, i32
  }
  func.func @transform_21(%arg0: i32) -> (i32, i32, i32) {
    %c0_i32 = arith.constant 0 : i32
    %c0_i32_0 = arith.constant 0 : i32
    %c0_i32_1 = arith.constant 0 : i32
    %c0_i32_2 = arith.constant 0 : i32
    return %c0_i32, %c0_i32_0, %c0_i32_1 : i32, i32, i32
  }
  func.func @transform_22(%arg0: i32) -> (i32, i32, i32) {
    %c0_i32 = arith.constant 0 : i32
    %c0_i32_0 = arith.constant 0 : i32
    %c0_i32_1 = arith.constant 0 : i32
    %c0_i32_2 = arith.constant 0 : i32
    return %c0_i32, %c0_i32_0, %c0_i32_1 : i32, i32, i32
  }
  func.func @transform_23(%arg0: i32) -> (i32, i32, i32) {
    %c0_i32 = arith.constant 0 : i32
    %c0_i32_0 = arith.constant 0 : i32
    %c0_i32_1 = arith.constant 0 : i32
    %c0_i32_2 = arith.constant 0 : i32
    return %c0_i32, %c0_i32_0, %c0_i32_1 : i32, i32, i32
  }
  func.func @transform_24(%arg0: i32) -> (i32, i32) {
    %c0_i32 = arith.constant 0 : i32
    %c0_i32_0 = arith.constant 0 : i32
    %c0_i32_1 = arith.constant 0 : i32
    return %c0_i32, %c0_i32_0 : i32, i32
  }
  func.func @transform_25(%arg0: i32) -> (i32, i32) {
    %c0_i32 = arith.constant 0 : i32
    %c0_i32_0 = arith.constant 0 : i32
    %c0_i32_1 = arith.constant 0 : i32
    return %c0_i32, %c0_i32_0 : i32, i32
  }
  func.func @transform_26(%arg0: i32) -> (i32, i32) {
    %c0_i32 = arith.constant 0 : i32
    %c0_i32_0 = arith.constant 0 : i32
    %c0_i32_1 = arith.constant 0 : i32
    return %c0_i32, %c0_i32_0 : i32, i32
  }
  func.func @transform_27(%arg0: i32) -> (i32, i32) {
    %c0_i32 = arith.constant 0 : i32
    %c0_i32_0 = arith.constant 0 : i32
    %c0_i32_1 = arith.constant 0 : i32
    return %c0_i32, %c0_i32_0 : i32, i32
  }
  func.func @transform_28(%arg0: i32) -> (i32, i32, i32) {
    %c0_i32 = arith.constant 0 : i32
    %c0_i32_0 = arith.constant 0 : i32
    %c0_i32_1 = arith.constant 0 : i32
    return %arg0, %c0_i32, %c0_i32_0 : i32, i32, i32
  }
}

</mosaic_0001>

<bundles_post_ra>
// kernel: decoder_forward.1
= control target key start
LH: loop header
LB: loop body
LE: loop exit
PB: predicated region body
PF: predicated region fallthrough
CT: control target
= control target key end

     0   :  { %s10937_s0 = inlined_call_operand.hbm [shape: f32[2,8,128], index: 0, kind: input, shape index: {}]   ;;  %s10938_s1 = inlined_call_operand.hbm [shape: bf16[2,8,128], index: 1, kind: input, shape index: {}]   ;;  %s10939_s2 = inlined_call_operand.hbm [shape: f32[2,8,8], index: 2, kind: input, shape index: {}]   ;;  %s10940_s3 = inlined_call_operand.hbm [shape: f32[2,8,8], index: 3, kind: input, shape index: {}]   ;;  %s10941_s4 = inlined_call_operand.hbm [shape: bf16[2,128,96], index: 4, kind: input, shape index: {}]   ;;  %s10942_s5 = inlined_call_operand.hbm [shape: f32[2,1,96], index: 5, kind: input, shape index: {}]   ;;  %s10943_s6 = inlined_call_operand.hbm [shape: f32[2,32,128], index: 6, kind: input, shape index: {}]   ;;  %s10944_s7 = inlined_call_operand.hbm [shape: f32[2,1,128], index: 7, kind: input, shape index: {}]   ;;  %s10945_s8 = inlined_call_operand.hbm [shape: f32[2,1,128], index: 8, kind: input, shape index: {}]   ;;  %s10946_s9 = inlined_call_operand.hbm [shape: f32[2,1,128], index: 9, kind: input, shape index: {}]   ;;  %s10947_s10 = inlined_call_operand.hbm [shape: bf16[2,128,32], index: 10, kind: input, shape index: {}]   ;;  %s10948_s11 = inlined_call_operand.hbm [shape: f32[2,1,32], index: 11, kind: input, shape index: {}]   ;;  %s10949_s12 = inlined_call_operand.hbm [shape: bf16[2,128,64], index: 12, kind: input, shape index: {}]   ;;  %s10950_s13 = inlined_call_operand.hbm [shape: f32[2,1,64], index: 13, kind: input, shape index: {}]   ;;  %s10951_s14 = inlined_call_operand.hbm [shape: f32[2,32,128], index: 14, kind: input, shape index: {}]   ;;  %s10952_s15 = inlined_call_operand.hbm [shape: f32[2,1,128], index: 15, kind: input, shape index: {}]   ;;  %s10953_s16 = inlined_call_operand.hbm [shape: f32[2,1,128], index: 16, kind: input, shape index: {}]   ;;  %s10954_s17 = inlined_call_operand.hbm [shape: f32[2,1,128], index: 17, kind: input, shape index: {}]   ;;  %s10955_s18 = inlined_call_operand.hbm [shape: bf16[2,128,128], index: 18, kind: input, shape index: {}]   ;;  %s10956_s19 = inlined_call_operand.hbm [shape: f32[2,1,128], index: 19, kind: input, shape index: {}]   ;;  %s10957_s20 = inlined_call_operand.hbm [shape: bf16[2,128,128], index: 20, kind: input, shape index: {}]   ;;  %s10958_s21 = inlined_call_operand.hbm [shape: f32[2,1,128], index: 21, kind: input, shape index: {}]   ;;  %s10959_s22 = inlined_call_operand.hbm [shape: f32[2,1,128], index: 22, kind: input, shape index: {}]   ;;  %s10960_s23 = inlined_call_operand.hbm [shape: f32[2,1,128], index: 23, kind: input, shape index: {}]   ;;  %s10961_s24 = inlined_call_operand.hbm [shape: f32[1,128], index: 24, kind: input, shape index: {}]   ;;  %s10962_s25 = inlined_call_operand.hbm [shape: f32[1,128], index: 25, kind: input, shape index: {}]   ;;  %s10963_s26 = inlined_call_operand.hbm [shape: bf16[128,128], index: 26, kind: input, shape index: {}]   ;;  %s10964_s27 = inlined_call_operand.hbm [shape: f32[1,128], index: 27, kind: input, shape index: {}]   ;;  %s10965_s28 = inlined_call_operand.hbm [shape: f32[2,8,128], index: 28, kind: output, shape index: {}]  }
   0x1   :  { %11030 = sst [smem:[#allocation70_spill]] %s10937_s0 }
   0x2   :  { %11031 = sst [smem:[#allocation71_spill]] %s10938_s1 }
   0x3   :  { %11032 = sst [smem:[#allocation72_spill]] %s10939_s2 }
   0x4   :  { %11033 = sst [smem:[#allocation73_spill]] %s10940_s3 }
   0x5   :  { %11034 = sst [smem:[#allocation74_spill]] %s10941_s4 }
   0x6   :  { %11035 = sst [smem:[#allocation75_spill]] %s10942_s5 }
   0x7   :  { %11036 = sst [smem:[#allocation76_spill]] %s10943_s6 }
   0x8   :  { %11037 = sst [smem:[#allocation77_spill]] %s10944_s7 }
   0x9   :  { %11038 = sst [smem:[#allocation78_spill]] %s10945_s8 }
   0xa   :  { %11039 = sst [smem:[#allocation79_spill]] %s10946_s9 }
   0xb   :  { %11040 = sst [smem:[#allocation80_spill]] %s10947_s10 }
   0xc   :  { %11041 = sst [smem:[#allocation81_spill]] %s10948_s11 }
   0xd   :  { %11042 = sst [smem:[#allocation82_spill]] %s10949_s12 }
   0xe   :  { %11043 = sst [smem:[#allocation83_spill]] %s10950_s13 }
   0xf   :  { %11044 = sst [smem:[#allocation84_spill]] %s10951_s14 }
  0x10   :  { %11045 = sst [smem:[#allocation85_spill]] %s10952_s15 }
  0x11   :  { %11046 = sst [smem:[#allocation86_spill]] %s10953_s16 }
  0x12   :  { %11047 = sst [smem:[#allocation87_spill]] %s10954_s17 }
  0x13   :  { %11048 = sst [smem:[#allocation88_spill]] %s10955_s18 }
  0x14   :  { %11049 = sst [smem:[#allocation89_spill]] %s10956_s19 }
  0x15   :  { %11050 = sst [smem:[#allocation90_spill]] %s10957_s20 }
  0x16   :  { %11051 = sst [smem:[#allocation91_spill]] %s10958_s21 }
  0x17   :  { %11052 = sst [smem:[#allocation92_spill]] %s10959_s22 }
  0x18   :  { %11053 = sst [smem:[#allocation93_spill]] %s10960_s23 }
  0x19   :  { %11054 = sst [smem:[#allocation94_spill]] %s10961_s24 }
  0x1a   :  { %11055 = sst [smem:[#allocation95_spill]] %s10962_s25 }
  0x1b   :  { %11056 = sst [smem:[#allocation96_spill]] %s10963_s26 }
  0x1c   :  { %11057 = sst [smem:[#allocation97_spill]] %s10964_s27 }
  0x1d   :  { %11058 = sst [smem:[#allocation98_spill]] %s10965_s28 }
  0x1e   :  { %33 = vsyncpa [#allocation3], 0 }
  0x1f   :  { %35 = vsyncpa [#allocation3 + $0x1], 0 }
  0x20   :  { %36 = vsyncpa [#allocation6], 0 }
  0x21   :  { %38 = vsyncpa [#allocation6 + $0x1], 0 }
  0x22   :  { %39 = vsyncpa [#allocation9], 0 }
  0x23   :  { %41 = vsyncpa [#allocation9 + $0x1], 0 }
  0x24   :  { %42 = vsyncpa [#allocation12], 0 }
  0x25   :  { %43 = vsyncpa [#allocation15], 0 }
  0x26   :  { %44 = vsyncpa [#allocation18], 0 }
  0x27   :  { %45 = vsyncpa [#allocation21], 0 }
  0x28   :  { %46 = vsyncpa [#allocation24], 0 }
  0x29   :  { %47 = vsyncpa [#allocation27], 0 }
  0x2a   :  { %48 = vsyncpa [#allocation30], 0 }
  0x2b   :  { %49 = vsyncpa [#allocation33], 0 }
  0x2c   :  { %50 = vsyncpa [#allocation36], 0 }
  0x2d   :  { %51 = vsyncpa [#allocation39], 0 }
  0x2e   :  { %52 = vsyncpa [#allocation42], 0 }
  0x2f   :  { %53 = vsyncpa [#allocation45], 0 }
  0x30   :  { %54 = vsyncpa [#allocation4], 0 }
  0x31   :  { %56 = vsyncpa [#allocation4 + $0x1], 0  ;;  %s9529_s8 = smov 0   ;;  %s9531_s5 = smov 0  }
  0x32   :  { %s9533_s9 = smov 0   ;;  %s9535_s30 = smov 0  }
  0x33 LB: > { %11059 = sst [smem:[#allocation64_spill]] %s9322_s8  ;;  %s9336_s3 = smov [#allocation10]   ;;  %s9334_s30 = sphi %s9535_s30, %s11151_s30   ;;  %s9330_s9 = sphi %s9533_s9, %s11153_s9   ;;  %s9326_s5 = sphi %s9531_s5, %s11155_s5   ;;  %s9322_s8 = sphi %s9529_s8, %s11154_s8  }
  0x34   : > { %11060 = sst [smem:[#allocation65_spill]] %s9330_s9  ;;  %s713_s6 = sshll.u32 %s9336_s3, 4  ;;  %s9555_s6 = int_to_ptr.vmem [resolvable:$true] %s713_s6 }
  0x35   : > { %s9550_s10 = sadd.s32 4294967295, %s9334_s30   ;;  %p7021_p0 = scmp.ge.s32.totalorder %s9334_s30, 1 }
  0x36   : > { %p10992_p1 = scmp.eq.s32.totalorder %s9550_s10, 0  ;;  %p701_p2 = scmp.lt.s32.totalorder %s9334_s30, 3 }
  0x37   : > { %s9337_s11 = smov [#allocation11]   ;;  %s9338_s7 = smov [#allocation14]  }
  0x38   : > { %p9557_p3 = pnand %p7021_p0, %p701_p2  ;;  %s726_s29 = sshll.u32 %s9337_s11, 4  ;;  %s9570_s29 = int_to_ptr.vmem [resolvable:$true] %s726_s29 }
  0x39   : > { %s9572_s12 = sshll.u32 %s9338_s7, 4  ;;  %s11064_s3 = sld [smem:[#allocation74_spill]]  ;;  %s753_s12 = int_to_ptr.vmem [resolvable:$true] %s9572_s12 }
  0x3a   : > { %s11061_s0 = scalar_select %p9557_p3, 1, 0 }
  0x3b   : > { %p8032_p5 = pneg %p9557_p3 }
  0x3c   : > { %11062 = sst [smem:[#allocation66_spill]] %s11061_s0 }
  0x3d   : > { %p9566_p6 = pnand %p8032_p5, %p10992_p1 }
  0x3f   : > { %s11063_s2 = scalar_select %p9566_p6, 1, 0 }
  0x40   : > { %s8416_s28 = scalar_lea.hbm %s11064_s3, 2048  ;;  %p9582_p8 = pneg %p9566_p6 }
  0x41   : > { %p8417_p7 = scmp.ne.s32.totalorder %s11064_s3, %s8416_s28  ;;  %p8423_p11 = scmp.lt.u32.totalorder %s8416_s28, %s11064_s3 }
  0x42   : > { %s11065_s11 = scalar_select %p9582_p8, 1, 0 }
  0x43   : > { %p8419_p9 = pnand %p9582_p8, %p8417_p7 }
  0x45   : > { %p8420_p10 = pneg %p8419_p9 }
  0x47   : > { %p8425_p12 = pnand %p8423_p11, %p8420_p10 }
  0x49   : > { %8428 = shalt.err (!%p8425_p12)
}
  0x4a   : > { %s8429_s27 = scalar_lea.vmem %s9555_s6, 2048  ;;  %p8437_p5 = scmp.lt.s32.totalorder %s9555_s6, %s9555_s6 }
  0x4b   : > { %p8430_p13 = scmp.ne.s32.totalorder %s9555_s6, %s8429_s27  ;;  %p8438_p4 = scmp.lt.s32.totalorder %s8429_s27, %s8429_s27 }
  0x4d   : > { %p8432_p0 = pnand %p8430_p13, %p9582_p8  ;;  %p8439_p7 = por %p8438_p4, %p8437_p5 }
  0x4f   : > { %p8433_p2 = pneg %p8432_p0 }
  0x51   : > { %p8440_p9 = pnand %p8439_p7, %p8433_p2 }
  0x53   : > { %8443 = shalt.err (!%p8440_p9)
}
  0x54   : > { %s10988_s0 = smov 64   ;;  %s10990_s26 = smov 4  }
  0x55   : > { %8035 = dma.hbm_to_vmem [thread:$0]  (!%p9566_p6), %s11064_s3, 2048, %s9555_s6, [#allocation9], %s10988_s0, %s10988_s0, %s10990_s26  }
  0x56   : > { %s11066_s24 = sld [smem:[#allocation75_spill]] }
  0x5c   : > { %s8444_s27 = scalar_lea.hbm %s11066_s24, 32 }
  0x5d   : > { %p8445_p4 = scmp.ne.s32.totalorder %s11066_s24, %s8444_s27  ;;  %p8451_p12 = scmp.lt.u32.totalorder %s8444_s27, %s11066_s24 }
  0x5f   : > { %p8447_p10 = pnand %p8445_p4, %p9582_p8 }
  0x61   : > { %p8448_p11 = pneg %p8447_p10 }
  0x63   : > { %p8453_p13 = pnand %p8451_p12, %p8448_p11 }
  0x65   : > { %8456 = shalt.err (!%p8453_p13)
}
  0x66   : > { %s8457_s6 = scalar_lea.vmem %s9570_s29, 32  ;;  %p8465_p7 = scmp.lt.s32.totalorder %s9570_s29, %s9570_s29 }
  0x67   : > { %p8458_p0 = scmp.ne.s32.totalorder %s9570_s29, %s8457_s6  ;;  %p8466_p9 = scmp.lt.s32.totalorder %s8457_s6, %s8457_s6 }
  0x69   : > { %p8460_p2 = pnand %p8458_p0, %p9582_p8  ;;  %p8467_p4 = por %p8466_p9, %p8465_p7 }
  0x6b   : > { %p8461_p5 = pneg %p8460_p2 }
  0x6d   : > { %p8468_p10 = pnand %p8467_p4, %p8461_p5 }
  0x6f   : > { %8471 = shalt.err (!%p8468_p10)
}
  0x70   : > { %s10998_s20 = smov 16   ;;  %s11000_s16 = smov 1  }
  0x71   : > { %8038 = dma.hbm_to_vmem [thread:$0]  (!%p9566_p6), %s11066_s24, 32, %s9570_s29, [#allocation12], %s10998_s20, %s10998_s20, %s11000_s16  }
  0x72   : > { %s11067_s4 = sld [smem:[#allocation77_spill]] }
  0x78   : > { %s8472_s7 = scalar_lea.hbm %s11067_s4, 32 }
  0x79   : > { %p8473_p11 = scmp.ne.s32.totalorder %s11067_s4, %s8472_s7  ;;  %p8479_p0 = scmp.lt.u32.totalorder %s8472_s7, %s11067_s4 }
  0x7b   : > { %p8475_p12 = pnand %p8473_p11, %p9582_p8 }
  0x7d   : > { %p8476_p13 = pneg %p8475_p12 }
  0x7f   : > { %p8481_p2 = pnand %p8479_p0, %p8476_p13 }
  0x81   : > { %8484 = shalt.err (!%p8481_p2)
}
  0x82   : > { %s8485_s18 = scalar_lea.vmem %s753_s12, 32  ;;  %p8493_p4 = scmp.lt.s32.totalorder %s753_s12, %s753_s12 }
  0x83   : > { %p8486_p5 = scmp.ne.s32.totalorder %s753_s12, %s8485_s18  ;;  %p8494_p10 = scmp.lt.s32.totalorder %s8485_s18, %s8485_s18 }
  0x85   : > { %p8488_p7 = pnand %p8486_p5, %p9582_p8  ;;  %p8495_p1 = por %p8494_p10, %p8493_p4 }
  0x87   : > { %p8489_p9 = pneg %p8488_p7 }
  0x89   : > { %p8496_p3 = pnand %p8495_p1, %p8489_p9 }
  0x8b   : > { %8499 = shalt.err (!%p8496_p3)
}
  0x8c   : > { %8044 = dma.hbm_to_vmem [thread:$0]  (!%p9566_p6), %s11067_s4, 32, %s753_s12, [#allocation15], %s10998_s20, %s10998_s20, %s11000_s16  }
  0x8d   : > { %s9343_s26 = smov [#allocation17]   ;;  %s9344_s28 = smov [#allocation20]  }
  0x8e   : > { %s778_s22 = sshll.u32 %s9343_s26, 4  ;;  %s804_s1 = sshll.u32 %s9344_s28, 4  ;;  %s779_s22 = int_to_ptr.vmem [resolvable:$true] %s778_s22  ;;  %s805_s1 = int_to_ptr.vmem [resolvable:$true] %s804_s1 }
  0x8f   : > { %s11068_s6 = sld [smem:[#allocation79_spill]] }
  0x95   : > { %s8500_s18 = scalar_lea.hbm %s11068_s6, 32 }
  0x96   : > { %p8501_p1 = scmp.ne.s32.totalorder %s11068_s6, %s8500_s18  ;;  %p8507_p12 = scmp.lt.u32.totalorder %s8500_s18, %s11068_s6 }
  0x98   : > { %p8503_p3 = pnand %p8501_p1, %p9582_p8 }
  0x9a   : > { %p8504_p11 = pneg %p8503_p3 }
  0x9c   : > { %p8509_p13 = pnand %p8507_p12, %p8504_p11 }
  0x9e   : > { %8512 = shalt.err (!%p8509_p13)
}
  0x9f   : > { %s8513_s12 = scalar_lea.vmem %s779_s22, 32  ;;  %p8521_p7 = scmp.lt.s32.totalorder %s779_s22, %s779_s22 }
  0xa0   : > { %p8514_p0 = scmp.ne.s32.totalorder %s779_s22, %s8513_s12  ;;  %p8522_p9 = scmp.lt.s32.totalorder %s8513_s12, %s8513_s12 }
  0xa2   : > { %p8516_p2 = pnand %p8514_p0, %p9582_p8  ;;  %p8523_p4 = por %p8522_p9, %p8521_p7 }
  0xa4   : > { %p8517_p5 = pneg %p8516_p2 }
  0xa6   : > { %p8524_p10 = pnand %p8523_p4, %p8517_p5 }
  0xa8   : > { %8527 = shalt.err (!%p8524_p10)
}
  0xa9   : > { %8050 = dma.hbm_to_vmem [thread:$0]  (!%p9566_p6), %s11068_s6, 32, %s779_s22, [#allocation18], %s10998_s20, %s10998_s20, %s11000_s16  }
  0xaa   : > { %s11069_s26 = sld [smem:[#allocation81_spill]] }
  0xb0   : > { %s8528_s28 = scalar_lea.hbm %s11069_s26, 32 }
  0xb1   : > { %p8529_p1 = scmp.ne.s32.totalorder %s11069_s26, %s8528_s28  ;;  %p8535_p12 = scmp.lt.u32.totalorder %s8528_s28, %s11069_s26 }
  0xb3   : > { %p8531_p3 = pnand %p8529_p1, %p9582_p8 }
  0xb5   : > { %p8532_p11 = pneg %p8531_p3 }
  0xb7   : > { %p8537_p13 = pnand %p8535_p12, %p8532_p11 }
  0xb9   : > { %8540 = shalt.err (!%p8537_p13)
}
  0xba   : > { %s8541_s12 = scalar_lea.vmem %s805_s1, 32  ;;  %p8549_p7 = scmp.lt.s32.totalorder %s805_s1, %s805_s1 }
  0xbb   : > { %p8542_p0 = scmp.ne.s32.totalorder %s805_s1, %s8541_s12  ;;  %p8550_p9 = scmp.lt.s32.totalorder %s8541_s12, %s8541_s12 }
  0xbd   : > { %p8544_p2 = pnand %p8542_p0, %p9582_p8  ;;  %p8551_p4 = por %p8550_p9, %p8549_p7 }
  0xbf   : > { %p8545_p5 = pneg %p8544_p2 }
  0xc1   : > { %p8552_p10 = pnand %p8551_p4, %p8545_p5 }
  0xc3   : > { %8555 = shalt.err (!%p8552_p10)
}
  0xc4   : > { %8056 = dma.hbm_to_vmem [thread:$0]  (!%p9566_p6), %s11069_s26, 32, %s805_s1, [#allocation21], %s10998_s20, %s10998_s20, %s11000_s16  }
  0xc5   : > { %s9345_s24 = smov [#allocation23]   ;;  %s9346_s0 = smov [#allocation26]  }
  0xc6   : > { %s830_s3 = sshll.u32 %s9345_s24, 4  ;;  %s856_s28 = sshll.u32 %s9346_s0, 4  ;;  %s831_s3 = int_to_ptr.vmem [resolvable:$true] %s830_s3  ;;  %s857_s28 = int_to_ptr.vmem [resolvable:$true] %s856_s28 }
  0xc7   : > { %s11070_s13 = sld [smem:[#allocation83_spill]] }
  0xcd   : > { %s8556_s18 = scalar_lea.hbm %s11070_s13, 32 }
  0xce   : > { %p8557_p1 = scmp.ne.s32.totalorder %s11070_s13, %s8556_s18  ;;  %p8563_p12 = scmp.lt.u32.totalorder %s8556_s18, %s11070_s13 }
  0xd0   : > { %p8559_p3 = pnand %p8557_p1, %p9582_p8 }
  0xd2   : > { %p8560_p11 = pneg %p8559_p3 }
  0xd4   : > { %p8565_p13 = pnand %p8563_p12, %p8560_p11 }
  0xd6   : > { %8568 = shalt.err (!%p8565_p13)
}
  0xd7   : > { %s8569_s1 = scalar_lea.vmem %s831_s3, 32  ;;  %p8577_p7 = scmp.lt.s32.totalorder %s831_s3, %s831_s3 }
  0xd8   : > { %p8570_p0 = scmp.ne.s32.totalorder %s831_s3, %s8569_s1  ;;  %p8578_p9 = scmp.lt.s32.totalorder %s8569_s1, %s8569_s1 }
  0xda   : > { %p8572_p2 = pnand %p8570_p0, %p9582_p8  ;;  %p8579_p4 = por %p8578_p9, %p8577_p7 }
  0xdc   : > { %p8573_p5 = pneg %p8572_p2 }
  0xde   : > { %p8580_p10 = pnand %p8579_p4, %p8573_p5 }
  0xe0   : > { %8583 = shalt.err (!%p8580_p10)
}
  0xe1   : > { %8062 = dma.hbm_to_vmem [thread:$0]  (!%p9566_p6), %s11070_s13, 32, %s831_s3, [#allocation24], %s10998_s20, %s10998_s20, %s11000_s16  }
  0xe2   : > { %s11071_s15 = sld [smem:[#allocation85_spill]] }
  0xe8   : > { %s8584_s7 = scalar_lea.hbm %s11071_s15, 32 }
  0xe9   : > { %p8585_p1 = scmp.ne.s32.totalorder %s11071_s15, %s8584_s7  ;;  %p8591_p12 = scmp.lt.u32.totalorder %s8584_s7, %s11071_s15 }
  0xeb   : > { %p8587_p3 = pnand %p8585_p1, %p9582_p8 }
  0xed   : > { %p8588_p11 = pneg %p8587_p3 }
  0xef   : > { %p8593_p13 = pnand %p8591_p12, %p8588_p11 }
  0xf1   : > { %8596 = shalt.err (!%p8593_p13)
}
  0xf2   : > { %s8597_s22 = scalar_lea.vmem %s857_s28, 32  ;;  %p8605_p7 = scmp.lt.s32.totalorder %s857_s28, %s857_s28 }
  0xf3   : > { %p8598_p0 = scmp.ne.s32.totalorder %s857_s28, %s8597_s22  ;;  %p8606_p9 = scmp.lt.s32.totalorder %s8597_s22, %s8597_s22 }
  0xf5   : > { %p8600_p2 = pnand %p8598_p0, %p9582_p8  ;;  %p8607_p4 = por %p8606_p9, %p8605_p7 }
  0xf7   : > { %p8601_p5 = pneg %p8600_p2 }
  0xf9   : > { %p8608_p10 = pnand %p8607_p4, %p8601_p5 }
  0xfb   : > { %8611 = shalt.err (!%p8608_p10)
}
  0xfc   : > { %8068 = dma.hbm_to_vmem [thread:$0]  (!%p9566_p6), %s11071_s15, 32, %s857_s28, [#allocation27], %s10998_s20, %s10998_s20, %s11000_s16  }
  0xfd   : > { %s9347_s4 = smov [#allocation29]   ;;  %s9348_s24 = smov [#allocation32]  }
  0xfe   : > { %s882_s14 = sshll.u32 %s9347_s4, 4  ;;  %s908_s0 = sshll.u32 %s9348_s24, 4  ;;  %s883_s14 = int_to_ptr.vmem [resolvable:$true] %s882_s14  ;;  %s909_s0 = int_to_ptr.vmem [resolvable:$true] %s908_s0 }
  0xff   : > { %s11072_s17 = sld [smem:[#allocation87_spill]] }
 0x105   : > { %s8612_s18 = scalar_lea.hbm %s11072_s17, 32 }
 0x106   : > { %p8613_p1 = scmp.ne.s32.totalorder %s11072_s17, %s8612_s18  ;;  %p8619_p12 = scmp.lt.u32.totalorder %s8612_s18, %s11072_s17 }
 0x108   : > { %p8615_p3 = pnand %p8613_p1, %p9582_p8 }
 0x10a   : > { %p8616_p11 = pneg %p8615_p3 }
 0x10c   : > { %p8621_p13 = pnand %p8619_p12, %p8616_p11 }
 0x10e   : > { %8624 = shalt.err (!%p8621_p13)
}
 0x10f   : > { %s8625_s28 = scalar_lea.vmem %s883_s14, 32  ;;  %p8633_p7 = scmp.lt.s32.totalorder %s883_s14, %s883_s14 }
 0x110   : > { %p8626_p0 = scmp.ne.s32.totalorder %s883_s14, %s8625_s28  ;;  %p8634_p9 = scmp.lt.s32.totalorder %s8625_s28, %s8625_s28 }
 0x112   : > { %p8628_p2 = pnand %p8626_p0, %p9582_p8  ;;  %p8635_p4 = por %p8634_p9, %p8633_p7 }
 0x114   : > { %p8629_p5 = pneg %p8628_p2 }
 0x116   : > { %p8636_p10 = pnand %p8635_p4, %p8629_p5 }
 0x118   : > { %8639 = shalt.err (!%p8636_p10)
}
 0x119   : > { %8074 = dma.hbm_to_vmem [thread:$0]  (!%p9566_p6), %s11072_s17, 32, %s883_s14, [#allocation30], %s10998_s20, %s10998_s20, %s11000_s16  }
 0x11a   : > { %s11073_s19 = sld [smem:[#allocation89_spill]] }
 0x120   : > { %s8640_s27 = scalar_lea.hbm %s11073_s19, 32 }
 0x121   : > { %p8641_p1 = scmp.ne.s32.totalorder %s11073_s19, %s8640_s27  ;;  %p8647_p12 = scmp.lt.u32.totalorder %s8640_s27, %s11073_s19 }
 0x123   : > { %p8643_p3 = pnand %p8641_p1, %p9582_p8 }
 0x125   : > { %p8644_p11 = pneg %p8643_p3 }
 0x127   : > { %p8649_p13 = pnand %p8647_p12, %p8644_p11 }
 0x129   : > { %8652 = shalt.err (!%p8649_p13)
}
 0x12a   : > { %s8653_s3 = scalar_lea.vmem %s909_s0, 32  ;;  %p8661_p7 = scmp.lt.s32.totalorder %s909_s0, %s909_s0 }
 0x12b   : > { %p8654_p0 = scmp.ne.s32.totalorder %s909_s0, %s8653_s3  ;;  %p8662_p9 = scmp.lt.s32.totalorder %s8653_s3, %s8653_s3 }
 0x12d   : > { %p8656_p2 = pnand %p8654_p0, %p9582_p8  ;;  %p8663_p4 = por %p8662_p9, %p8661_p7 }
 0x12f   : > { %p8657_p5 = pneg %p8656_p2 }
 0x131   : > { %p8664_p10 = pnand %p8663_p4, %p8657_p5 }
 0x133   : > { %8667 = shalt.err (!%p8664_p10)
}
 0x134   : > { %8080 = dma.hbm_to_vmem [thread:$0]  (!%p9566_p6), %s11073_s19, 32, %s909_s0, [#allocation33], %s10998_s20, %s10998_s20, %s11000_s16  }
 0x135   : > { %s9349_s1 = smov [#allocation35]   ;;  %s9350_s24 = smov [#allocation38]  }
 0x136   : > { %s934_s4 = sshll.u32 %s9349_s1, 4  ;;  %s960_s7 = sshll.u32 %s9350_s24, 4  ;;  %s935_s4 = int_to_ptr.vmem [resolvable:$true] %s934_s4  ;;  %s961_s7 = int_to_ptr.vmem [resolvable:$true] %s960_s7 }
 0x137   : > { %s11074_s21 = sld [smem:[#allocation91_spill]] }
 0x13d   : > { %s8668_s29 = scalar_lea.hbm %s11074_s21, 32 }
 0x13e   : > { %p8669_p1 = scmp.ne.s32.totalorder %s11074_s21, %s8668_s29  ;;  %p8675_p12 = scmp.lt.u32.totalorder %s8668_s29, %s11074_s21 }
 0x140   : > { %p8671_p3 = pnand %p8669_p1, %p9582_p8 }
 0x142   : > { %p8672_p11 = pneg %p8671_p3 }
 0x144   : > { %p8677_p13 = pnand %p8675_p12, %p8672_p11 }
 0x146   : > { %8680 = shalt.err (!%p8677_p13)
}
 0x147   : > { %s8681_s0 = scalar_lea.vmem %s935_s4, 32  ;;  %p8689_p7 = scmp.lt.s32.totalorder %s935_s4, %s935_s4 }
 0x148   : > { %p8682_p0 = scmp.ne.s32.totalorder %s935_s4, %s8681_s0  ;;  %p8690_p9 = scmp.lt.s32.totalorder %s8681_s0, %s8681_s0 }
 0x14a   : > { %p8684_p2 = pnand %p8682_p0, %p9582_p8  ;;  %p8691_p4 = por %p8690_p9, %p8689_p7 }
 0x14c   : > { %p8685_p5 = pneg %p8684_p2 }
 0x14e   : > { %p8692_p10 = pnand %p8691_p4, %p8685_p5 }
 0x150   : > { %8695 = shalt.err (!%p8692_p10)
}
 0x151   : > { %8086 = dma.hbm_to_vmem [thread:$0]  (!%p9566_p6), %s11074_s21, 32, %s935_s4, [#allocation36], %s10998_s20, %s10998_s20, %s11000_s16  }
 0x152   : > { %s11075_s23 = sld [smem:[#allocation93_spill]] }
 0x158   : > { %s8696_s18 = scalar_lea.hbm %s11075_s23, 32 }
 0x159   : > { %p8697_p1 = scmp.ne.s32.totalorder %s11075_s23, %s8696_s18  ;;  %p8703_p12 = scmp.lt.u32.totalorder %s8696_s18, %s11075_s23 }
 0x15b   : > { %p8699_p3 = pnand %p8697_p1, %p9582_p8 }
 0x15d   : > { %p8700_p11 = pneg %p8699_p3 }
 0x15f   : > { %p8705_p13 = pnand %p8703_p12, %p8700_p11 }
 0x161   : > { %8708 = shalt.err (!%p8705_p13)
}
 0x162   : > { %s8709_s14 = scalar_lea.vmem %s961_s7, 32  ;;  %p8717_p7 = scmp.lt.s32.totalorder %s961_s7, %s961_s7 }
 0x163   : > { %p8710_p0 = scmp.ne.s32.totalorder %s961_s7, %s8709_s14  ;;  %p8718_p9 = scmp.lt.s32.totalorder %s8709_s14, %s8709_s14 }
 0x165   : > { %p8712_p2 = pnand %p8710_p0, %p9582_p8  ;;  %p8719_p4 = por %p8718_p9, %p8717_p7 }
 0x167   : > { %p8713_p5 = pneg %p8712_p2 }
 0x169   : > { %p8720_p10 = pnand %p8719_p4, %p8713_p5 }
 0x16b   : > { %8723 = shalt.err (!%p8720_p10)
}
 0x16c   : > { %8092 = dma.hbm_to_vmem [thread:$0]  (!%p9566_p6), %s11075_s23, 32, %s961_s7, [#allocation39], %s10998_s20, %s10998_s20, %s11000_s16  }
 0x16d   : > { %s9351_s28 = smov [#allocation41]   ;;  %s11076_s25 = sld [smem:[#allocation95_spill]] }
 0x16e   : > { %s985_s1 = sshll.u32 %s9351_s28, 4  ;;  %s986_s1 = int_to_ptr.vmem [resolvable:$true] %s985_s1 }
 0x173   : > { %s8724_s18 = scalar_lea.hbm %s11076_s25, 16 }
 0x174   : > { %p8725_p1 = scmp.ne.s32.totalorder %s11076_s25, %s8724_s18  ;;  %p8731_p12 = scmp.lt.u32.totalorder %s8724_s18, %s11076_s25 }
 0x176   : > { %p8727_p3 = pnand %p8725_p1, %p9582_p8 }
 0x178   : > { %p8728_p11 = pneg %p8727_p3 }
 0x17a   : > { %p8733_p13 = pnand %p8731_p12, %p8728_p11 }
 0x17c   : > { %8736 = shalt.err (!%p8733_p13)
}
 0x17d   : > { %s8737_s7 = scalar_lea.vmem %s986_s1, 16  ;;  %s8744_s14 = scalar_lea.vmem %s986_s1, 32 }
 0x17e   : > { %p8738_p0 = scmp.ne.s32.totalorder %s986_s1, %s8737_s7  ;;  %p8745_p7 = scmp.lt.s32.totalorder %s986_s1, %s986_s1 }
 0x17f   : > { %p8746_p9 = scmp.lt.s32.totalorder %s8744_s14, %s8737_s7 }
 0x180   : > { %p8740_p2 = pnand %p8738_p0, %p9582_p8 }
 0x181   : > { %p8747_p4 = por %p8746_p9, %p8745_p7 }
 0x182   : > { %p8741_p5 = pneg %p8740_p2 }
 0x184   : > { %p8748_p10 = pnand %p8747_p4, %p8741_p5 }
 0x186   : > { %8751 = shalt.err (!%p8748_p10)
}
 0x187   : > { %8098 = dma.hbm_to_vmem [thread:$0]  (!%p9566_p6), %s11076_s25, 16, %s986_s1, [#allocation42]  }
 0x188   : > { %s7020_s28 = sadd.s32 4294967294, %s9334_s30   ;;  %s9842_s24 = sadd.s32 1, %s9334_s30  }
 0x189   : > { %11077 = sst [smem:[#allocation67_spill]] %s9842_s24  ;;  %s66_s27 = ssub.s32 %s9334_s30, %s9842_s24 }
 0x18a   : > { %s69_s18 = sadd.s32 1, %s9330_s9  ;;  %p67_p1 = scmp.eq.s32.totalorder %s66_s27, 0 }
 0x18b   : > { %p76_p3 = scmp.ne.s32.totalorder %s9330_s9, %s9326_s5  ;;  %p77_p11 = scmp.eq.s32.totalorder %s9334_s30, 0 }
 0x18c   : > { %p82_p12 = scmp.ne.s32.totalorder %s9326_s5, %s9322_s8  ;;  %p11079_p0 = scmp.eq.s32.totalorder %s9550_s10, 0 }
 0x18d   : > { %s9853_s29 = scalar_select %p67_p1, %s9330_s9, %s69_s18  }
 0x18e   : > { %p78_p13 = por %p77_p11, %p76_p3  ;;  %p9857_p2 = por %p11079_p0, %p82_p12 }
 0x18f   : > { %11078 = sst [smem:[#allocation68_spill]] %s9853_s29  ;;  %p688_p5 = scmp.eq.s32.totalorder %s9550_s10, 1 }
 0x190   : > { %s11080_s12 = scalar_select %p9857_p2, 1, 0 }
 0x191   : > { %p694_p7 = scmp.eq.s32.totalorder %s7020_s28, 1  ;;  %p8146_p9 = scmp.lt.s32.totalorder %s9334_s30, 2 }
 0x192   : > { %s9864_s1 = sand.u32 1, %s9330_s9   ;;  %p9866_p4 = por %p688_p5, %p76_p3 }
 0x193   : > { %p9870_p10 = por %p694_p7, %p82_p12  ;;  %p9874_p1 = pnand %p8146_p9, %p78_p13 }
 0x194   : > { %s11081_s22 = scalar_select %p9866_p4, 1, 0 }
 0x195   : > { %s11082_s3 = scalar_select %p9870_p10, 1, 0 }
 0x196   : > { %s11084_s7 = scalar_select %p9874_p1, 1, 0 }
 0x197   : > { %11083 = sst [smem:[#allocation69_spill]] %s11082_s3  ;;  %s11004_s14 = sand.u32 1, %s9334_s30  }
 0x198   : > { %s7049_s4 = sshll.u32 %s9864_s1, 2  ;;  %s7050_s0 = sshll.u32 %s9334_s30, 6 }
 0x199   : > { %s1042_s28 = scalar_lea.vmem [#allocation5], %s7049_s4  ;;  %s11085_s16 = sld [smem:[#allocation71_spill]] }
 0x19a   : > { %s1049_s27 = sshll.u32 %s1042_s28, 4  ;;  %s9890_s13 = scalar_lea.sflag [#allocation6], %s11004_s14  ;;  %s9886_s27 = int_to_ptr.vmem [resolvable:$true] %s1049_s27 }
 0x19b   : > { %p9896_p11 = pneg %p9874_p1 }
 0x19d   : > { %s11086_s4 = scalar_select %p9896_p11, 1, 0 }
 0x19f   : > { %s9884_s6 = scalar_lea.hbm %s11085_s16, %s7050_s0  ;;  %s8757_s28 = scalar_lea.hbm %s11085_s16, 128 }
 0x1a0   : > { %s8752_s15 = scalar_lea.hbm %s9884_s6, 64  ;;  %p8758_p0 = scmp.lt.u32.totalorder %s9884_s6, %s11085_s16 }
 0x1a1   : > { %p8753_p3 = scmp.ne.s32.totalorder %s9884_s6, %s8752_s15  ;;  %p8759_p5 = scmp.lt.u32.totalorder %s8757_s28, %s8752_s15 }
 0x1a2   : > { %p8761_p9 = scmp.lt.u32.totalorder %s8752_s15, %s9884_s6 }
 0x1a3   : > { %p8755_p12 = pnand %p9896_p11, %p8753_p3  ;;  %p8760_p7 = por %p8759_p5, %p8758_p0 }
 0x1a5   : > { %p8756_p13 = pneg %p8755_p12  ;;  %p8762_p10 = por %p8761_p9, %p8760_p7 }
 0x1a7   : > { %p8763_p4 = pnand %p8762_p10, %p8756_p13 }
 0x1a9   : > { %8766 = shalt.err (!%p8763_p4)
}
 0x1aa   : > { %s8767_s14 = scalar_lea.vmem %s9886_s27, 64  ;;  %s9352_s20 = smov [#allocation5]  }
 0x1ab   : > { %p8768_p3 = scmp.ne.s32.totalorder %s9886_s27, %s8767_s14  ;;  %s8772_s0 = sshll.u32 %s9352_s20, 4  ;;  %s8773_s0 = int_to_ptr.vmem [resolvable:$false] %s8772_s0 }
 0x1ac   : > { %s8774_s17 = scalar_lea.vmem %s8773_s0, 128  ;;  %p8775_p6 = scmp.lt.s32.totalorder %s9886_s27, %s8773_s0 }
 0x1ad   : > { %p8770_p12 = pnand %p8768_p3, %p9896_p11  ;;  %p8776_p8 = scmp.lt.s32.totalorder %s8774_s17, %s8767_s14 }
 0x1af   : > { %p8771_p2 = pneg %p8770_p12  ;;  %p8777_p0 = por %p8776_p8, %p8775_p6 }
 0x1b1   : > { %p8778_p5 = pnand %p8777_p0, %p8771_p2 }
 0x1b3   : > { %8781 = shalt.err (!%p8778_p5)
}
 0x1b4   : > { %8111 = dma.hbm_to_vmem [thread:$0]  (!%p9874_p1), %s9884_s6, 64, %s9886_s27, %s9890_s13  }
 0x1b5   : > { %s9353_s15 = smov [#allocation13]   ;;  %s11087_s20 = sld [smem:[#allocation76_spill]] }
 0x1b6   : > { %s739_s28 = sshll.u32 %s9353_s15, 4  ;;  %p11088_p8 = scmp.ne.s32.totalorder %s11065_s11, 0  ;;  %s740_s28 = int_to_ptr.vmem [resolvable:$true] %s739_s28 }
 0x1bb   : > { %s8782_s19 = scalar_lea.hbm %s11087_s20, 1024 }
 0x1bc   : > { %p8783_p6 = scmp.ne.s32.totalorder %s11087_s20, %s8782_s19  ;;  %p8789_p10 = scmp.lt.u32.totalorder %s8782_s19, %s11087_s20 }
 0x1be   : > { %p8785_p2 = pnand %p8783_p6, %p11088_p8 }
 0x1c0   : > { %p8786_p4 = pneg %p8785_p2 }
 0x1c2   : > { %p8791_p13 = pnand %p8789_p10, %p8786_p4 }
 0x1c4   : > { %8794 = shalt.err (!%p8791_p13)
}
 0x1c5   : > { %s8795_s6 = scalar_lea.vmem %s740_s28, 1024  ;;  %p8803_p12 = scmp.lt.s32.totalorder %s740_s28, %s740_s28 }
 0x1c6   : > { %p8796_p7 = scmp.ne.s32.totalorder %s740_s28, %s8795_s6  ;;  %p8804_p0 = scmp.lt.s32.totalorder %s8795_s6, %s8795_s6 }
 0x1c8   : > { %p8798_p9 = pnand %p8796_p7, %p11088_p8  ;;  %p8805_p5 = por %p8804_p0, %p8803_p12 }
 0x1ca   : > { %p8799_p3 = pneg %p8798_p9 }
 0x1cc   : > { %p8806_p1 = pnand %p8805_p5, %p8799_p3 }
 0x1ce   : > { %8809 = shalt.err (!%p8806_p1)
}
 0x1cf   : > { %s11016_s21 = smov 128   ;;  %s11017_s16 = smov 8  }
 0x1d0   : > { %p11089_p6 = scmp.ne.s32.totalorder %s11063_s2, 0  ;;  %s9356_s15 = smov [#allocation16]  }
 0x1d1   : > { %s765_s18 = sshll.u32 %s9356_s15, 4  ;;  %s9357_s0 = smov [#allocation19]   ;;  %s766_s18 = int_to_ptr.vmem [resolvable:$true] %s765_s18 }
 0x1d2   : > { %8041 = dma.hbm_to_vmem [thread:$0]  (!%p11089_p6), %s11087_s20, 1024, %s740_s28, [#allocation12], %s11016_s21, %s11016_s21, %s11017_s16  }
 0x1d3   : > { %s791_s14 = sshll.u32 %s9357_s0, 4  ;;  %s11090_s23 = sld [smem:[#allocation78_spill]]  ;;  %s9941_s14 = int_to_ptr.vmem [resolvable:$true] %s791_s14 }
 0x1d9   : > { %s8810_s25 = scalar_lea.hbm %s11090_s23, 32 }
 0x1da   : > { %p8811_p1 = scmp.ne.s32.totalorder %s11090_s23, %s8810_s25  ;;  %p8817_p10 = scmp.lt.u32.totalorder %s8810_s25, %s11090_s23 }
 0x1dc   : > { %p8813_p2 = pnand %p8811_p1, %p11088_p8 }
 0x1de   : > { %p8814_p4 = pneg %p8813_p2 }
 0x1e0   : > { %p8819_p13 = pnand %p8817_p10, %p8814_p4 }
 0x1e2   : > { %8822 = shalt.err (!%p8819_p13)
}
 0x1e3   : > { %s8823_s27 = scalar_lea.vmem %s766_s18, 32  ;;  %p8831_p12 = scmp.lt.s32.totalorder %s766_s18, %s766_s18 }
 0x1e4   : > { %p8824_p7 = scmp.ne.s32.totalorder %s766_s18, %s8823_s27  ;;  %p8832_p0 = scmp.lt.s32.totalorder %s8823_s27, %s8823_s27 }
 0x1e6   : > { %p8826_p9 = pnand %p8824_p7, %p11088_p8  ;;  %p8833_p5 = por %p8832_p0, %p8831_p12 }
 0x1e8   : > { %p8827_p3 = pneg %p8826_p9 }
 0x1ea   : > { %p8834_p11 = pnand %p8833_p5, %p8827_p3 }
 0x1ec   : > { %8837 = shalt.err (!%p8834_p11)
}
 0x1ed   : > { %s11091_s26 = smov 1   ;;  %s11092_s29 = smov 16  }
 0x1ee   : > { %8047 = dma.hbm_to_vmem [thread:$0]  (!%p11089_p6), %s11090_s23, 32, %s766_s18, [#allocation15], %s11092_s29, %s11092_s29, %s11091_s26  }
 0x1ef   : > { %s11093_s6 = sld [smem:[#allocation80_spill]] }
 0x1f5   : > { %s8838_s19 = scalar_lea.hbm %s11093_s6, 2048 }
 0x1f6   : > { %p8839_p1 = scmp.ne.s32.totalorder %s11093_s6, %s8838_s19  ;;  %p8845_p4 = scmp.lt.u32.totalorder %s8838_s19, %s11093_s6 }
 0x1f8   : > { %p8841_p11 = pnand %p8839_p1, %p11088_p8 }
 0x1fa   : > { %p8842_p2 = pneg %p8841_p11 }
 0x1fc   : > { %p8847_p10 = pnand %p8845_p4, %p8842_p2 }
 0x1fe   : > { %8850 = shalt.err (!%p8847_p10)
}
 0x1ff   : > { %s8851_s18 = scalar_lea.vmem %s9941_s14, 2048  ;;  %p8859_p3 = scmp.lt.s32.totalorder %s9941_s14, %s9941_s14 }
 0x200   : > { %p8852_p13 = scmp.ne.s32.totalorder %s9941_s14, %s8851_s18  ;;  %p8860_p12 = scmp.lt.s32.totalorder %s8851_s18, %s8851_s18 }
 0x202   : > { %p8854_p7 = pnand %p8852_p13, %p11088_p8  ;;  %p8861_p0 = por %p8860_p12, %p8859_p3 }
 0x204   : > { %p8855_p9 = pneg %p8854_p7 }
 0x206   : > { %p8862_p5 = pnand %p8861_p0, %p8855_p9 }
 0x208   : > { %8865 = shalt.err (!%p8862_p5)
}
 0x209   : > { %s11094_s21 = smov 4   ;;  %s11095_s16 = smov 64  }
 0x20a   : > { %8053 = dma.hbm_to_vmem [thread:$0]  (!%p11089_p6), %s11093_s6, 2048, %s9941_s14, [#allocation18], %s11095_s16, %s11095_s16, %s11094_s21  }
 0x20b   : > { %s9358_s0 = smov [#allocation22]   ;;  %s9359_s19 = smov [#allocation25]  }
 0x20c   : > { %s817_s17 = sshll.u32 %s9358_s0, 4  ;;  %s843_s28 = sshll.u32 %s9359_s19, 4  ;;  %s818_s17 = int_to_ptr.vmem [resolvable:$true] %s817_s17  ;;  %s9990_s28 = int_to_ptr.vmem [resolvable:$true] %s843_s28 }
 0x20d   : > { %s11096_s20 = sld [smem:[#allocation82_spill]] }
 0x213   : > { %s8866_s23 = scalar_lea.hbm %s11096_s20, 2048 }
 0x214   : > { %p8867_p1 = scmp.ne.s32.totalorder %s11096_s20, %s8866_s23  ;;  %p8873_p4 = scmp.lt.u32.totalorder %s8866_s23, %s11096_s20 }
 0x216   : > { %p8869_p11 = pnand %p8867_p1, %p11088_p8 }
 0x218   : > { %p8870_p2 = pneg %p8869_p11 }
 0x21a   : > { %p8875_p10 = pnand %p8873_p4, %p8870_p2 }
 0x21c   : > { %8878 = shalt.err (!%p8875_p10)
}
 0x21d   : > { %s8879_s25 = scalar_lea.vmem %s818_s17, 2048  ;;  %p8887_p3 = scmp.lt.s32.totalorder %s818_s17, %s818_s17 }
 0x21e   : > { %p8880_p13 = scmp.ne.s32.totalorder %s818_s17, %s8879_s25  ;;  %p8888_p12 = scmp.lt.s32.totalorder %s8879_s25, %s8879_s25 }
 0x220   : > { %p8882_p7 = pnand %p8880_p13, %p11088_p8  ;;  %p8889_p0 = por %p8888_p12, %p8887_p3 }
 0x222   : > { %p8883_p9 = pneg %p8882_p7 }
 0x224   : > { %p8890_p5 = pnand %p8889_p0, %p8883_p9 }
 0x226   : > { %8893 = shalt.err (!%p8890_p5)
}
 0x227   : > { %8059 = dma.hbm_to_vmem [thread:$0]  (!%p11089_p6), %s11096_s20, 2048, %s818_s17, [#allocation21], %s11095_s16, %s11095_s16, %s11094_s21  }
 0x228   : > { %s11097_s19 = sld [smem:[#allocation84_spill]] }
 0x22e   : > { %s8894_s27 = scalar_lea.hbm %s11097_s19, 1024 }
 0x22f   : > { %p8895_p1 = scmp.ne.s32.totalorder %s11097_s19, %s8894_s27  ;;  %p8901_p4 = scmp.lt.u32.totalorder %s8894_s27, %s11097_s19 }
 0x231   : > { %p8897_p11 = pnand %p8895_p1, %p11088_p8 }
 0x233   : > { %p8898_p2 = pneg %p8897_p11 }
 0x235   : > { %p8903_p10 = pnand %p8901_p4, %p8898_p2 }
 0x237   : > { %8906 = shalt.err (!%p8903_p10)
}
 0x238   : > { %s8907_s17 = scalar_lea.vmem %s9990_s28, 1024  ;;  %p8915_p3 = scmp.lt.s32.totalorder %s9990_s28, %s9990_s28 }
 0x239   : > { %p8908_p13 = scmp.ne.s32.totalorder %s9990_s28, %s8907_s17  ;;  %p8916_p12 = scmp.lt.s32.totalorder %s8907_s17, %s8907_s17 }
 0x23b   : > { %p8910_p7 = pnand %p8908_p13, %p11088_p8  ;;  %p8917_p0 = por %p8916_p12, %p8915_p3 }
 0x23d   : > { %p8911_p9 = pneg %p8910_p7 }
 0x23f   : > { %p8918_p5 = pnand %p8917_p0, %p8911_p9 }
 0x241   : > { %8921 = shalt.err (!%p8918_p5)
}
 0x242   : > { %s11098_s9 = smov 8   ;;  %s11099_s23 = smov 128  }
 0x243   : > { %8065 = dma.hbm_to_vmem [thread:$0]  (!%p11089_p6), %s11097_s19, 1024, %s9990_s28, [#allocation24], %s11099_s23, %s11099_s23, %s11098_s9  }
 0x244   : > { %s9360_s27 = smov [#allocation28]   ;;  %s9361_s15 = smov [#allocation31]  }
 0x245   : > { %s869_s18 = sshll.u32 %s9360_s27, 4  ;;  %s895_s14 = sshll.u32 %s9361_s15, 4  ;;  %s870_s18 = int_to_ptr.vmem [resolvable:$true] %s869_s18  ;;  %s10039_s14 = int_to_ptr.vmem [resolvable:$true] %s895_s14 }
 0x246   : > { %s11100_s6 = sld [smem:[#allocation86_spill]] }
 0x24c   : > { %s8922_s20 = scalar_lea.hbm %s11100_s6, 32 }
 0x24d   : > { %p8923_p1 = scmp.ne.s32.totalorder %s11100_s6, %s8922_s20  ;;  %p8929_p4 = scmp.lt.u32.totalorder %s8922_s20, %s11100_s6 }
 0x24f   : > { %p8925_p11 = pnand %p8923_p1, %p11088_p8 }
 0x251   : > { %p8926_p2 = pneg %p8925_p11 }
 0x253   : > { %p8931_p10 = pnand %p8929_p4, %p8926_p2 }
 0x255   : > { %8934 = shalt.err (!%p8931_p10)
}
 0x256   : > { %s8935_s9 = scalar_lea.vmem %s870_s18, 32  ;;  %p8943_p3 = scmp.lt.s32.totalorder %s870_s18, %s870_s18 }
 0x257   : > { %p8936_p13 = scmp.ne.s32.totalorder %s870_s18, %s8935_s9  ;;  %p8944_p12 = scmp.lt.s32.totalorder %s8935_s9, %s8935_s9 }
 0x259   : > { %p8938_p7 = pnand %p8936_p13, %p11088_p8  ;;  %p8945_p0 = por %p8944_p12, %p8943_p3 }
 0x25b   : > { %p8939_p9 = pneg %p8938_p7 }
 0x25d   : > { %p8946_p5 = pnand %p8945_p0, %p8939_p9 }
 0x25f   : > { %8949 = shalt.err (!%p8946_p5)
}
 0x260   : > { %8071 = dma.hbm_to_vmem [thread:$0]  (!%p11089_p6), %s11100_s6, 32, %s870_s18, [#allocation27], %s11092_s29, %s11092_s29, %s11091_s26  }
 0x261   : > { %s11101_s0 = sld [smem:[#allocation88_spill]] }
 0x267   : > { %s8950_s27 = scalar_lea.hbm %s11101_s0, 2048 }
 0x268   : > { %p8951_p1 = scmp.ne.s32.totalorder %s11101_s0, %s8950_s27  ;;  %p8957_p4 = scmp.lt.u32.totalorder %s8950_s27, %s11101_s0 }
 0x26a   : > { %p8953_p11 = pnand %p8951_p1, %p11088_p8 }
 0x26c   : > { %p8954_p2 = pneg %p8953_p11 }
 0x26e   : > { %p8959_p10 = pnand %p8957_p4, %p8954_p2 }
 0x270   : > { %8962 = shalt.err (!%p8959_p10)
}
 0x271   : > { %s8963_s18 = scalar_lea.vmem %s10039_s14, 2048  ;;  %p8971_p3 = scmp.lt.s32.totalorder %s10039_s14, %s10039_s14 }
 0x272   : > { %p8964_p13 = scmp.ne.s32.totalorder %s10039_s14, %s8963_s18  ;;  %p8972_p12 = scmp.lt.s32.totalorder %s8963_s18, %s8963_s18 }
 0x274   : > { %p8966_p7 = pnand %p8964_p13, %p11088_p8  ;;  %p8973_p0 = por %p8972_p12, %p8971_p3 }
 0x276   : > { %p8967_p9 = pneg %p8966_p7 }
 0x278   : > { %p8974_p5 = pnand %p8973_p0, %p8967_p9 }
 0x27a   : > { %8977 = shalt.err (!%p8974_p5)
}
 0x27b   : > { %8077 = dma.hbm_to_vmem [thread:$0]  (!%p11089_p6), %s11101_s0, 2048, %s10039_s14, [#allocation30], %s11095_s16, %s11095_s16, %s11094_s21  }
 0x27c   : > { %s9362_s8 = smov [#allocation34]   ;;  %s9363_s20 = smov [#allocation37]  }
 0x27d   : > { %s921_s3 = sshll.u32 %s9362_s8, 4  ;;  %s947_s23 = sshll.u32 %s9363_s20, 4  ;;  %s922_s3 = int_to_ptr.vmem [resolvable:$true] %s921_s3  ;;  %s10088_s23 = int_to_ptr.vmem [resolvable:$true] %s947_s23 }
 0x27e   : > { %s11102_s25 = sld [smem:[#allocation90_spill]] }
 0x284   : > { %s8978_s17 = scalar_lea.hbm %s11102_s25, 2048 }
 0x285   : > { %p8979_p1 = scmp.ne.s32.totalorder %s11102_s25, %s8978_s17  ;;  %p8985_p4 = scmp.lt.u32.totalorder %s8978_s17, %s11102_s25 }
 0x287   : > { %p8981_p11 = pnand %p8979_p1, %p11088_p8 }
 0x289   : > { %p8982_p2 = pneg %p8981_p11 }
 0x28b   : > { %p8987_p10 = pnand %p8985_p4, %p8982_p2 }
 0x28d   : > { %8990 = shalt.err (!%p8987_p10)
}
 0x28e   : > { %s8991_s9 = scalar_lea.vmem %s922_s3, 2048  ;;  %p8999_p3 = scmp.lt.s32.totalorder %s922_s3, %s922_s3 }
 0x28f   : > { %p8992_p13 = scmp.ne.s32.totalorder %s922_s3, %s8991_s9  ;;  %p9000_p12 = scmp.lt.s32.totalorder %s8991_s9, %s8991_s9 }
 0x291   : > { %p8994_p7 = pnand %p8992_p13, %p11088_p8  ;;  %p9001_p0 = por %p9000_p12, %p8999_p3 }
 0x293   : > { %p8995_p9 = pneg %p8994_p7 }
 0x295   : > { %p9002_p5 = pnand %p9001_p0, %p8995_p9 }
 0x297   : > { %9005 = shalt.err (!%p9002_p5)
}
 0x298   : > { %8083 = dma.hbm_to_vmem [thread:$0]  (!%p11089_p6), %s11102_s25, 2048, %s922_s3, [#allocation33], %s11095_s16, %s11095_s16, %s11094_s21  }
 0x299   : > { %s11103_s17 = sld [smem:[#allocation92_spill]] }
 0x29f   : > { %s9006_s24 = scalar_lea.hbm %s11103_s17, 32 }
 0x2a0   : > { %p9007_p1 = scmp.ne.s32.totalorder %s11103_s17, %s9006_s24  ;;  %p9013_p4 = scmp.lt.u32.totalorder %s9006_s24, %s11103_s17 }
 0x2a2   : > { %p9009_p11 = pnand %p9007_p1, %p11088_p8 }
 0x2a4   : > { %p9010_p2 = pneg %p9009_p11 }
 0x2a6   : > { %p9015_p10 = pnand %p9013_p4, %p9010_p2 }
 0x2a8   : > { %9018 = shalt.err (!%p9015_p10)
}
 0x2a9   : > { %s9019_s3 = scalar_lea.vmem %s10088_s23, 32  ;;  %p9027_p3 = scmp.lt.s32.totalorder %s10088_s23, %s10088_s23 }
 0x2aa   : > { %p9020_p13 = scmp.ne.s32.totalorder %s10088_s23, %s9019_s3  ;;  %p9028_p12 = scmp.lt.s32.totalorder %s9019_s3, %s9019_s3 }
 0x2ac   : > { %p9022_p7 = pnand %p9020_p13, %p11088_p8  ;;  %p9029_p0 = por %p9028_p12, %p9027_p3 }
 0x2ae   : > { %p9023_p9 = pneg %p9022_p7 }
 0x2b0   : > { %p9030_p5 = pnand %p9029_p0, %p9023_p9 }
 0x2b2   : > { %9033 = shalt.err (!%p9030_p5)
}
 0x2b3   : > { %8089 = dma.hbm_to_vmem [thread:$0]  (!%p11089_p6), %s11103_s17, 32, %s10088_s23, [#allocation36], %s11092_s29, %s11092_s29, %s11091_s26  }
 0x2b4   : > { %s9364_s27 = smov [#allocation40]   ;;  %s9365_s24 = smov [#allocation43]  }
 0x2b5   : > { %s974_s15 = sshll.u32 %s9364_s27, 4  ;;  %s995_s18 = sshll.u32 %s9365_s24, 4  ;;  %s975_s15 = int_to_ptr.vmem [resolvable:$true] %s974_s15  ;;  %s10137_s18 = int_to_ptr.vmem [resolvable:$true] %s995_s18 }
 0x2b6   : > { %s11104_s9 = sld [smem:[#allocation94_spill]] }
 0x2bc   : > { %s11105_s3 = smov %s11104_s9  ;;  %s9034_s0 = scalar_lea.hbm %s11104_s9, 16 }
 0x2bd   : > { %p9035_p1 = scmp.ne.s32.totalorder %s11105_s3, %s9034_s0  ;;  %p9041_p4 = scmp.lt.u32.totalorder %s9034_s0, %s11105_s3 }
 0x2bf   : > { %p9037_p11 = pnand %p9035_p1, %p11088_p8 }
 0x2c1   : > { %p9038_p2 = pneg %p9037_p11 }
 0x2c3   : > { %p9043_p10 = pnand %p9041_p4, %p9038_p2 }
 0x2c5   : > { %9046 = shalt.err (!%p9043_p10)
}
 0x2c6   : > { %s9047_s29 = scalar_lea.vmem %s975_s15, 16  ;;  %s9054_s23 = scalar_lea.vmem %s975_s15, 32 }
 0x2c7   : > { %p9048_p13 = scmp.ne.s32.totalorder %s975_s15, %s9047_s29  ;;  %p9055_p3 = scmp.lt.s32.totalorder %s975_s15, %s975_s15 }
 0x2c8   : > { %p9056_p12 = scmp.lt.s32.totalorder %s9054_s23, %s9047_s29 }
 0x2c9   : > { %p9050_p7 = pnand %p9048_p13, %p11088_p8 }
 0x2ca   : > { %p9057_p0 = por %p9056_p12, %p9055_p3 }
 0x2cb   : > { %p9051_p9 = pneg %p9050_p7 }
 0x2cd   : > { %p9058_p5 = pnand %p9057_p0, %p9051_p9 }
 0x2cf   : > { %9061 = shalt.err (!%p9058_p5)
}
 0x2d0   : > { %8095 = dma.hbm_to_vmem [thread:$0]  (!%p11089_p6), %s11105_s3, 16, %s975_s15, [#allocation39]  }
 0x2d1   : > { %s11106_s27 = sld [smem:[#allocation96_spill]] }
 0x2d7   : > { %s9062_s24 = scalar_lea.hbm %s11106_s27, 1024 }
 0x2d8   : > { %p9063_p1 = scmp.ne.s32.totalorder %s11106_s27, %s9062_s24  ;;  %p9069_p4 = scmp.lt.u32.totalorder %s9062_s24, %s11106_s27 }
 0x2da   : > { %p9065_p11 = pnand %p9063_p1, %p11088_p8 }
 0x2dc   : > { %p9066_p2 = pneg %p9065_p11 }
 0x2de   : > { %p9071_p10 = pnand %p9069_p4, %p9066_p2 }
 0x2e0   : > { %9074 = shalt.err (!%p9071_p10)
}
 0x2e1   : > { %s9075_s15 = scalar_lea.vmem %s10137_s18, 1024  ;;  %p9083_p3 = scmp.lt.s32.totalorder %s10137_s18, %s10137_s18 }
 0x2e2   : > { %p9076_p13 = scmp.ne.s32.totalorder %s10137_s18, %s9075_s15  ;;  %p9084_p12 = scmp.lt.s32.totalorder %s9075_s15, %s9075_s15 }
 0x2e4   : > { %p9078_p7 = pnand %p9076_p13, %p11088_p8  ;;  %p9085_p0 = por %p9084_p12, %p9083_p3 }
 0x2e6   : > { %p9079_p9 = pneg %p9078_p7 }
 0x2e8   : > { %p9086_p5 = pnand %p9085_p0, %p9079_p9 }
 0x2ea   : > { %9089 = shalt.err (!%p9086_p5)
}
 0x2eb   : > { %8101 = dma.hbm_to_vmem [thread:$0]  (!%p11089_p6), %s11106_s27, 1024, %s10137_s18, [#allocation42], %s11095_s16, %s11095_s16, %s11094_s21  }
 0x2ec   : > { %s9366_s23 = smov [#allocation44]   ;;  %s10184_s19 = sshll.u32 %s9864_s1, 3 }
 0x2ed   : > { %s1009_s6 = sshll.u32 %s9366_s23, 4  ;;  %s11107_s24 = sld [smem:[#allocation97_spill]]  ;;  %s1010_s6 = int_to_ptr.vmem [resolvable:$true] %s1009_s6 }
 0x2f3   : > { %s9090_s28 = scalar_lea.hbm %s11107_s24, 16 }
 0x2f4   : > { %p9091_p1 = scmp.ne.s32.totalorder %s11107_s24, %s9090_s28  ;;  %p9097_p4 = scmp.lt.u32.totalorder %s9090_s28, %s11107_s24 }
 0x2f6   : > { %p9093_p11 = pnand %p9091_p1, %p11088_p8 }
 0x2f8   : > { %p9094_p2 = pneg %p9093_p11 }
 0x2fa   : > { %p9099_p10 = pnand %p9097_p4, %p9094_p2 }
 0x2fc   : > { %9102 = shalt.err (!%p9099_p10)
}
 0x2fd   : > { %s9103_s21 = scalar_lea.vmem %s1010_s6, 16  ;;  %s9110_s16 = scalar_lea.vmem %s1010_s6, 32 }
 0x2fe   : > { %p9104_p13 = scmp.ne.s32.totalorder %s1010_s6, %s9103_s21  ;;  %p9111_p3 = scmp.lt.s32.totalorder %s1010_s6, %s1010_s6 }
 0x2ff   : > { %p9112_p12 = scmp.lt.s32.totalorder %s9110_s16, %s9103_s21 }
 0x300   : > { %p9106_p7 = pnand %p9104_p13, %p11088_p8 }
 0x301   : > { %p9113_p0 = por %p9112_p12, %p9111_p3 }
 0x302   : > { %p9107_p9 = pneg %p9106_p7 }
 0x304   : > { %p9114_p5 = pnand %p9113_p0, %p9107_p9 }
 0x306   : > { %9117 = shalt.err (!%p9114_p5)
}
 0x307   : > { %8104 = dma.hbm_to_vmem [thread:$0]  (!%p11089_p6), %s11107_s24, 16, %s1010_s6, [#allocation45]  }
 0x308   : > { %s10205_s29 = sshll.u32 %s9334_s30, 7  ;;  %s1024_s11 = scalar_lea.vmem [#allocation2], %s10184_s19 }
 0x309   : > { %s1031_s23 = sshll.u32 %s1024_s11, 4  ;;  %s11108_s28 = sld [smem:[#allocation70_spill]]  ;;  %s1032_s23 = int_to_ptr.vmem [resolvable:$true] %s1031_s23 }
 0x30a   : > { %s1021_s2 = scalar_lea.sflag [#allocation3], %s9864_s1  ;;  %p11109_p1 = scmp.ne.s32.totalorder %s11086_s4, 0 }
 0x30f   : > { %s10212_s14 = scalar_lea.hbm %s11108_s28, %s10205_s29  ;;  %s9123_s15 = scalar_lea.hbm %s11108_s28, 256 }
 0x310   : > { %s9118_s9 = scalar_lea.hbm %s10212_s14, 128  ;;  %p9124_p2 = scmp.lt.u32.totalorder %s10212_s14, %s11108_s28 }
 0x311   : > { %p9119_p8 = scmp.ne.s32.totalorder %s10212_s14, %s9118_s9  ;;  %p9125_p4 = scmp.lt.u32.totalorder %s9123_s15, %s9118_s9 }
 0x312   : > { %p9127_p13 = scmp.lt.u32.totalorder %s9118_s9, %s10212_s14 }
 0x313   : > { %p9121_p6 = pnand %p9119_p8, %p11109_p1  ;;  %p9126_p10 = por %p9125_p4, %p9124_p2 }
 0x315   : > { %p9122_p11 = pneg %p9121_p6  ;;  %p9128_p7 = por %p9127_p13, %p9126_p10 }
 0x317   : > { %p9129_p9 = pnand %p9128_p7, %p9122_p11 }
 0x319   : > { %9132 = shalt.err (!%p9129_p9)
}
 0x31a   : > { %s9133_s1 = scalar_lea.vmem %s1032_s23, 128  ;;  %s9367_s18 = smov [#allocation2]  }
 0x31b   : > { %p9134_p3 = scmp.ne.s32.totalorder %s1032_s23, %s9133_s1  ;;  %s9138_s26 = sshll.u32 %s9367_s18, 4  ;;  %s9139_s26 = int_to_ptr.vmem [resolvable:$false] %s9138_s26 }
 0x31c   : > { %s9140_s11 = scalar_lea.vmem %s9139_s26, 256  ;;  %p9141_p5 = scmp.lt.s32.totalorder %s1032_s23, %s9139_s26 }
 0x31d   : > { %p9136_p12 = pnand %p9134_p3, %p11109_p1  ;;  %p9142_p8 = scmp.lt.s32.totalorder %s9140_s11, %s9133_s1 }
 0x31f   : > { %p9137_p0 = pneg %p9136_p12  ;;  %p9143_p6 = por %p9142_p8, %p9141_p5 }
 0x321   : > { %p9144_p2 = pnand %p9143_p6, %p9137_p0 }
 0x323   : > { %9147 = shalt.err (!%p9144_p2)
}
 0x324   : > { %p11110_p4 = scmp.ne.s32.totalorder %s11084_s7, 0  ;;  %s11111_s9 = sld [smem:[#allocation72_spill]] }
 0x325   : > { %s1060_s15 = scalar_lea.vmem [#allocation7], %s10184_s19  ;;  %s11113_s18 = sld [smem:[#allocation73_spill]] }
 0x326   : > { %8108 = dma.hbm_to_vmem [thread:$0]  (!%p11110_p4), %s10212_s14, 128, %s1032_s23, %s1021_s2  }
 0x327   : > { %s1067_s21 = sshll.u32 %s1060_s15, 4  ;;  %s1068_s21 = int_to_ptr.vmem [resolvable:$true] %s1067_s21 }
 0x32a   : > { %s11112_s6 = smov %s11111_s9  ;;  %s10236_s8 = scalar_lea.hbm %s11111_s9, %s10205_s29 }
 0x32b   : > { %s10243_s26 = scalar_lea.hbm %s11113_s18, %s10205_s29  ;;  %s9148_s11 = scalar_lea.hbm %s10236_s8, 128 }
 0x32c   : > { %p9149_p11 = scmp.ne.s32.totalorder %s10236_s8, %s9148_s11  ;;  %s9153_s2 = scalar_lea.hbm %s11112_s6, 256 }
 0x32d   : > { %p9154_p7 = scmp.lt.u32.totalorder %s10236_s8, %s11112_s6  ;;  %p9155_p9 = scmp.lt.u32.totalorder %s9153_s2, %s9148_s11 }
 0x32e   : > { %p9151_p10 = pnand %p9149_p11, %p11109_p1  ;;  %p9157_p12 = scmp.lt.u32.totalorder %s9148_s11, %s10236_s8 }
 0x32f   : > { %p9156_p3 = por %p9155_p9, %p9154_p7 }
 0x330   : > { %p9152_p13 = pneg %p9151_p10 }
 0x331   : > { %p9158_p0 = por %p9157_p12, %p9156_p3 }
 0x333   : > { %p9159_p5 = pnand %p9158_p0, %p9152_p13 }
 0x335   : > { %9162 = shalt.err (!%p9159_p5)
}
 0x336   : > { %s9163_s29 = scalar_lea.vmem %s1068_s21, 128  ;;  %s9368_s9 = smov [#allocation7]  }
 0x337   : > { %p9164_p8 = scmp.ne.s32.totalorder %s1068_s21, %s9163_s29  ;;  %s9168_s15 = sshll.u32 %s9368_s9, 4  ;;  %s9169_s15 = int_to_ptr.vmem [resolvable:$false] %s9168_s15 }
 0x338   : > { %s9170_s16 = scalar_lea.vmem %s9169_s15, 256  ;;  %p9171_p11 = scmp.lt.s32.totalorder %s1068_s21, %s9169_s15 }
 0x339   : > { %p9166_p6 = pnand %p9164_p8, %p11109_p1  ;;  %p9172_p10 = scmp.lt.s32.totalorder %s9170_s16, %s9163_s29 }
 0x33b   : > { %p9167_p2 = pneg %p9166_p6  ;;  %p9173_p4 = por %p9172_p10, %p9171_p11 }
 0x33d   : > { %p9174_p7 = pnand %p9173_p4, %p9167_p2 }
 0x33f   : > { %9177 = shalt.err (!%p9174_p7)
}
 0x340   : > { %p11114_p9 = scmp.ne.s32.totalorder %s11084_s7, 0  ;;  %s1078_s1 = scalar_lea.vmem [#allocation8], %s10184_s19 }
 0x341   : > { %s1085_s11 = sshll.u32 %s1078_s1, 4  ;;  %s11115_s23 = sand.u32 1, %s9334_s30   ;;  %s1086_s11 = int_to_ptr.vmem [resolvable:$true] %s1085_s11 }
 0x342   : > { %8114 = dma.hbm_to_vmem [thread:$0]  (!%p11114_p9), %s10236_s8, 128, %s1068_s21, %s9890_s13  }
 0x343   : > { %s1075_s14 = scalar_lea.sflag [#allocation9], %s11115_s23  ;;  %s9178_s2 = scalar_lea.hbm %s10243_s26, 128 }
 0x344   : > { %p9179_p4 = scmp.ne.s32.totalorder %s10243_s26, %s9178_s2  ;;  %s9183_s29 = scalar_lea.hbm %s11113_s18, 256 }
 0x345   : > { %p9184_p12 = scmp.lt.u32.totalorder %s10243_s26, %s11113_s18  ;;  %p9185_p0 = scmp.lt.u32.totalorder %s9183_s29, %s9178_s2 }
 0x346   : > { %p9181_p13 = pnand %p9179_p4, %p11109_p1  ;;  %p9187_p8 = scmp.lt.u32.totalorder %s9178_s2, %s10243_s26 }
 0x347   : > { %p9186_p5 = por %p9185_p0, %p9184_p12 }
 0x348   : > { %p9182_p3 = pneg %p9181_p13 }
 0x349   : > { %p9188_p6 = por %p9187_p8, %p9186_p5 }
 0x34b   : > { %p9189_p2 = pnand %p9188_p6, %p9182_p3 }
 0x34d   : > { %9192 = shalt.err (!%p9189_p2)
}
 0x34e   : > { %s9193_s13 = scalar_lea.vmem %s1086_s11, 128  ;;  %s9369_s19 = smov [#allocation8]  }
 0x34f   : > { %p9194_p11 = scmp.ne.s32.totalorder %s1086_s11, %s9193_s13  ;;  %s9198_s8 = sshll.u32 %s9369_s19, 4  ;;  %s9199_s8 = int_to_ptr.vmem [resolvable:$false] %s9198_s8 }
 0x350   : > { %s9200_s21 = scalar_lea.vmem %s9199_s8, 256  ;;  %p9201_p4 = scmp.lt.s32.totalorder %s1086_s11, %s9199_s8 }
 0x351   : > { %p9196_p10 = pnand %p9194_p11, %p11109_p1  ;;  %p9202_p13 = scmp.lt.s32.totalorder %s9200_s21, %s9193_s13 }
 0x353   : > { %p9197_p7 = pneg %p9196_p10  ;;  %p9203_p9 = por %p9202_p13, %p9201_p4 }
 0x355   : > { %p9204_p0 = pnand %p9203_p9, %p9197_p7 }
 0x357   : > { %9207 = shalt.err (!%p9204_p0)
}
 0x358   : > { %p11116_p12 = scmp.ne.s32.totalorder %s11084_s7, 0  ;;  %s11117_s16 = sld [smem:[#allocation66_spill]] }
 0x35a   : > { %8117 = dma.hbm_to_vmem [thread:$0]  (!%p11116_p12), %s10243_s26, 128, %s1086_s11, %s1075_s14  }
 0x35e   : > { %p11118_p3 = scmp.ne.s32.totalorder %s11117_s16, 0 }
 0x35f   : > { %s10286_s4 = sand.u32 (!%p11118_p3), 1, %s9326_s5   ;;  %p11119_p1 = scmp.ne.s32.totalorder (!%p11118_p3), %s11080_s12, 0 }
 0x360   : > { %1094 = sbr.rel (%p11118_p3) target bundleno = 15285 (0x3bb5), region = 132  ;;  %s10289_s1 = sshll.u32 (!%p11118_p3), %s10286_s4, 3 }
 0x361   : > { %s1097_s23 = scalar_lea.sflag (!%p11118_p3), [#allocation3], %s10286_s4  ;;  %s1100_s2 = scalar_lea.vmem (!%p11118_p3), [#allocation2], %s10289_s1 }
 0x367   : > { %9253 = dma.done.wait (%p11119_p1), %s1097_s23, 128  }
 0x368   : > { %9255 = vsyncadd (%p11119_p1), %s1097_s23, 4294967168  ;;  %s1105_s7 = sand.u32 1, %s9550_s10   ;;  %s7057_s26 = sshll.u32 %s10286_s4, 2 }
 0x369   : > { %s1106_s11 = scalar_lea.sflag [#allocation6], %s1105_s7  ;;  %s10299_s14 = scalar_lea.vmem [#allocation5], %s7057_s26 }
 0x36a   : > { %9257 = dma.done.wait (%p11119_p1), %s1106_s11, 192  }
 0x36b   : > { %9259 = vsyncadd (%p11119_p1), %s1106_s11, 4294967104  ;;  %s1118_s0 = scalar_lea.vmem [#allocation7], %s10289_s1  ;;  %s1124_s20 = scalar_lea.sflag [#allocation9], %s1105_s7 }
 0x36c   : > { %s1127_s29 = scalar_lea.vmem [#allocation8], %s10289_s1 }
 0x36d   : > { %9261 = dma.done.wait (%p11119_p1), %s1124_s20, 128  }
 0x36e   : > { %9263 = vsyncadd (%p11119_p1), %s1124_s20, 4294967168  ;;  %p11120_p9 = scmp.eq.s32.totalorder %s9550_s10, 0 }
 0x370   : > { %9265 = dma.done.wait (%p11120_p9), [#allocation9], 2048   ;;  %p11121_p5 = pmov %p11120_p9 }
 0x372   : > { %9267 = vsyncadd (%p11121_p5), [#allocation9], 4294965248  ;;  %p11122_p8 = pmov %p11121_p5 }
 0x373   : > { %p11123_p6 = pmov %p11121_p5 }
 0x374   : > { %9269 = dma.done.wait (%p11122_p8), [#allocation12], 1056  }
 0x375   : > { %9271 = vsyncadd (%p11123_p6), [#allocation12], 4294966240  ;;  %p11124_p2 = pmov %p11121_p5 }
 0x377   : > { %9273 = dma.done.wait (%p11124_p2), [#allocation15], 64   ;;  %p11125_p11 = pmov %p11124_p2 }
 0x378   : > { %p11126_p10 = pmov %p11124_p2 }
 0x379   : > { %9275 = vsyncadd (%p11125_p11), [#allocation15], 4294967232 }
 0x37a   : > { %9277 = dma.done.wait (%p11126_p10), [#allocation18], 2080   ;;  %p11127_p7 = pmov %p11124_p2 }
 0x37b   : > { %p11128_p4 = pmov %p11124_p2 }
 0x37c   : > { %9279 = vsyncadd (%p11127_p7), [#allocation18], 4294965216 }
 0x37d   : > { %9281 = dma.done.wait (%p11128_p4), [#allocation21], 2080   ;;  %p11129_p13 = pmov %p11124_p2 }
 0x37e   : > { %p11130_p0 = pmov %p11124_p2 }
 0x37f   : > { %9283 = vsyncadd (%p11129_p13), [#allocation21], 4294965216 }
 0x380   : > { %9285 = dma.done.wait (%p11130_p0), [#allocation24], 1056   ;;  %p11131_p12 = pmov %p11130_p0 }
 0x381   : > { %p11132_p3 = pmov %p11130_p0 }
 0x382   : > { %9287 = vsyncadd (%p11131_p12), [#allocation24], 4294966240 }
 0x383   : > { %9289 = dma.done.wait (%p11132_p3), [#allocation27], 64   ;;  %p11133_p1 = pmov %p11130_p0 }
 0x384   : > { %p11134_p9 = pmov %p11130_p0 }
 0x385   : > { %9291 = vsyncadd (%p11133_p1), [#allocation27], 4294967232 }
 0x386   : > { %9293 = dma.done.wait (%p11134_p9), [#allocation30], 2080   ;;  %p11135_p5 = pmov %p11130_p0 }
 0x387   : > { %p11136_p8 = pmov %p11130_p0 }
 0x388   : > { %9295 = vsyncadd (%p11135_p5), [#allocation30], 4294965216 }
 0x389   : > { %9297 = dma.done.wait (%p11136_p8), [#allocation33], 2080   ;;  %p11137_p6 = pmov %p11130_p0 }
 0x38a   : > { %p11138_p2 = pmov %p11130_p0 }
 0x38b   : > { %9299 = vsyncadd (%p11137_p6), [#allocation33], 4294965216 }
 0x38c   : > { %9301 = dma.done.wait (%p11138_p2), [#allocation36], 64   ;;  %p11139_p11 = pmov %p11130_p0 }
 0x38d   : > { %p11140_p10 = pmov %p11130_p0 }
 0x38e   : > { %9303 = vsyncadd (%p11139_p11), [#allocation36], 4294967232 }
 0x38f   : > { %9305 = dma.done.wait (%p11140_p10), [#allocation39], 48   ;;  %p11141_p7 = pmov %p11130_p0 }
 0x390   : > { %p11142_p4 = pmov %p11130_p0 }
 0x391   : > { %9307 = vsyncadd (%p11141_p7), [#allocation39], 4294967248 }
 0x392   : > { %9309 = dma.done.wait (%p11142_p4), [#allocation42], 1040   ;;  %p11143_p13 = pmov %p11130_p0 }
 0x394   : > { %9311 = vsyncadd (%p11143_p13), [#allocation42], 4294966256 }
 0x395   : > { %9313 = dma.done.wait (%p11130_p0), [#allocation45], 16   ;;  %p11144_p12 = pmov %p11130_p0 }
 0x396   : > { %v9370_v0 = vmov 0.0   ;;  %vm9371_vm0 = vmmov 0   ;;  %v8247_v1 = vld [vmem:[#allocation10] sm:$0xff]   ;;  %v8248_v2 = vld [vmem:[#allocation10 + $0x8] sm:$0xff]   ;;  %v8249_v3 = vld [vmem:[#allocation10 + $0x10] sm:$0xff]   ;;  %s9372_s12 = smov 64  }
 0x397   : > { %9315 = vsyncadd (%p11144_p12), [#allocation45], 4294967280  ;;  %7466 = vmatprep.subr.bf16.mxu0 %v9370_v0  ;;  %7482 = vmatprep.mubr.msk.bf16.mxu0 %vm9371_vm0, %v9370_v0  ;;  %v8250_v4 = vld [vmem:[#allocation10 + $0x18] sm:$0xff]   ;;  %v8251_v5 = vld [vmem:[#allocation10 + $0x20] sm:$0xff]   ;;  %s9373_s9 = smov 96   ;;  %s9374_s15 = smov 88  }
 0x398   : > { %7501 = vmatprep.subr.mxu1 %v9370_v0  ;;  %7503 = vmatprep.mubr.msk.f32.mxu1 %vm9371_vm0, %v9370_v0  ;;  %v8252_v6 = vld [vmem:[#allocation10 + $0x28] sm:$0xff]   ;;  %v8253_v7 = vld [vmem:[#allocation10 + $0x30] sm:$0xff]   ;;  %v8254_v8 = vld [vmem:[#allocation10 + $0x38] sm:$0xff]   ;;  %vm1440_vm1 = vcmask 64512   ;;  %s9375_s13 = smov 120   ;;  %s9376_s19 = smov 72  }
 0x399   : > { %7467 = vmatpush3.bf16.msra.mxu0 %v8247_v1  ;;  %v10377_v9 = vld [vmem:[%s1100_s2] sm:$0xff]  ;;  %v7086_v11 = vld [vmem:[#allocation11] ss:$0 sm:$0xff]  ;;  %s9377_s8 = smov 56   ;;  %s9378_s21 = smov 80  }
 0x39a   : > { %7468 = vmatprep.subr.bf16.mxu0 %v9370_v0  ;;  %v1321_v10 = vpack.c.bf16 %v10377_v9, %v10377_v9  ;;  %v10402_v19 = vld [vmem:[%s1118_s0] sm:$0xff]  ;;  %s9379_s16 = smov 112   ;;  %s9380_s23 = smov 104  }
 0x39b   : > { %v1434_v52 = vld [vmem:[#allocation13 + $0x8] sm:$0xff]  ;;  %v1433_v54 = vld [vmem:[#allocation13] sm:$0xff]  ;;  %s9381_s2 = smov 48   ;;  %s9382_s7 = smov 40  }
 0x39c   : > { %s7268_s26 = sshll.u32 %s9550_s10, 7  ;;  %s1310_s11 = scalar_lea.vmem [#allocation46], %s10289_s1 }
 0x39d   : > { %7469 = vmatpush3.bf16.msra.mxu0 %v8248_v2  ;;  %p11146_p1 = scmp.ne.s32.totalorder %s11081_s22, 0  ;;  %s9383_s1 = smov [#allocation46]  }
 0x39e   : > { %7470 = vmatprep.subr.bf16.mxu0 %v9370_v0 }
 0x3a1   : > { %7471 = vmatpush3.bf16.msra.mxu0 %v8249_v3 }
 0x3a2   : > { %7472 = vmatprep.subr.bf16.mxu0 %v9370_v0 }
 0x3a5   : > { %7473 = vmatpush3.bf16.msra.mxu0 %v8250_v4 }
 0x3a6   : > { %7474 = vmatprep.subr.bf16.mxu0 %v9370_v0 }
 0x3a9   : > { %7475 = vmatpush3.bf16.msra.mxu0 %v8251_v5 }
 0x3aa   : > { %7476 = vmatprep.subr.bf16.mxu0 %v9370_v0 }
 0x3ad   : > { %7477 = vmatpush3.bf16.msra.mxu0 %v8252_v6 }
 0x3ae   : > { %7478 = vmatprep.subr.bf16.mxu0 %v9370_v0 }
 0x3b1   : > { %7479 = vmatpush3.bf16.msra.mxu0 %v8253_v7 }
 0x3b2   : > { %7480 = vmatprep.subr.bf16.mxu0 %v9370_v0 }
 0x3b5   : > { %7481 = vmatpush3.bf16.msra.mxu0 %v8254_v8 }
 0x3b6   : > { %7486 = vmatprep.subr.mxu0 %v9370_v0 }
 0x3b8   : > { %7483 = vmatmul.mubr.bf16.vlgmr.msra.gmra.mrb[0].mxu0 %v1321_v10 }
 0x3b9   : > { %7488 = vmatprep.mubr.msk.f32.mxu0 %vm9371_vm0, %v9370_v0 }
 0x48b   : > { %v1427_v12 = vpop.f32.mrb[0].mxu0 }
 0x48c   : > { %v10385_v13 = vadd.f32 %v7086_v11, %v1427_v12  ;;  %v7484_v14 = vpop.f32.mrb[1].mxu0 }
 0x48d   : > { %v1430_v15 = vpop.f32.mrb[2].mxu0 }
 0x48e   : > { %1526 = vrot.lane.b32.xlu1 %v10385_v13, %s9372_s12  ;;  %1438 = vrot.lane.b32.xlu0 %v10385_v13, %s9373_s9  ;;  %v7485_v16 = vpop.f32.mrb[3].mxu0 }
 0x492   : > { %1604 = vrot.lane.b32.xlu1 %v10385_v13, %s9374_s15 }
 0x500   : > { %v1439_v17 = vpop.permute.xlu0 %1438  ;;  %v1527_v18 = vpop.permute.xlu1 %1526 }
 0x501   : > { %7487 = vmatpush3.xpose.msk.msra.mxu0 %vm1440_vm1, %v1439_v17 }
 0x502   : > { %7491 = vmatprep.subr.mxu0 %v9370_v0 }
 0x504   : > { %7489 = vmatmul.mubr.msk.f32.vlgmr.msra.gmra.mrb[4].mxu0 %vm1440_vm1, %v10385_v13  ;;  %v1605_v29 = vpop.permute.xlu1 %1604 }
 0x505   : > { %7492 = vmatpush3.msra.mxu0 %v1527_v18  ;;  %7493 = vmatprep.mubr.msk.f32.mxu0 %vm9371_vm0, %v9370_v0 }
 0x506   : > { %7496 = vmatprep.subr.mxu0 %v9370_v0 }
 0x5d7   : > { %v1511_v20 = vpop.f32.mrb[4].mxu0 }
 0x5d8   : > { %v1512_v21 = vadd.f32 %v1511_v20, %v10402_v19  ;;  %v7490_v22 = vpop.f32.mrb[5].mxu0 }
 0x5d9   : > { %v1435_v22 = vld [vmem:[#allocation13 + $0x10] sm:$0xff] }
 0x5da   : > { %v1515_v23 = vsel %vm1440_vm1, %v1512_v21, -inf }
 0x5db   : > { %1516 = vmax.xlane.f32.xlu0 %v1515_v23 }
 0x668   : > { %v1517_v24 = vpop.xlane.xlu0 %1516 }
 0x669   : > { %v1518_v25 = vsub.f32 %v1512_v21, %v1517_v24 }
 0x66b   : > { %v1519_v26 = vmul.f32 1.442695, %v1518_v25 }
 0x66d   : > { %8335 = vpow2.f32 %v1519_v26 }
 0x677   : > { %v8336_v27 = vpop.eup %8335 }
 0x678   : > { %v1521_v28 = vsel %vm1440_vm1, %v8336_v27, 0.0 }
 0x679   : > { %1522 = vadd.xlane.f32.xlu1 %v1521_v28 }
 0x68a   : > { %1602 = vrot.lane.b32.xlu1 %v10385_v13, %s9375_s13 }
 0x706   : > { %v1523_v30 = vpop.xlane.xlu1 %1522 }
 0x707   : > { %8337 = vrcp.f32 %v1523_v30 }
 0x70a   : > { %v1603_v33 = vpop.permute.xlu1 %1602 }
 0x711   : > { %v8338_v31 = vpop.eup %8337 }
 0x712   : > { %v1525_v32 = vmul.f32 %v8338_v31, %v8336_v27 }
 0x714   : > { %7494 = vmatmul.mubr.msk.f32.vlgmr.msra.gmra.mrb[6].mxu0 %vm1440_vm1, %v1525_v32 }
 0x715   : > { %7497 = vmatpush3.xpose.msk.msra.mxu0 %vm1440_vm1, %v1605_v29  ;;  %7498 = vmatprep.mubr.msk.f32.mxu0 %vm9371_vm0, %v9370_v0  ;;  %v1436_v29 = vld [vmem:[#allocation13 + $0x18] sm:$0xff] }
 0x716   : > { %7531 = vmatprep.subr.mxu0 %v9370_v0 }
 0x718   : > { %7499 = vmatmul.mubr.msk.f32.vlgmr.msra.gmra.mrb[8].mxu0 %vm1440_vm1, %v1603_v33 }
 0x719   : > { %7533 = vmatprep.mubr.msk.f32.mxu0 %vm9371_vm0, %v9370_v0 }
 0x7e7   : > { %v1598_v34 = vpop.f32.mrb[6].mxu0 }
 0x7e8   : > { %v7495_v35 = vpop.f32.mrb[7].mxu0 }
 0x7e9   : > { %v1312_v35 = vlaneseq }
 0x7eb   : > { %v1676_v36 = vpop.f32.mrb[8].mxu0 }
 0x7ec   : > { %v1677_v37 = vadd.f32 %v1676_v36, %v10402_v19  ;;  %v7500_v38 = vpop.f32.mrb[9].mxu0  ;;  %v1313_v36 = vand.u32 127, %v1312_v35 }
 0x7ed   : > { %v7111_v38 = vld [vmem:[#allocation14] ss:$0 sm:$0xff] }
 0x7ee   : > { %v1680_v39 = vsel %vm1440_vm1, %v1677_v37, -inf  ;;  %vm1314_vm2 = vcmp.lt.s32.totalorder %v1313_v36, 32 }
 0x7ef   : > { %1681 = vmax.xlane.f32.xlu1 %v1680_v39 }
 0x800   : > { %2154 = vrot.lane.b32.xlu1 %v10385_v13, %s9376_s19 }
 0x87c   : > { %v1682_v40 = vpop.xlane.xlu1 %1681 }
 0x87d   : > { %v1683_v41 = vsub.f32 %v1677_v37, %v1682_v40 }
 0x87f   : > { %v1684_v42 = vmul.f32 1.442695, %v1683_v41 }
 0x880   : > { %v2155_v43 = vpop.permute.xlu1 %2154 }
 0x881   : > { %8339 = vpow2.f32 %v1684_v42  ;;  %7532 = vmatpush3.xpose.msk.msra.mxu0 %vm1440_vm1, %v2155_v43  ;;  %v10479_v42 = vsel %vm1314_vm2, 1.0, %v9370_v0 }
 0x882   : > { %7541 = vmatprep.subr.mxu0 %v9370_v0 }
 0x88b   : > { %v8340_v44 = vpop.eup %8339 }
 0x88c   : > { %v1686_v45 = vsel %vm1440_vm1, %v8340_v44, 0.0 }
 0x88d   : > { %1687 = vadd.xlane.f32.xlu0 %v1686_v45  ;;  %v8255_v45 = vld [vmem:[#allocation22] sm:$0xff]  }
 0x8a3   : > { %1691 = vrot.lane.b32.xlu0 %v10385_v13, %s9377_s8 }
 0x8a7   : > { %1915 = vrot.lane.b32.xlu0 %v10385_v13, %s9378_s21 }
 0x8ab   : > { %1913 = vrot.lane.b32.xlu0 %v10385_v13, %s9379_s16 }
 0x8af   : > { %2152 = vrot.lane.b32.xlu0 %v10385_v13, %s9380_s23 }
 0x91a   : > { %v1688_v46 = vpop.xlane.xlu0 %1687 }
 0x91b   : > { %8341 = vrcp.f32 %v1688_v46  ;;  %v8257_v46 = vld [vmem:[#allocation19] sm:$0xff]  }
 0x91e   : > { %v1692_v47 = vpop.permute.xlu0 %1691 }
 0x91f   : > { %7502 = vmatpush3.msra.mxu1 %v1692_v47  ;;  %v8256_v47 = vld [vmem:[#allocation22 + $0x8] sm:$0xff]  }
 0x920   : > { %7506 = vmatprep.subr.mxu1 %v9370_v0 }
 0x922   : > { %v1916_v48 = vpop.permute.xlu0 %1915 }
 0x925   : > { %v8342_v49 = vpop.eup %8341 }
 0x926   : > { %v1914_v50 = vpop.permute.xlu0 %1913  ;;  %v1690_v51 = vmul.f32 %v8342_v49, %v8340_v44  ;;  %v8258_v49 = vld [vmem:[#allocation22 + $0x10] sm:$0xff]  }
 0x928   : > { %7504 = vmatmul.mubr.msk.f32.vlgmr.msra.gmra.mrb[0].mxu1 %vm1440_vm1, %v1690_v51 }
 0x929   : > { %7507 = vmatpush3.msra.mxu1 %v1434_v52  ;;  %7508 = vmatprep.mubr.msk.f32.mxu1 %vm9371_vm0, %v9370_v0 }
 0x92a   : > { %v2153_v53 = vpop.permute.xlu0 %2152  ;;  %7511 = vmatprep.subr.mxu1 %v9370_v0 }
 0x92b   : > { %7534 = vmatmul.mubr.msk.f32.vlgmr.msra.gmra.mrb[10].mxu0 %vm1440_vm1, %v2153_v53 }
 0x92c   : > { %7543 = vmatprep.mubr.msk.f32.mxu0 %vm9371_vm0, %v9370_v0  ;;  %7542 = vmatpush3.msra.mxu0 %v1436_v29 }
 0x92d   : > { %7566 = vmatprep.subr.bf16.mxu0 %v9370_v0 }
 0x9fb   : > { %v1763_v55 = vpop.f32.mrb[0].mxu1 }
 0x9fc   : > { %v7505_v56 = vpop.f32.mrb[1].mxu1  ;;  %7509 = vmatmul.mubr.msk.f32.vlgmr.msra.gmra.mrb[2].mxu1 %vm1440_vm1, %v1763_v55  ;;  %v8261_v55 = vld [vmem:[#allocation19 + $0x10] sm:$0xff]  }
 0x9fd   : > { %7512 = vmatpush3.msra.mxu1 %v1433_v54  ;;  %7513 = vmatprep.mubr.msk.f32.mxu1 %vm9371_vm0, %v9370_v0  ;;  %v8262_v56 = vld [vmem:[#allocation22 + $0x20] sm:$0xff]  }
 0x9fe   : > { %v2226_v57 = vpop.f32.mrb[10].mxu0  ;;  %7516 = vmatprep.subr.mxu1 %v9370_v0 }
 0x9ff   : > { %v7535_v58 = vpop.f32.mrb[11].mxu0  ;;  %v2227_v11 = vadd.f32 %v2226_v57, %v10402_v19  ;;  %v8263_v57 = vld [vmem:[#allocation19 + $0x18] sm:$0xff]  }
 0xa00   : > { %7514 = vmatmul.mubr.msk.f32.vlgmr.msra.gmra.mrb[4].mxu1 %vm1440_vm1, %v1598_v34  ;;  %v8264_v58 = vld [vmem:[#allocation22 + $0x28] sm:$0xff]  }
 0xa01   : > { %7518 = vmatprep.mubr.msk.f32.mxu1 %vm9371_vm0, %v9370_v0  ;;  %v2230_v14 = vsel %vm1440_vm1, %v2227_v11, -inf }
 0xa04   : > { %7517 = vmatpush3.xpose.msk.msra.mxu1 %vm1440_vm1, %v1916_v48  ;;  %v8259_v48 = vld [vmem:[#allocation19 + $0x8] sm:$0xff]  }
 0xa05   : > { %7521 = vmatprep.subr.mxu1 %v9370_v0 }
 0xa07   : > { %7519 = vmatmul.mubr.msk.f32.vlgmr.msra.gmra.mrb[6].mxu1 %vm1440_vm1, %v1914_v50 }
 0xa08   : > { %7523 = vmatprep.mubr.msk.f32.mxu1 %vm9371_vm0, %v9370_v0 }
 0xacf   : > { %v1836_v59 = vpop.f32.mrb[2].mxu1 }
 0xad0   : > { %v7510_v60 = vpop.f32.mrb[3].mxu1 }
 0xad1   : > { %v8266_v60 = vld [vmem:[#allocation22 + $0x30] sm:$0xff]  }
 0xad3   : > { %v1909_v61 = vpop.f32.mrb[4].mxu1 }
 0xad4   : > { %v1910_v62 = vadd.f32 %v1909_v61, %v1836_v59  ;;  %v7515_v63 = vpop.f32.mrb[5].mxu1  ;;  %v8265_v59 = vld [vmem:[#allocation19 + $0x20] sm:$0xff]   ;;  %v8267_v61 = vld [vmem:[#allocation19 + $0x28] sm:$0xff]  }
 0xad5   : > { %v8269_v63 = vld [vmem:[#allocation19 + $0x30] sm:$0xff]  }
 0xada   : > { %v1987_v1 = vpop.f32.mrb[6].mxu1 }
 0xadb   : > { %v1988_v2 = vadd.f32 %v1987_v1, %v10402_v19  ;;  %v7520_v3 = vpop.f32.mrb[7].mxu1  ;;  %v1318_v1 = vld [vmem:[%s10299_s14] sm:$0xf] }
 0xadd   : > { %v1991_v4 = vsel %vm1440_vm1, %v1988_v2, -inf }
 0xade   : > { %1992 = vmax.xlane.f32.xlu0 %v1991_v4 }
 0xaf4   : > { %2002 = vrot.lane.b32.xlu0 %v10385_v13, %s9381_s2 }
 0xaf8   : > { %2241 = vrot.lane.b32.xlu0 %v10385_v13, %s9382_s7 }
 0xb6b   : > { %v1993_v5 = vpop.xlane.xlu0 %1992 }
 0xb6c   : > { %v1994_v6 = vsub.f32 %v1988_v2, %v1993_v5  ;;  %v8270_v2 = vld [vmem:[#allocation19 + $0x38] sm:$0xff]  }
 0xb6e   : > { %v1995_v7 = vmul.f32 1.442695, %v1994_v6 }
 0xb6f   : > { %v2003_v8 = vpop.permute.xlu0 %2002 }
 0xb70   : > { %8343 = vpow2.f32 %v1995_v7  ;;  %7522 = vmatpush3.msra.mxu1 %v2003_v8  ;;  %v7112_v7 = vld [vmem:[#allocation16] ss:$0 sm:$0xff] }
 0xb71   : > { %7526 = vmatprep.subr.mxu1 %v9370_v0 }
 0xb73   : > { %v2242_v26 = vpop.permute.xlu0 %2241 }
 0xb7a   : > { %v8344_v10 = vpop.eup %8343 }
 0xb7b   : > { %v1997_v12 = vsel %vm1440_vm1, %v8344_v10, 0.0 }
 0xb7c   : > { %1998 = vadd.xlane.f32.xlu1 %v1997_v12 }
 0xb80   : > { %2231 = vmax.xlane.f32.xlu1 %v2230_v14 }
 0xc09   : > { %v1999_v15 = vpop.xlane.xlu1 %1998 }
 0xc0a   : > { %8345 = vrcp.f32 %v1999_v15  ;;  %v7123_v15 = vld [vmem:[#allocation23] ss:$0 sm:$0xff] }
 0xc0d   : > { %v2232_v13 = vpop.xlane.xlu1 %2231 }
 0xc0e   : > { %v2233_v16 = vsub.f32 %v2227_v11, %v2232_v13 }
 0xc10   : > { %v2234_v17 = vmul.f32 1.442695, %v2233_v16 }
 0xc12   : > { %8347 = vpow2.f32 %v2234_v17 }
 0xc14   : > { %v8346_v18 = vpop.eup %8345 }
 0xc15   : > { %v2001_v20 = vmul.f32 %v8346_v18, %v8344_v10  ;;  %v7113_v10 = vld [vmem:[#allocation17] ss:$0 sm:$0xff] }
 0xc17   : > { %7524 = vmatmul.mubr.msk.f32.vlgmr.msra.gmra.mrb[8].mxu1 %vm1440_vm1, %v2001_v20 }
 0xc18   : > { %7528 = vmatprep.mubr.msk.f32.mxu1 %vm9371_vm0, %v9370_v0  ;;  %7527 = vmatpush3.msra.mxu1 %v1435_v22 }
 0xc19   : > { %7536 = vmatprep.subr.mxu1 %v9370_v0 }
 0xc1c   : > { %v8348_v19 = vpop.eup %8347 }
 0xc1d   : > { %v2236_v21 = vsel %vm1440_vm1, %v8348_v19, 0.0 }
 0xc1e   : > { %2237 = vadd.xlane.f32.xlu1 %v2236_v21 }
 0xcab   : > { %v2238_v23 = vpop.xlane.xlu1 %2237 }
 0xcac   : > { %8349 = vrcp.f32 %v2238_v23 }
 0xcb6   : > { %v8350_v24 = vpop.eup %8349 }
 0xcb7   : > { %v2240_v28 = vmul.f32 %v8350_v24, %v8348_v19  ;;  %v7114_v19 = vld [vmem:[#allocation20] ss:$0 sm:$0xff] }
 0xcea   : > { %v2074_v25 = vpop.f32.mrb[8].mxu1 }
 0xceb   : > { %v7525_v27 = vpop.f32.mrb[9].mxu1  ;;  %7529 = vmatmul.mubr.msk.f32.vlgmr.msra.gmra.mrb[10].mxu1 %vm1440_vm1, %v2074_v25 }
 0xcec   : > { %7537 = vmatpush3.msra.mxu1 %v2242_v26  ;;  %7538 = vmatprep.mubr.msk.f32.mxu1 %vm9371_vm0, %v9370_v0 }
 0xced   : > { %7546 = vmatprep.subr.bf16.mxu1 %v9370_v0 }
 0xcef   : > { %7539 = vmatmul.mubr.msk.f32.vlgmr.msra.gmra.mrb[12].mxu1 %vm1440_vm1, %v2240_v28  ;;  %v10531_v28 = vld [vmem:[%s1127_s29] sm:$0xff] }
 0xcf0   : > { %7562 = vmatprep.mubr.msk.bf16.mxu1 %vm9371_vm0, %v9370_v0  ;;  %7547 = vmatpush3.bf16.msra.mxu1 %v8257_v46 }
 0xcf1   : > { %7548 = vmatprep.subr.bf16.mxu1 %v9370_v0 }
 0xcf4   : > { %7549 = vmatpush3.bf16.msra.mxu1 %v8259_v48 }
 0xcf5   : > { %7550 = vmatprep.subr.bf16.mxu1 %v9370_v0 }
 0xcf8   : > { %7551 = vmatpush3.bf16.msra.mxu1 %v8261_v55  ;;  %v2652_v55 = vld [vmem:[#allocation25] sm:$0xff] }
 0xcf9   : > { %7552 = vmatprep.subr.bf16.mxu1 %v9370_v0 }
 0xcfc   : > { %7553 = vmatpush3.bf16.msra.mxu1 %v8263_v57 }
 0xcfd   : > { %7554 = vmatprep.subr.bf16.mxu1 %v9370_v0 }
 0xd00   : > { %7555 = vmatpush3.bf16.msra.mxu1 %v8265_v59 }
 0xd01   : > { %7556 = vmatprep.subr.bf16.mxu1 %v9370_v0 }
 0xd04   : > { %7557 = vmatpush3.bf16.msra.mxu1 %v8267_v61 }
 0xd05   : > { %7558 = vmatprep.subr.bf16.mxu1 %v9370_v0 }
 0xd08   : > { %7559 = vmatpush3.bf16.msra.mxu1 %v8269_v63 }
 0xd09   : > { %7560 = vmatprep.subr.bf16.mxu1 %v9370_v0 }
 0xd0c   : > { %7561 = vmatpush3.bf16.msra.mxu1 %v8270_v2 }
 0xd0d   : > { %7586 = vmatprep.subr.mxu1 %v9370_v0 }
 0xdbe   : > { %v2147_v30 = vpop.f32.mrb[10].mxu1 }
 0xdbf   : > { %v2151_v31 = vadd.f32 %v2147_v30, %v1910_v62  ;;  %v7530_v32 = vpop.f32.mrb[11].mxu1  ;;  %v8268_v62 = vld [vmem:[#allocation22 + $0x38] sm:$0xff]  }
 0xdc2   : > { %v2313_v33 = vpop.f32.mrb[12].mxu1 }
 0xdc3   : > { %v7540_v34 = vpop.f32.mrb[13].mxu1  ;;  %7544 = vmatmul.mubr.msk.f32.vlgmr.msra.gmra.mrb[12].mxu0 %vm1440_vm1, %v2313_v33 }
 0xdc4   : > { %7582 = vmatprep.mubr.msk.bf16.mxu0 %vm9371_vm0, %v9370_v0  ;;  %7567 = vmatpush3.bf16.msra.mxu0 %v8255_v45 }
 0xdc5   : > { %7568 = vmatprep.subr.bf16.mxu0 %v9370_v0 }
 0xdc8   : > { %7569 = vmatpush3.bf16.msra.mxu0 %v8256_v47 }
 0xdc9   : > { %7570 = vmatprep.subr.bf16.mxu0 %v9370_v0 }
 0xdcc   : > { %7571 = vmatpush3.bf16.msra.mxu0 %v8258_v49 }
 0xdcd   : > { %7572 = vmatprep.subr.bf16.mxu0 %v9370_v0 }
 0xe96   : > { %v2386_v37 = vpop.f32.mrb[12].mxu0 }
 0xe97   : > { %v2390_v39 = vadd.f32 %v2386_v37, %v2151_v31  ;;  %v7545_v40 = vpop.f32.mrb[13].mxu0 }
 0xe99   : > { %v2398_v41 = vadd.f32 %v7111_v38, %v2390_v39 }
 0xe9b   : > { %v2399_v43 = vadd.f32 %v2398_v41, %v10377_v9  ;;  %v8260_v9 = vld [vmem:[#allocation22 + $0x18] sm:$0xff]  }
 0xe9c   : > { %7573 = vmatpush3.bf16.msra.mxu0 %v8260_v9 }
 0xe9d   : > { %v2402_v44 = vmul.f32 %v10479_v42, %v2399_v43  ;;  %7574 = vmatprep.subr.bf16.mxu0 %v9370_v0 }
 0xe9f   : > { %2403 = vadd.xlane.f32.xlu1 %v2402_v44 }
 0xea0   : > { %7575 = vmatpush3.bf16.msra.mxu0 %v8262_v56  ;;  %v2653_v56 = vld [vmem:[#allocation25 + $0x8] sm:$0xff] }
 0xea1   : > { %7576 = vmatprep.subr.bf16.mxu0 %v9370_v0 }
 0xea4   : > { %7577 = vmatpush3.bf16.msra.mxu0 %v8264_v58 }
 0xea5   : > { %7578 = vmatprep.subr.bf16.mxu0 %v9370_v0 }
 0xea8   : > { %7579 = vmatpush3.bf16.msra.mxu0 %v8266_v60 }
 0xea9   : > { %7580 = vmatprep.subr.bf16.mxu0 %v9370_v0 }
 0xeac   : > { %7581 = vmatpush3.bf16.msra.mxu0 %v8268_v62 }
 0xead   : > { %7591 = vmatprep.subr.mxu0 %v9370_v0 }
 0xeaf   : > { %7583 = vmatmul.mubr.bf16.vlgmr.msra.gmra.mrb[16].mxu0 %v1318_v1 }
 0xeb0   : > { %7593 = vmatprep.mubr.msk.f32.mxu0 %vm9371_vm0, %v9370_v0 }
 0xf2c   : > { %v2404_v50 = vpop.xlane.xlu1 %2403 }
 0xf2d   : > { %v2405_v51 = vmul.f32 0.03125, %v2404_v50 }
 0xf2f   : > { %v2406_v52 = vsub.f32 %v2402_v44, %v2405_v51 }
 0xf31   : > { %v2407_v53 = vmul.f32 %v10479_v42, %v2406_v52 }
 0xf33   : > { %v2408_v54 = vmul.f32 %v2407_v53, %v2407_v53 }
 0xf35   : > { %2409 = vadd.xlane.f32.xlu0 %v2408_v54 }
 0xf82   : > { %v2646_v13 = vpop.f32.mrb[16].mxu0 }
 0xf83   : > { %v10509_v16 = vadd.f32 %v7123_v15, %v2646_v13  ;;  %v7584_v17 = vpop.f32.mrb[17].mxu0 }
 0xf84   : > { %v2649_v18 = vpop.f32.mrb[18].mxu0 }
 0xf85   : > { %v7585_v20 = vpop.f32.mrb[19].mxu0  ;;  %2821 = vrot.lane.b32.xlu1 %v10509_v16, %s9375_s13 }
 0xfc2   : > { %v2410_v3 = vpop.xlane.xlu0 %2409 }
 0xfc3   : > { %v2411_v4 = vmul.f32 0.03125, %v2410_v3 }
 0xfc5   : > { %v2412_v5 = vadd.f32 1e-05, %v2411_v4 }
 0xfc7   : > { %8351 = vrsqrt.f32 %v2412_v5 }
 0xfd1   : > { %v8352_v6 = vpop.eup %8351 }
 0xfd2   : > { %v2414_v8 = vmul.f32 %v8352_v6, %v2407_v53 }
 0xfd4   : > { %v2421_v11 = vmul.f32 %v7112_v7, %v2414_v8 }
 0xfd6   : > { %v10503_v12 = vadd.f32 %v7113_v10, %v2421_v11 }
 0xfd8   : > { %v2429_v14 = vpack.c.bf16 %v10503_v12, %v10503_v12 }
 0xfda   : > { %7563 = vmatmul.mubr.bf16.vlgmr.msra.gmra.mrb[16].mxu1 %v2429_v14 }
 0xfdb   : > { %7588 = vmatprep.mubr.msk.f32.mxu1 %vm9371_vm0, %v9370_v0  ;;  %7587 = vmatpush3.xpose.msk.msra.mxu1 %vm1440_vm1, %v10509_v16 }
 0xfdc   : > { %7596 = vmatprep.subr.mxu1 %v9370_v0 }
 0xff7   : > { %v2822_v24 = vpop.permute.xlu1 %2821 }
0x10ad   : > { %v2535_v21 = vpop.f32.mrb[16].mxu1 }
0x10ae   : > { %v10516_v22 = vadd.f32 %v7114_v19, %v2535_v21  ;;  %v7564_v23 = vpop.f32.mrb[17].mxu1 }
0x10af   : > { %v2538_v25 = vpop.f32.mrb[18].mxu1  ;;  %v2654_v23 = vld [vmem:[#allocation25 + $0x10] sm:$0xff] }
0x10b0   : > { %v7565_v26 = vpop.f32.mrb[19].mxu1  ;;  %2819 = vrot.lane.b32.xlu1 %v10516_v22, %s9375_s13  ;;  %7589 = vmatmul.mubr.msk.f32.vlgmr.msra.gmra.mrb[14].mxu1 %vm1440_vm1, %v10516_v22 }
0x10b1   : > { %7597 = vmatpush3.xpose.msk.msra.mxu1 %vm1440_vm1, %v2822_v24  ;;  %7598 = vmatprep.mubr.msk.f32.mxu1 %vm9371_vm0, %v9370_v0 }
0x10b2   : > { %7606 = vmatprep.subr.mxu1 %v9370_v0 }
0x1122   : > { %v2820_v27 = vpop.permute.xlu1 %2819 }
0x1123   : > { %7599 = vmatmul.mubr.msk.f32.vlgmr.msra.gmra.mrb[20].mxu1 %vm1440_vm1, %v2820_v27 }
0x1124   : > { %7608 = vmatprep.mubr.msk.f32.mxu1 %vm9371_vm0, %v9370_v0  ;;  %7607 = vmatpush3.msra.mxu1 %v2653_v56 }
0x1125   : > { %7616 = vmatprep.subr.mxu1 %v9370_v0 }
0x1183   : > { %v2728_v29 = vpop.f32.mrb[14].mxu1 }
0x1184   : > { %v2729_v30 = vadd.f32 %v2728_v29, %v10531_v28  ;;  %v7590_v31 = vpop.f32.mrb[15].mxu1 }
0x1186   : > { %v2732_v32 = vsel %vm1440_vm1, %v2729_v30, -inf }
0x1187   : > { %2733 = vmax.xlane.f32.xlu1 %v2732_v32 }
0x1198   : > { %2908 = vrot.lane.b32.xlu1 %v10509_v16, %s9374_s15 }
0x11f6   : > { %v2893_v33 = vpop.f32.mrb[20].mxu1 }
0x11f7   : > { %v2894_v34 = vadd.f32 %v2893_v33, %v10531_v28  ;;  %v7600_v35 = vpop.f32.mrb[21].mxu1 }
0x11f9   : > { %v2897_v36 = vsel %vm1440_vm1, %v2894_v34, -inf }
0x11fa   : > { %2898 = vmax.xlane.f32.xlu0 %v2897_v36 }
0x1214   : > { %v2734_v37 = vpop.xlane.xlu1 %2733 }
0x1215   : > { %v2735_v38 = vsub.f32 %v2729_v30, %v2734_v37 }
0x1217   : > { %v2736_v39 = vmul.f32 1.442695, %v2735_v38 }
0x1218   : > { %v2909_v52 = vpop.permute.xlu1 %2908 }
0x1219   : > { %8353 = vpow2.f32 %v2736_v39 }
0x1223   : > { %v8354_v40 = vpop.eup %8353 }
0x1224   : > { %v2738_v41 = vsel %vm1440_vm1, %v8354_v40, 0.0 }
0x1225   : > { %2739 = vadd.xlane.f32.xlu0 %v2738_v41 }
0x1287   : > { %v2899_v43 = vpop.xlane.xlu0 %2898 }
0x1288   : > { %v2900_v44 = vsub.f32 %v2894_v34, %v2899_v43  ;;  %v2655_v43 = vld [vmem:[#allocation25 + $0x18] sm:$0xff] }
0x128a   : > { %v2901_v45 = vmul.f32 1.442695, %v2900_v44 }
0x128c   : > { %8355 = vpow2.f32 %v2901_v45 }
0x1296   : > { %v8356_v46 = vpop.eup %8355 }
0x1297   : > { %v2903_v47 = vsel %vm1440_vm1, %v8356_v46, 0.0 }
0x1298   : > { %2904 = vadd.xlane.f32.xlu0 %v2903_v47 }
0x12ae   : > { %2743 = vrot.lane.b32.xlu0 %v10509_v16, %s9373_s9 }
0x12b2   : > { %3132 = vrot.lane.b32.xlu0 %v10509_v16, %s9379_s16  ;;  %v2740_v48 = vpop.xlane.xlu0 %2739 }
0x12b3   : > { %8357 = vrcp.f32 %v2740_v48 }
0x12b6   : > { %3130 = vrot.lane.b32.xlu0 %v10516_v22, %s9379_s16 }
0x12bd   : > { %v8358_v9 = vpop.eup %8357 }
0x12be   : > { %v2742_v50 = vmul.f32 %v8358_v9, %v8354_v40 }
0x1325   : > { %v2905_v49 = vpop.xlane.xlu0 %2904 }
0x1326   : > { %8359 = vrcp.f32 %v2905_v49 }
0x1329   : > { %v2744_v51 = vpop.permute.xlu0 %2743 }
0x132a   : > { %7592 = vmatpush3.msra.mxu0 %v2744_v51  ;;  %v8271_v51 = vld [vmem:[#allocation31] sm:$0xff]  }
0x132b   : > { %7594 = vmatmul.mubr.msk.f32.vlgmr.msra.gmra.mrb[14].mxu0 %vm1440_vm1, %v2742_v50  ;;  %7601 = vmatprep.subr.mxu0 %v9370_v0 }
0x132c   : > { %7602 = vmatpush3.msra.mxu0 %v2909_v52  ;;  %7603 = vmatprep.mubr.msk.f32.mxu0 %vm9371_vm0, %v9370_v0  ;;  %v8272_v52 = vld [vmem:[#allocation31 + $0x8] sm:$0xff]  }
0x132d   : > { %7611 = vmatprep.subr.mxu0 %v9370_v0  ;;  %v3133_v59 = vpop.permute.xlu0 %3132 }
0x1330   : > { %v8360_v53 = vpop.eup %8359 }
0x1331   : > { %v2907_v54 = vmul.f32 %v8360_v53, %v8356_v46  ;;  %v3131_v62 = vpop.permute.xlu0 %3130  ;;  %v7148_v46 = vld [vmem:[#allocation26] ss:$0 sm:$0xff] }
0x1333   : > { %7604 = vmatmul.mubr.msk.f32.vlgmr.msra.gmra.mrb[20].mxu0 %vm1440_vm1, %v2907_v54 }
0x1334   : > { %7613 = vmatprep.mubr.msk.f32.mxu0 %vm9371_vm0, %v9370_v0  ;;  %7612 = vmatpush3.msra.mxu0 %v2652_v55 }
0x1335   : > { %7621 = vmatprep.subr.mxu0 %v9370_v0 }
0x13fe   : > { %v2815_v57 = vpop.f32.mrb[14].mxu0 }
0x13ff   : > { %v7595_v58 = vpop.f32.mrb[15].mxu0  ;;  %7614 = vmatmul.mubr.msk.f32.vlgmr.msra.gmra.mrb[22].mxu0 %vm1440_vm1, %v2815_v57 }
0x1400   : > { %7623 = vmatprep.mubr.msk.f32.mxu0 %vm9371_vm0, %v9370_v0  ;;  %v8273_v58 = vld [vmem:[#allocation31 + $0x10] sm:$0xff]  }
0x1406   : > { %v2980_v60 = vpop.f32.mrb[20].mxu0 }
0x1407   : > { %v7605_v61 = vpop.f32.mrb[21].mxu0  ;;  %7609 = vmatmul.mubr.msk.f32.vlgmr.msra.gmra.mrb[22].mxu1 %vm1440_vm1, %v2980_v60  ;;  %v8276_v60 = vld [vmem:[#allocation31 + $0x28] sm:$0xff]  }
0x1408   : > { %7617 = vmatpush3.xpose.msk.msra.mxu1 %vm1440_vm1, %v3133_v59  ;;  %7618 = vmatprep.mubr.msk.f32.mxu1 %vm9371_vm0, %v9370_v0  ;;  %v8275_v59 = vld [vmem:[#allocation31 + $0x20] sm:$0xff]   ;;  %v8277_v61 = vld [vmem:[#allocation31 + $0x30] sm:$0xff]  }
0x1409   : > { %7626 = vmatprep.subr.mxu1 %v9370_v0 }
0x140b   : > { %7619 = vmatmul.mubr.msk.f32.vlgmr.msra.gmra.mrb[24].mxu1 %vm1440_vm1, %v3131_v62  ;;  %v8278_v62 = vld [vmem:[#allocation31 + $0x38] sm:$0xff]  }
0x140c   : > { %7628 = vmatprep.mubr.msk.f32.mxu1 %vm9371_vm0, %v9370_v0  ;;  %7627 = vmatpush3.msra.mxu1 %v2654_v23 }
0x140d   : > { %7636 = vmatprep.subr.mxu1 %v9370_v0 }
0x14d2   : > { %v3126_v63 = vpop.f32.mrb[22].mxu0 }
0x14d3   : > { %v7615_v1 = vpop.f32.mrb[23].mxu0 }
0x14d4   : > { %v8280_v1 = vld [vmem:[#allocation34 + $0x8] sm:$0xff]  }
0x14da   : > { %v3053_v2 = vpop.f32.mrb[22].mxu1 }
0x14db   : > { %v3127_v3 = vadd.f32 %v3126_v63, %v3053_v2  ;;  %v7610_v4 = vpop.f32.mrb[23].mxu1  ;;  %v8279_v63 = vld [vmem:[#allocation34] sm:$0xff]   ;;  %v8281_v2 = vld [vmem:[#allocation34 + $0x10] sm:$0xff]  }
0x14dc   : > { %v8283_v4 = vld [vmem:[#allocation34 + $0x20] sm:$0xff]  }
0x14de   : > { %v3204_v5 = vpop.f32.mrb[24].mxu1 }
0x14df   : > { %v3205_v6 = vadd.f32 %v3204_v5, %v10531_v28  ;;  %v7620_v7 = vpop.f32.mrb[25].mxu1  ;;  %v8284_v5 = vld [vmem:[#allocation34 + $0x28] sm:$0xff]  }
0x14e1   : > { %v3208_v8 = vsel %vm1440_vm1, %v3205_v6, -inf }
0x14e2   : > { %3209 = vmax.xlane.f32.xlu0 %v3208_v8 }
0x14f8   : > { %3219 = vrot.lane.b32.xlu0 %v10509_v16, %s9378_s21 }
0x14fc   : > { %3369 = vrot.lane.b32.xlu0 %v10516_v22, %s9380_s23 }
0x156f   : > { %v3210_v10 = vpop.xlane.xlu0 %3209 }
0x1570   : > { %v3211_v11 = vsub.f32 %v3205_v6, %v3210_v10 }
0x1572   : > { %v3212_v14 = vmul.f32 1.442695, %v3211_v11  ;;  %v7149_v11 = vld [vmem:[#allocation28] ss:$0 sm:$0xff] }
0x1573   : > { %v3220_v15 = vpop.permute.xlu0 %3219 }
0x1574   : > { %8361 = vpow2.f32 %v3212_v14  ;;  %7622 = vmatpush3.msra.mxu0 %v3220_v15  ;;  %v7150_v15 = vld [vmem:[#allocation29] ss:$0 sm:$0xff] }
0x1575   : > { %7631 = vmatprep.subr.mxu0 %v9370_v0 }
0x1577   : > { %v3370_v22 = vpop.permute.xlu0 %3369 }
0x157e   : > { %v8362_v13 = vpop.eup %8361 }
0x157f   : > { %v3214_v17 = vsel %vm1440_vm1, %v8362_v13, 0.0 }
0x1580   : > { %3215 = vadd.xlane.f32.xlu1 %v3214_v17 }
0x1591   : > { %3371 = vrot.lane.b32.xlu1 %v10509_v16, %s9380_s23 }
0x160d   : > { %v3216_v18 = vpop.xlane.xlu1 %3215 }
0x160e   : > { %8363 = vrcp.f32 %v3216_v18 }
0x1611   : > { %v3372_v21 = vpop.permute.xlu1 %3371 }
0x1618   : > { %v8364_v20 = vpop.eup %8363 }
0x1619   : > { %v3218_v19 = vmul.f32 %v8364_v20, %v8362_v13  ;;  %v8285_v20 = vld [vmem:[#allocation34 + $0x30] sm:$0xff]  }
0x161b   : > { %7624 = vmatmul.mubr.msk.f32.vlgmr.msra.gmra.mrb[24].mxu0 %vm1440_vm1, %v3218_v19  ;;  %v8286_v19 = vld [vmem:[#allocation34 + $0x38] sm:$0xff]  }
0x161c   : > { %7632 = vmatpush3.xpose.msk.msra.mxu0 %vm1440_vm1, %v3372_v21  ;;  %7633 = vmatprep.mubr.msk.f32.mxu0 %vm9371_vm0, %v9370_v0  ;;  %v7151_v21 = vld [vmem:[#allocation32] ss:$0 sm:$0xff] }
0x161d   : > { %7641 = vmatprep.subr.mxu0 %v9370_v0 }
0x161f   : > { %7634 = vmatmul.mubr.msk.f32.vlgmr.msra.gmra.mrb[26].mxu0 %vm1440_vm1, %v3370_v22 }
0x1620   : > { %7643 = vmatprep.mubr.msk.f32.mxu0 %vm9371_vm0, %v9370_v0  ;;  %7642 = vmatpush3.msra.mxu0 %v2655_v43 }
0x1621   : > { %7666 = vmatprep.subr.bf16.mxu0 %v9370_v0 }
0x16ee   : > { %v3291_v24 = vpop.f32.mrb[24].mxu0 }
0x16ef   : > { %v7625_v25 = vpop.f32.mrb[25].mxu0  ;;  %7629 = vmatmul.mubr.msk.f32.vlgmr.msra.gmra.mrb[26].mxu1 %vm1440_vm1, %v3291_v24 }
0x16f0   : > { %7638 = vmatprep.mubr.msk.f32.mxu1 %vm9371_vm0, %v9370_v0 }
0x16f2   : > { %v3443_v26 = vpop.f32.mrb[26].mxu0 }
0x16f3   : > { %v3444_v27 = vadd.f32 %v3443_v26, %v10531_v28  ;;  %v7635_v29 = vpop.f32.mrb[27].mxu0 }
0x16f5   : > { %v3447_v30 = vsel %vm1440_vm1, %v3444_v27, -inf }
0x16f6   : > { %3448 = vmax.xlane.f32.xlu1 %v3447_v30  ;;  %v7160_v30 = vld [vmem:[#allocation35] ss:$0 sm:$0xff] }
0x1783   : > { %v3449_v31 = vpop.xlane.xlu1 %3448 }
0x1784   : > { %v3450_v32 = vsub.f32 %v3444_v27, %v3449_v31 }
0x1786   : > { %v3451_v33 = vmul.f32 1.442695, %v3450_v32 }
0x1788   : > { %8365 = vpow2.f32 %v3451_v33 }
0x1792   : > { %v8366_v34 = vpop.eup %8365 }
0x1793   : > { %v3453_v35 = vsel %vm1440_vm1, %v8366_v34, 0.0 }
0x1794   : > { %3454 = vadd.xlane.f32.xlu0 %v3453_v35 }
0x17aa   : > { %3458 = vrot.lane.b32.xlu0 %v10509_v16, %s9376_s19 }
0x17c2   : > { %v3364_v36 = vpop.f32.mrb[26].mxu1 }
0x17c3   : > { %v3368_v37 = vadd.f32 %v3364_v36, %v3127_v3  ;;  %v7630_v38 = vpop.f32.mrb[27].mxu1  ;;  %v8282_v3 = vld [vmem:[#allocation34 + $0x18] sm:$0xff]  }
0x17c4   : > { %v8287_v38 = vld [vmem:[#allocation10 + $0x40] sm:$0xff]  }
0x1821   : > { %v3455_v39 = vpop.xlane.xlu0 %3454 }
0x1822   : > { %8367 = vrcp.f32 %v3455_v39  ;;  %v8288_v39 = vld [vmem:[#allocation10 + $0x48] sm:$0xff]  }
0x1825   : > { %v3459_v28 = vpop.permute.xlu0 %3458 }
0x1826   : > { %7637 = vmatpush3.msra.mxu1 %v3459_v28 }
0x1827   : > { %7646 = vmatprep.subr.bf16.mxu1 %v9370_v0 }
0x182c   : > { %v8368_v40 = vpop.eup %8367 }
0x182d   : > { %v3457_v41 = vmul.f32 %v8368_v40, %v8366_v34 }
0x182f   : > { %7639 = vmatmul.mubr.msk.f32.vlgmr.msra.gmra.mrb[28].mxu1 %vm1440_vm1, %v3457_v41 }
0x1830   : > { %7662 = vmatprep.mubr.msk.bf16.mxu1 %vm9371_vm0, %v9370_v0  ;;  %7647 = vmatpush3.bf16.msra.mxu1 %v8271_v51 }
0x1831   : > { %7648 = vmatprep.subr.bf16.mxu1 %v9370_v0 }
0x1834   : > { %7649 = vmatpush3.bf16.msra.mxu1 %v8272_v52 }
0x1835   : > { %7650 = vmatprep.subr.bf16.mxu1 %v9370_v0 }
0x1838   : > { %7651 = vmatpush3.bf16.msra.mxu1 %v8273_v58 }
0x1839   : > { %7652 = vmatprep.subr.bf16.mxu1 %v9370_v0 }
0x1902   : > { %v3530_v16 = vpop.f32.mrb[28].mxu1 }
0x1903   : > { %v7640_v44 = vpop.f32.mrb[29].mxu1  ;;  %7644 = vmatmul.mubr.msk.f32.vlgmr.msra.gmra.mrb[28].mxu0 %vm1440_vm1, %v3530_v16 }
0x1904   : > { %7682 = vmatprep.mubr.msk.bf16.mxu0 %vm9371_vm0, %v9370_v0  ;;  %7667 = vmatpush3.bf16.msra.mxu0 %v8279_v63  ;;  %v8289_v44 = vld [vmem:[#allocation10 + $0x50] sm:$0xff]  }
0x1905   : > { %7668 = vmatprep.subr.bf16.mxu0 %v9370_v0 }
0x1908   : > { %7669 = vmatpush3.bf16.msra.mxu0 %v8280_v1 }
0x1909   : > { %7670 = vmatprep.subr.bf16.mxu0 %v9370_v0 }
0x190c   : > { %7671 = vmatpush3.bf16.msra.mxu0 %v8281_v2 }
0x190d   : > { %7672 = vmatprep.subr.bf16.mxu0 %v9370_v0 }
0x1910   : > { %7673 = vmatpush3.bf16.msra.mxu0 %v8282_v3  ;;  %v10654_v3 = vld [vmem:[%s1118_s0] sm:$0xff] }
0x1911   : > { %7674 = vmatprep.subr.bf16.mxu0 %v9370_v0 }
0x1914   : > { %7675 = vmatpush3.bf16.msra.mxu0 %v8283_v4 }
0x1915   : > { %7676 = vmatprep.subr.bf16.mxu0 %v9370_v0 }
0x1918   : > { %7677 = vmatpush3.bf16.msra.mxu0 %v8284_v5 }
0x1919   : > { %7678 = vmatprep.subr.bf16.mxu0 %v9370_v0 }
0x191c   : > { %7679 = vmatpush3.bf16.msra.mxu0 %v8285_v20 }
0x191d   : > { %7680 = vmatprep.subr.bf16.mxu0 %v9370_v0 }
0x1920   : > { %7681 = vmatpush3.bf16.msra.mxu0 %v8286_v19 }
0x1921   : > { %7706 = vmatprep.subr.mxu0 %v9370_v0 }
0x19d6   : > { %v3603_v45 = vpop.f32.mrb[28].mxu0 }
0x19d7   : > { %v3607_v47 = vadd.f32 %v3603_v45, %v3368_v37  ;;  %v7645_v48 = vpop.f32.mrb[29].mxu0  ;;  %v8290_v45 = vld [vmem:[#allocation10 + $0x58] sm:$0xff]  }
0x19d8   : > { %v8293_v48 = vld [vmem:[#allocation10 + $0x70] sm:$0xff]  }
0x19d9   : > { %v3615_v49 = vadd.f32 %v7148_v46, %v3607_v47  ;;  %v8291_v46 = vld [vmem:[#allocation10 + $0x60] sm:$0xff]   ;;  %v8292_v47 = vld [vmem:[#allocation10 + $0x68] sm:$0xff]  }
0x19db   : > { %v3616_v9 = vadd.f32 %v3615_v49, %v10503_v12  ;;  %v8274_v12 = vld [vmem:[#allocation31 + $0x18] sm:$0xff]   ;;  %v8294_v49 = vld [vmem:[#allocation10 + $0x78] sm:$0xff]  }
0x19dc   : > { %7653 = vmatpush3.bf16.msra.mxu1 %v8274_v12  ;;  %v7171_v12 = vld [vmem:[#allocation11 + $0x1] ss:$0 sm:$0xff] }
0x19dd   : > { %v3619_v50 = vmul.f32 %v10479_v42, %v3616_v9  ;;  %7654 = vmatprep.subr.bf16.mxu1 %v9370_v0 }
0x19df   : > { %3620 = vadd.xlane.f32.xlu1 %v3619_v50 }
0x19e0   : > { %7655 = vmatpush3.bf16.msra.mxu1 %v8275_v59 }
0x19e1   : > { %7656 = vmatprep.subr.bf16.mxu1 %v9370_v0 }
0x19e4   : > { %7657 = vmatpush3.bf16.msra.mxu1 %v8276_v60 }
0x19e5   : > { %7658 = vmatprep.subr.bf16.mxu1 %v9370_v0 }
0x19e8   : > { %7659 = vmatpush3.bf16.msra.mxu1 %v8277_v61 }
0x19e9   : > { %7660 = vmatprep.subr.bf16.mxu1 %v9370_v0 }
0x19ec   : > { %7661 = vmatpush3.bf16.msra.mxu1 %v8278_v62 }
0x19ed   : > { %7686 = vmatprep.subr.bf16.mxu1 %v9370_v0 }
0x1a6c   : > { %v3621_v53 = vpop.xlane.xlu1 %3620 }
0x1a6d   : > { %v3622_v54 = vmul.f32 0.03125, %v3621_v53  ;;  %v7169_v53 = vld [vmem:[#allocation37] ss:$0 sm:$0xff] }
0x1a6f   : > { %v3623_v55 = vsub.f32 %v3619_v50, %v3622_v54 }
0x1a71   : > { %v3624_v56 = vmul.f32 %v10479_v42, %v3623_v55  ;;  %v7170_v55 = vld [vmem:[#allocation38] ss:$0 sm:$0xff] }
0x1a73   : > { %v3625_v57 = vmul.f32 %v3624_v56, %v3624_v56 }
0x1a75   : > { %3626 = vadd.xlane.f32.xlu1 %v3625_v57 }
0x1b02   : > { %v3627_v6 = vpop.xlane.xlu1 %3626 }
0x1b03   : > { %v3628_v7 = vmul.f32 0.03125, %v3627_v6 }
0x1b05   : > { %v3629_v8 = vadd.f32 1e-05, %v3628_v7 }
0x1b07   : > { %8369 = vrsqrt.f32 %v3629_v8 }
0x1b11   : > { %v8370_v10 = vpop.eup %8369 }
0x1b12   : > { %v3631_v14 = vmul.f32 %v8370_v10, %v3624_v56 }
0x1b14   : > { %v3638_v13 = vmul.f32 %v7149_v11, %v3631_v14 }
0x1b16   : > { %v3645_v17 = vadd.f32 %v7150_v15, %v3638_v13 }
0x1b18   : > { %v3646_v18 = vpack.c.bf16 %v3645_v17, %v3645_v17 }
0x1b1a   : > { %7663 = vmatmul.mubr.bf16.vlgmr.msra.gmra.mrb[32].mxu1 %v3646_v18 }
0x1b1b   : > { %7702 = vmatprep.mubr.msk.bf16.mxu1 %vm9371_vm0, %v9370_v0  ;;  %7687 = vmatpush3.bf16.msra.mxu1 %v8287_v38  ;;  %v4016_v38 = vld [vmem:[#allocation13 + $0x20] sm:$0xff] }
0x1b1c   : > { %7688 = vmatprep.subr.bf16.mxu1 %v9370_v0 }
0x1b1f   : > { %7689 = vmatpush3.bf16.msra.mxu1 %v8288_v39 }
0x1b20   : > { %7690 = vmatprep.subr.bf16.mxu1 %v9370_v0 }
0x1b23   : > { %7691 = vmatpush3.bf16.msra.mxu1 %v8289_v44 }
0x1b24   : > { %7692 = vmatprep.subr.bf16.mxu1 %v9370_v0 }
0x1b27   : > { %7693 = vmatpush3.bf16.msra.mxu1 %v8290_v45 }
0x1b28   : > { %7694 = vmatprep.subr.bf16.mxu1 %v9370_v0 }
0x1b2b   : > { %7695 = vmatpush3.bf16.msra.mxu1 %v8291_v46 }
0x1b2c   : > { %7696 = vmatprep.subr.bf16.mxu1 %v9370_v0 }
0x1b2f   : > { %7697 = vmatpush3.bf16.msra.mxu1 %v8292_v47 }
0x1b30   : > { %7698 = vmatprep.subr.bf16.mxu1 %v9370_v0 }
0x1b33   : > { %7699 = vmatpush3.bf16.msra.mxu1 %v8293_v48 }
0x1b34   : > { %7700 = vmatprep.subr.bf16.mxu1 %v9370_v0 }
0x1b37   : > { %7701 = vmatpush3.bf16.msra.mxu1 %v8294_v49 }
0x1b38   : > { %7746 = vmatprep.subr.mxu1 %v9370_v0 }
0x1bed   : > { %v3752_v22 = vpop.f32.mrb[32].mxu1 }
0x1bee   : > { %v3753_v23 = vadd.f32 %v7151_v21, %v3752_v22  ;;  %v7664_v24 = vpop.f32.mrb[33].mxu1 }
0x1bef   : > { %v3755_v25 = vpop.f32.mrb[34].mxu1 }
0x1bf0   : > { %v3758_v26 = vmax.f32 %v3753_v23, 0.0  ;;  %v7665_v27 = vpop.f32.mrb[35].mxu1 }
0x1bf2   : > { %v3759_v29 = vpack.c.bf16 %v3758_v26, %v3758_v26 }
0x1bf4   : > { %7683 = vmatmul.mubr.bf16.vlgmr.msra.gmra.mrb[32].mxu0 %v3759_v29 }
0x1bf5   : > { %7708 = vmatprep.mubr.msk.f32.mxu0 %vm9371_vm0, %v9370_v0 }
0x1cc7   : > { %v3865_v31 = vpop.f32.mrb[32].mxu0 }
0x1cc8   : > { %v3866_v32 = vadd.f32 %v7160_v30, %v3865_v31  ;;  %v7684_v33 = vpop.f32.mrb[33].mxu0 }
0x1cc9   : > { %v3868_v34 = vpop.f32.mrb[34].mxu0 }
0x1cca   : > { %v3871_v35 = vadd.f32 %v3866_v32, %v3645_v17  ;;  %v7685_v36 = vpop.f32.mrb[35].mxu0 }
0x1ccc   : > { %v3874_v37 = vmul.f32 %v10479_v42, %v3871_v35 }
0x1cce   : > { %3875 = vadd.xlane.f32.xlu1 %v3874_v37 }
0x1d5b   : > { %v3876_v28 = vpop.xlane.xlu1 %3875 }
0x1d5c   : > { %v3877_v40 = vmul.f32 0.03125, %v3876_v28 }
0x1d5e   : > { %v3878_v41 = vsub.f32 %v3874_v37, %v3877_v40  ;;  %v4017_v37 = vld [vmem:[#allocation13 + $0x28] sm:$0xff] }
0x1d60   : > { %v3879_v43 = vmul.f32 %v10479_v42, %v3878_v41 }
0x1d62   : > { %v3880_v16 = vmul.f32 %v3879_v43, %v3879_v43 }
0x1d64   : > { %3881 = vadd.xlane.f32.xlu1 %v3880_v16 }
0x1df1   : > { %v3882_v9 = vpop.xlane.xlu1 %3881 }
0x1df2   : > { %v3883_v50 = vmul.f32 0.03125, %v3882_v9 }
0x1df4   : > { %v3884_v51 = vadd.f32 1e-05, %v3883_v50 }
0x1df6   : > { %8371 = vrsqrt.f32 %v3884_v51 }
0x1e00   : > { %v8372_v52 = vpop.eup %8371 }
0x1e01   : > { %v3886_v54 = vmul.f32 %v8372_v52, %v3879_v43 }
0x1e03   : > { %v3893_v56 = vmul.f32 %v7169_v53, %v3886_v54 }
0x1e05   : > { %v10636_v57 = vadd.f32 %v7170_v55, %v3893_v56 }
0x1e07   : > { %v3901_v58 = vpack.c.bf16 %v10636_v57, %v10636_v57 }
0x1e09   : > { %7703 = vmatmul.mubr.bf16.vlgmr.msra.gmra.mrb[36].mxu1 %v3901_v58 }
0x1e0a   : > { %7748 = vmatprep.mubr.msk.f32.mxu1 %vm9371_vm0, %v9370_v0 }
0x1edc   : > { %v4009_v59 = vpop.f32.mrb[36].mxu1 }
0x1edd   : > { %v10642_v60 = vadd.f32 %v7171_v12, %v4009_v59  ;;  %v7704_v61 = vpop.f32.mrb[37].mxu1 }
0x1ede   : > { %v4012_v62 = vpop.f32.mrb[38].mxu1 }
0x1edf   : > { %4021 = vrot.lane.b32.xlu1 %v10642_v60, %s9373_s9  ;;  %v7705_v63 = vpop.f32.mrb[39].mxu1  ;;  %v4018_v62 = vld [vmem:[#allocation13 + $0x30] sm:$0xff] }
0x1ee0   : > { %7747 = vmatpush3.msra.mxu1 %v4018_v62 }
0x1ee1   : > { %7756 = vmatprep.subr.mxu1 %v9370_v0 }
0x1f51   : > { %v4022_v1 = vpop.permute.xlu1 %4021 }
0x1f52   : > { %7707 = vmatpush3.xpose.msk.msra.mxu0 %vm1440_vm1, %v4022_v1 }
0x1f53   : > { %7711 = vmatprep.subr.mxu0 %v9370_v0 }
0x1f55   : > { %7709 = vmatmul.mubr.msk.f32.vlgmr.msra.gmra.mrb[30].mxu0 %vm1440_vm1, %v10642_v60 }
0x1f56   : > { %7713 = vmatprep.mubr.msk.f32.mxu0 %vm9371_vm0, %v9370_v0 }
0x2028   : > { %v4093_v2 = vpop.f32.mrb[30].mxu0 }
0x2029   : > { %v4094_v4 = vadd.f32 %v10654_v3, %v4093_v2  ;;  %v7710_v5 = vpop.f32.mrb[31].mxu0 }
0x202b   : > { %v4097_v6 = vsel %vm1440_vm1, %v4094_v4, -inf }
0x202c   : > { %4098 = vmax.xlane.f32.xlu0 %v4097_v6 }
0x2042   : > { %4108 = vrot.lane.b32.xlu0 %v10642_v60, %s9372_s12 }
0x2046   : > { %4184 = vrot.lane.b32.xlu0 %v10642_v60, %s9375_s13 }
0x20b9   : > { %v4099_v7 = vpop.xlane.xlu0 %4098 }
0x20ba   : > { %v4100_v8 = vsub.f32 %v4094_v4, %v4099_v7 }
0x20bc   : > { %v4101_v10 = vmul.f32 1.442695, %v4100_v8 }
0x20bd   : > { %v4109_v11 = vpop.permute.xlu0 %4108 }
0x20be   : > { %8373 = vpow2.f32 %v4101_v10  ;;  %7712 = vmatpush3.msra.mxu0 %v4109_v11 }
0x20bf   : > { %7716 = vmatprep.subr.mxu0 %v9370_v0 }
0x20c1   : > { %v4185_v19 = vpop.permute.xlu0 %4184 }
0x20c8   : > { %v8374_v14 = vpop.eup %8373 }
0x20c9   : > { %v4103_v15 = vsel %vm1440_vm1, %v8374_v14, 0.0 }
0x20ca   : > { %4104 = vadd.xlane.f32.xlu1 %v4103_v15 }
0x20db   : > { %4186 = vrot.lane.b32.xlu1 %v10642_v60, %s9374_s15 }
0x2157   : > { %v4105_v13 = vpop.xlane.xlu1 %4104 }
0x2158   : > { %8375 = vrcp.f32 %v4105_v13 }
0x215b   : > { %v4187_v20 = vpop.permute.xlu1 %4186 }
0x2162   : > { %v8376_v17 = vpop.eup %8375 }
0x2163   : > { %v4107_v18 = vmul.f32 %v8376_v17, %v8374_v14 }
0x2165   : > { %7714 = vmatmul.mubr.msk.f32.vlgmr.msra.gmra.mrb[36].mxu0 %vm1440_vm1, %v4107_v18 }
0x2166   : > { %7717 = vmatpush3.xpose.msk.msra.mxu0 %vm1440_vm1, %v4187_v20  ;;  %7718 = vmatprep.mubr.msk.f32.mxu0 %vm9371_vm0, %v9370_v0 }
0x2167   : > { %7721 = vmatprep.subr.mxu0 %v9370_v0 }
0x2169   : > { %7719 = vmatmul.mubr.msk.f32.vlgmr.msra.gmra.mrb[38].mxu0 %vm1440_vm1, %v4185_v19 }
0x216a   : > { %7723 = vmatprep.mubr.msk.f32.mxu0 %vm9371_vm0, %v9370_v0 }
0x2238   : > { %v4180_v21 = vpop.f32.mrb[36].mxu0 }
0x2239   : > { %v7715_v22 = vpop.f32.mrb[37].mxu0 }
0x223c   : > { %v4258_v23 = vpop.f32.mrb[38].mxu0 }
0x223d   : > { %v4259_v24 = vadd.f32 %v10654_v3, %v4258_v23  ;;  %v7720_v25 = vpop.f32.mrb[39].mxu0 }
0x223f   : > { %v4262_v26 = vsel %vm1440_vm1, %v4259_v24, -inf }
0x2240   : > { %4263 = vmax.xlane.f32.xlu0 %v4262_v26 }
0x2256   : > { %4273 = vrot.lane.b32.xlu0 %v10642_v60, %s9377_s8 }
0x225a   : > { %4495 = vrot.lane.b32.xlu0 %v10642_v60, %s9379_s16 }
0x22cd   : > { %v4264_v27 = vpop.xlane.xlu0 %4263 }
0x22ce   : > { %v4265_v29 = vsub.f32 %v4259_v24, %v4264_v27  ;;  %v7196_v24 = vld [vmem:[#allocation14 + $0x1] ss:$0 sm:$0xff] }
0x22d0   : > { %v4266_v30 = vmul.f32 1.442695, %v4265_v29 }
0x22d1   : > { %v4274_v31 = vpop.permute.xlu0 %4273 }
0x22d2   : > { %8377 = vpow2.f32 %v4266_v30  ;;  %7722 = vmatpush3.msra.mxu0 %v4274_v31  ;;  %v8295_v31 = vld [vmem:[#allocation22 + $0x40] sm:$0xff]  }
0x22d3   : > { %7726 = vmatprep.subr.mxu0 %v9370_v0 }
0x22d5   : > { %v4496_v41 = vpop.permute.xlu0 %4495 }
0x22dc   : > { %v8378_v32 = vpop.eup %8377 }
0x22dd   : > { %v4268_v33 = vsel %vm1440_vm1, %v8378_v32, 0.0 }
0x22de   : > { %4269 = vadd.xlane.f32.xlu1 %v4268_v33  ;;  %v8297_v33 = vld [vmem:[#allocation22 + $0x48] sm:$0xff]  }
0x22ef   : > { %4497 = vrot.lane.b32.xlu1 %v10642_v60, %s9378_s21 }
0x236b   : > { %v4270_v34 = vpop.xlane.xlu1 %4269 }
0x236c   : > { %8379 = vrcp.f32 %v4270_v34  ;;  %v8298_v34 = vld [vmem:[#allocation19 + $0x48] sm:$0xff]  }
0x236f   : > { %v4498_v40 = vpop.permute.xlu1 %4497 }
0x2376   : > { %v8380_v35 = vpop.eup %8379 }
0x2377   : > { %v4272_v36 = vmul.f32 %v8380_v35, %v8378_v32  ;;  %v8296_v32 = vld [vmem:[#allocation19 + $0x40] sm:$0xff]   ;;  %v8299_v35 = vld [vmem:[#allocation22 + $0x50] sm:$0xff]  }
0x2379   : > { %7724 = vmatmul.mubr.msk.f32.vlgmr.msra.gmra.mrb[40].mxu0 %vm1440_vm1, %v4272_v36 }
0x237a   : > { %7727 = vmatpush3.msra.mxu0 %v4017_v37  ;;  %7728 = vmatprep.mubr.msk.f32.mxu0 %vm9371_vm0, %v9370_v0 }
0x237b   : > { %7731 = vmatprep.subr.mxu0 %v9370_v0 }
0x244c   : > { %v4345_v39 = vpop.f32.mrb[40].mxu0 }
0x244d   : > { %v7725_v28 = vpop.f32.mrb[41].mxu0  ;;  %7729 = vmatmul.mubr.msk.f32.vlgmr.msra.gmra.mrb[42].mxu0 %vm1440_vm1, %v4345_v39 }
0x244e   : > { %7732 = vmatpush3.msra.mxu0 %v4016_v38  ;;  %7733 = vmatprep.mubr.msk.f32.mxu0 %vm9371_vm0, %v9370_v0  ;;  %v8301_v28 = vld [vmem:[#allocation22 + $0x58] sm:$0xff]  }
0x244f   : > { %7736 = vmatprep.subr.mxu0 %v9370_v0 }
0x2451   : > { %7734 = vmatmul.mubr.msk.f32.vlgmr.msra.gmra.mrb[44].mxu0 %vm1440_vm1, %v4180_v21 }
0x2452   : > { %7738 = vmatprep.mubr.msk.f32.mxu0 %vm9371_vm0, %v9370_v0 }
0x2455   : > { %7737 = vmatpush3.xpose.msk.msra.mxu0 %vm1440_vm1, %v4498_v40  ;;  %v8300_v40 = vld [vmem:[#allocation19 + $0x50] sm:$0xff]  }
0x2456   : > { %7741 = vmatprep.subr.mxu0 %v9370_v0 }
0x2458   : > { %7739 = vmatmul.mubr.msk.f32.vlgmr.msra.gmra.mrb[46].mxu0 %vm1440_vm1, %v4496_v41  ;;  %v8303_v41 = vld [vmem:[#allocation22 + $0x60] sm:$0xff]  }
0x2459   : > { %7743 = vmatprep.mubr.msk.f32.mxu0 %vm9371_vm0, %v9370_v0 }
0x2520   : > { %v4418_v43 = vpop.f32.mrb[42].mxu0 }
0x2521   : > { %v7730_v16 = vpop.f32.mrb[43].mxu0 }
0x2522   : > { %v8305_v16 = vld [vmem:[#allocation22 + $0x68] sm:$0xff]  }
0x2524   : > { %v4491_v44 = vpop.f32.mrb[44].mxu0 }
0x2525   : > { %v4492_v45 = vadd.f32 %v4491_v44, %v4418_v43  ;;  %v7735_v46 = vpop.f32.mrb[45].mxu0  ;;  %v8302_v43 = vld [vmem:[#allocation19 + $0x58] sm:$0xff]   ;;  %v8304_v44 = vld [vmem:[#allocation19 + $0x60] sm:$0xff]  }
0x2526   : > { %v8306_v46 = vld [vmem:[#allocation19 + $0x68] sm:$0xff]  }
0x252b   : > { %v4569_v47 = vpop.f32.mrb[46].mxu0 }
0x252c   : > { %v4570_v48 = vadd.f32 %v10654_v3, %v4569_v47  ;;  %v7740_v49 = vpop.f32.mrb[47].mxu0  ;;  %v8309_v47 = vld [vmem:[#allocation22 + $0x78] sm:$0xff]  }
0x252d   : > { %v8310_v49 = vld [vmem:[#allocation19 + $0x78] sm:$0xff]  }
0x252e   : > { %v4573_v9 = vsel %vm1440_vm1, %v4570_v48, -inf }
0x252f   : > { %4574 = vmax.xlane.f32.xlu0 %v4573_v9  ;;  %v8414_v9 = vld [vmem:[%s10299_s14] sm:$0xf]  ;;  %s6656_s14 = sshll.u32 %s1310_s11, 4  ;;  %s10895_s14 = int_to_ptr.vmem [resolvable:$true] %s6656_s14 }
0x2530   : > { %s9208_s10 = scalar_lea.vmem %s10895_s14, 128 }
0x2531   : > { %p9209_p3 = scmp.ne.s32.totalorder %s10895_s14, %s9208_s10 }
0x2533   : > { %p9210_p9 = pnand %p9209_p3, %p11146_p1 }
0x2535   : > { %p9211_p5 = pneg %p9210_p9 }
0x2545   : > { %4584 = vrot.lane.b32.xlu0 %v10642_v60, %s9381_s2 }
0x2549   : > { %4734 = vrot.lane.b32.xlu0 %v10642_v60, %s9380_s23 }
0x25bc   : > { %v4575_v50 = vpop.xlane.xlu0 %4574 }
0x25bd   : > { %v4576_v51 = vsub.f32 %v4570_v48, %v4575_v50  ;;  %v8308_v48 = vld [vmem:[#allocation19 + $0x70] sm:$0xff]  }
0x25bf   : > { %v4577_v52 = vmul.f32 1.442695, %v4576_v51 }
0x25c0   : > { %v4585_v53 = vpop.permute.xlu0 %4584 }
0x25c1   : > { %8381 = vpow2.f32 %v4577_v52  ;;  %7742 = vmatpush3.msra.mxu0 %v4585_v53 }
0x25c2   : > { %7751 = vmatprep.subr.mxu0 %v9370_v0 }
0x25c4   : > { %v4735_v61 = vpop.permute.xlu0 %4734 }
0x25cb   : > { %v8382_v54 = vpop.eup %8381 }
0x25cc   : > { %v4579_v55 = vsel %vm1440_vm1, %v8382_v54, 0.0 }
0x25cd   : > { %4580 = vadd.xlane.f32.xlu1 %v4579_v55 }
0x25de   : > { %4736 = vrot.lane.b32.xlu1 %v10642_v60, %s9376_s19 }
0x265a   : > { %v4581_v56 = vpop.xlane.xlu1 %4580 }
0x265b   : > { %8383 = vrcp.f32 %v4581_v56  ;;  %v7198_v56 = vld [vmem:[#allocation17 + $0x1] ss:$0 sm:$0xff] }
0x265e   : > { %v4737_v59 = vpop.permute.xlu1 %4736 }
0x2665   : > { %v8384_v58 = vpop.eup %8383 }
0x2666   : > { %v4583_v12 = vmul.f32 %v8384_v58, %v8382_v54  ;;  %v7197_v54 = vld [vmem:[#allocation16 + $0x1] ss:$0 sm:$0xff] }
0x2668   : > { %7744 = vmatmul.mubr.msk.f32.vlgmr.msra.gmra.mrb[48].mxu0 %vm1440_vm1, %v4583_v12 }
0x2669   : > { %7752 = vmatpush3.xpose.msk.msra.mxu0 %vm1440_vm1, %v4737_v59  ;;  %7753 = vmatprep.mubr.msk.f32.mxu0 %vm9371_vm0, %v9370_v0 }
0x266a   : > { %7761 = vmatprep.subr.mxu0 %v9370_v0 }
0x266c   : > { %7754 = vmatmul.mubr.msk.f32.vlgmr.msra.gmra.mrb[50].mxu0 %vm1440_vm1, %v4735_v61  ;;  %v7208_v61 = vld [vmem:[#allocation23 + $0x1] ss:$0 sm:$0xff] }
0x266d   : > { %7763 = vmatprep.mubr.msk.f32.mxu0 %vm9371_vm0, %v9370_v0 }
0x273b   : > { %v4656_v63 = vpop.f32.mrb[48].mxu0 }
0x273c   : > { %v7745_v1 = vpop.f32.mrb[49].mxu0  ;;  %7749 = vmatmul.mubr.msk.f32.vlgmr.msra.gmra.mrb[30].mxu1 %vm1440_vm1, %v4656_v63 }
0x273d   : > { %7758 = vmatprep.mubr.msk.f32.mxu1 %vm9371_vm0, %v9370_v0 }
0x273f   : > { %v4808_v2 = vpop.f32.mrb[50].mxu0 }
0x2740   : > { %v4809_v4 = vadd.f32 %v10654_v3, %v4808_v2  ;;  %v7755_v5 = vpop.f32.mrb[51].mxu0 }
0x2741   : > { %v7199_v5 = vld [vmem:[#allocation20 + $0x1] ss:$0 sm:$0xff] }
0x2742   : > { %v4812_v6 = vsel %vm1440_vm1, %v4809_v4, -inf }
0x2743   : > { %4813 = vmax.xlane.f32.xlu0 %v4812_v6 }
0x2759   : > { %4823 = vrot.lane.b32.xlu0 %v10642_v60, %s9382_s7  ;;  %v4019_v60 = vld [vmem:[#allocation13 + $0x38] sm:$0xff] }
0x275a   : > { %7762 = vmatpush3.msra.mxu0 %v4019_v60 }
0x275b   : > { %7786 = vmatprep.subr.bf16.mxu0 %v9370_v0 }
0x27d0   : > { %v4814_v7 = vpop.xlane.xlu0 %4813 }
0x27d1   : > { %v4815_v8 = vsub.f32 %v4809_v4, %v4814_v7 }
0x27d3   : > { %v4816_v10 = vmul.f32 1.442695, %v4815_v8 }
0x27d4   : > { %v4824_v11 = vpop.permute.xlu0 %4823 }
0x27d5   : > { %8385 = vpow2.f32 %v4816_v10  ;;  %7757 = vmatpush3.msra.mxu1 %v4824_v11 }
0x27d6   : > { %7766 = vmatprep.subr.bf16.mxu1 %v9370_v0 }
0x27df   : > { %v8386_v14 = vpop.eup %8385 }
0x27e0   : > { %v4818_v15 = vsel %vm1440_vm1, %v8386_v14, 0.0 }
0x27e1   : > { %4819 = vadd.xlane.f32.xlu1 %v4818_v15 }
0x280f   : > { %v4729_v3 = vpop.f32.mrb[30].mxu1 }
0x2810   : > { %v4733_v13 = vadd.f32 %v4729_v3, %v4492_v45  ;;  %v7750_v17 = vpop.f32.mrb[31].mxu1  ;;  %v8307_v45 = vld [vmem:[#allocation22 + $0x70] sm:$0xff]  }
0x286e   : > { %v4820_v18 = vpop.xlane.xlu1 %4819 }
0x286f   : > { %8387 = vrcp.f32 %v4820_v18 }
0x2879   : > { %v8388_v20 = vpop.eup %8387 }
0x287a   : > { %v4822_v19 = vmul.f32 %v8388_v20, %v8386_v14 }
0x287c   : > { %7759 = vmatmul.mubr.msk.f32.vlgmr.msra.gmra.mrb[40].mxu1 %vm1440_vm1, %v4822_v19 }
0x287d   : > { %7782 = vmatprep.mubr.msk.bf16.mxu1 %vm9371_vm0, %v9370_v0  ;;  %7767 = vmatpush3.bf16.msra.mxu1 %v8296_v32 }
0x287e   : > { %7768 = vmatprep.subr.bf16.mxu1 %v9370_v0 }
0x2881   : > { %7769 = vmatpush3.bf16.msra.mxu1 %v8298_v34 }
0x2882   : > { %7770 = vmatprep.subr.bf16.mxu1 %v9370_v0 }
0x2885   : > { %7771 = vmatpush3.bf16.msra.mxu1 %v8300_v40  ;;  %v5242_v40 = vld [vmem:[#allocation25 + $0x20] sm:$0xff] }
0x2886   : > { %7772 = vmatprep.subr.bf16.mxu1 %v9370_v0 }
0x2889   : > { %7773 = vmatpush3.bf16.msra.mxu1 %v8302_v43 }
0x288a   : > { %7774 = vmatprep.subr.bf16.mxu1 %v9370_v0 }
0x288d   : > { %7775 = vmatpush3.bf16.msra.mxu1 %v8304_v44 }
0x288e   : > { %7776 = vmatprep.subr.bf16.mxu1 %v9370_v0 }
0x2891   : > { %7777 = vmatpush3.bf16.msra.mxu1 %v8306_v46 }
0x2892   : > { %7778 = vmatprep.subr.bf16.mxu1 %v9370_v0 }
0x2895   : > { %7779 = vmatpush3.bf16.msra.mxu1 %v8308_v48 }
0x2896   : > { %7780 = vmatprep.subr.bf16.mxu1 %v9370_v0 }
0x2899   : > { %7781 = vmatpush3.bf16.msra.mxu1 %v8310_v49 }
0x289a   : > { %7806 = vmatprep.subr.mxu1 %v9370_v0 }
0x294f   : > { %v4895_v21 = vpop.f32.mrb[40].mxu1 }
0x2950   : > { %v7760_v22 = vpop.f32.mrb[41].mxu1  ;;  %7764 = vmatmul.mubr.msk.f32.vlgmr.msra.gmra.mrb[52].mxu0 %vm1440_vm1, %v4895_v21 }
0x2951   : > { %7802 = vmatprep.mubr.msk.bf16.mxu0 %vm9371_vm0, %v9370_v0  ;;  %7787 = vmatpush3.bf16.msra.mxu0 %v8295_v31 }
0x2952   : > { %7788 = vmatprep.subr.bf16.mxu0 %v9370_v0 }
0x2955   : > { %7789 = vmatpush3.bf16.msra.mxu0 %v8297_v33 }
0x2956   : > { %7790 = vmatprep.subr.bf16.mxu0 %v9370_v0 }
0x2959   : > { %7791 = vmatpush3.bf16.msra.mxu0 %v8299_v35 }
0x295a   : > { %7792 = vmatprep.subr.bf16.mxu0 %v9370_v0 }
0x295d   : > { %7793 = vmatpush3.bf16.msra.mxu0 %v8301_v28 }
0x295e   : > { %7794 = vmatprep.subr.bf16.mxu0 %v9370_v0 }
0x2961   : > { %7795 = vmatpush3.bf16.msra.mxu0 %v8303_v41  ;;  %v5243_v41 = vld [vmem:[#allocation25 + $0x28] sm:$0xff] }
0x2962   : > { %7796 = vmatprep.subr.bf16.mxu0 %v9370_v0 }
0x2965   : > { %7797 = vmatpush3.bf16.msra.mxu0 %v8305_v16 }
0x2966   : > { %7798 = vmatprep.subr.bf16.mxu0 %v9370_v0 }
0x2969   : > { %7799 = vmatpush3.bf16.msra.mxu0 %v8307_v45 }
0x296a   : > { %7800 = vmatprep.subr.bf16.mxu0 %v9370_v0 }
0x296d   : > { %7801 = vmatpush3.bf16.msra.mxu0 %v8309_v47 }
0x296e   : > { %7811 = vmatprep.subr.mxu0 %v9370_v0 }
0x2970   : > { %7803 = vmatmul.mubr.bf16.vlgmr.msra.gmra.mrb[56].mxu0 %v8414_v9 }
0x2971   : > { %7813 = vmatprep.mubr.msk.f32.mxu0 %vm9371_vm0, %v9370_v0 }
0x2a23   : > { %v4968_v23 = vpop.f32.mrb[52].mxu0 }
0x2a24   : > { %v4972_v25 = vadd.f32 %v4968_v23, %v4733_v13  ;;  %v7765_v26 = vpop.f32.mrb[53].mxu0  ;;  %v10785_v13 = vld [vmem:[%s1127_s29] sm:$0xff]  ;;  %s11145_s29 = sld [smem:[#allocation98_spill]] }
0x2a26   : > { %v4981_v27 = vadd.f32 %v7196_v24, %v4972_v25 }
0x2a28   : > { %v4982_v29 = vadd.f32 %v4981_v27, %v10636_v57 }
0x2a2a   : > { %v4987_v30 = vmul.f32 %v10479_v42, %v4982_v29  ;;  %s10893_s12 = scalar_lea.hbm %s11145_s29, %s7268_s26 }
0x2a2c   : > { %4988 = vadd.xlane.f32.xlu1 %v4987_v30 }
0x2a43   : > { %v5235_v62 = vpop.f32.mrb[56].mxu0 }
0x2a44   : > { %v10763_v63 = vadd.f32 %v7208_v61, %v5235_v62  ;;  %v7804_v1 = vpop.f32.mrb[57].mxu0 }
0x2a45   : > { %v5238_v2 = vpop.f32.mrb[58].mxu0 }
0x2a46   : > { %v7805_v4 = vpop.f32.mrb[59].mxu0 }
0x2ab9   : > { %v4989_v57 = vpop.xlane.xlu1 %4988 }
0x2aba   : > { %v4990_v36 = vmul.f32 0.03125, %v4989_v57 }
0x2abc   : > { %v4991_v37 = vsub.f32 %v4987_v30, %v4990_v36 }
0x2abe   : > { %v4992_v38 = vmul.f32 %v10479_v42, %v4991_v37 }
0x2ac0   : > { %v4993_v39 = vmul.f32 %v4992_v38, %v4992_v38 }
0x2ac2   : > { %4994 = vadd.xlane.f32.xlu1 %v4993_v39 }
0x2ad3   : > { %5411 = vrot.lane.b32.xlu1 %v10763_v63, %s9375_s13 }
0x2b4f   : > { %v4995_v50 = vpop.xlane.xlu1 %4994 }
0x2b50   : > { %v4996_v51 = vmul.f32 0.03125, %v4995_v50 }
0x2b52   : > { %v4997_v52 = vadd.f32 1e-05, %v4996_v51 }
0x2b53   : > { %v5412_v10 = vpop.permute.xlu1 %5411 }
0x2b54   : > { %8389 = vrsqrt.f32 %v4997_v52 }
0x2b5e   : > { %v8390_v53 = vpop.eup %8389 }
0x2b5f   : > { %v4999_v55 = vmul.f32 %v8390_v53, %v4992_v38 }
0x2b61   : > { %v5006_v58 = vmul.f32 %v7197_v54, %v4999_v55 }
0x2b63   : > { %v10757_v12 = vadd.f32 %v7198_v56, %v5006_v58 }
0x2b65   : > { %v5014_v59 = vpack.c.bf16 %v10757_v12, %v10757_v12 }
0x2b67   : > { %7783 = vmatmul.mubr.bf16.vlgmr.msra.gmra.mrb[44].mxu1 %v5014_v59 }
0x2b68   : > { %7808 = vmatprep.mubr.msk.f32.mxu1 %vm9371_vm0, %v9370_v0  ;;  %7807 = vmatpush3.xpose.msk.msra.mxu1 %vm1440_vm1, %v10763_v63 }
0x2b69   : > { %7816 = vmatprep.subr.mxu1 %v9370_v0 }
0x2c3a   : > { %v5122_v6 = vpop.f32.mrb[44].mxu1 }
0x2c3b   : > { %v10770_v7 = vadd.f32 %v7199_v5, %v5122_v6  ;;  %v7784_v8 = vpop.f32.mrb[45].mxu1 }
0x2c3c   : > { %v5125_v11 = vpop.f32.mrb[46].mxu1  ;;  %v5244_v8 = vld [vmem:[#allocation25 + $0x30] sm:$0xff] }
0x2c3d   : > { %5409 = vrot.lane.b32.xlu0 %v10770_v7, %s9375_s13  ;;  %v7785_v14 = vpop.f32.mrb[47].mxu1  ;;  %7809 = vmatmul.mubr.msk.f32.vlgmr.msra.gmra.mrb[42].mxu1 %vm1440_vm1, %v10770_v7 }
0x2c3e   : > { %7817 = vmatpush3.xpose.msk.msra.mxu1 %vm1440_vm1, %v5412_v10  ;;  %7818 = vmatprep.mubr.msk.f32.mxu1 %vm9371_vm0, %v9370_v0 }
0x2c3f   : > { %7826 = vmatprep.subr.mxu1 %v9370_v0 }
0x2caf   : > { %v5410_v15 = vpop.permute.xlu0 %5409 }
0x2cb0   : > { %7819 = vmatmul.mubr.msk.f32.vlgmr.msra.gmra.mrb[48].mxu1 %vm1440_vm1, %v5410_v15 }
0x2cb1   : > { %7828 = vmatprep.mubr.msk.f32.mxu1 %vm9371_vm0, %v9370_v0  ;;  %7827 = vmatpush3.msra.mxu1 %v5243_v41 }
0x2cb2   : > { %7836 = vmatprep.subr.mxu1 %v9370_v0 }
0x2d10   : > { %v5318_v3 = vpop.f32.mrb[42].mxu1 }
0x2d11   : > { %v5319_v17 = vadd.f32 %v10785_v13, %v5318_v3  ;;  %v7810_v18 = vpop.f32.mrb[43].mxu1 }
0x2d13   : > { %v5322_v20 = vsel %vm1440_vm1, %v5319_v17, -inf }
0x2d14   : > { %5323 = vmax.xlane.f32.xlu0 %v5322_v20 }
0x2d83   : > { %v5483_v19 = vpop.f32.mrb[48].mxu1 }
0x2d84   : > { %v5484_v60 = vadd.f32 %v10785_v13, %v5483_v19  ;;  %v7820_v21 = vpop.f32.mrb[49].mxu1 }
0x2d86   : > { %v5487_v22 = vsel %vm1440_vm1, %v5484_v60, -inf }
0x2d87   : > { %5488 = vmax.xlane.f32.xlu1 %v5487_v22 }
0x2d98   : > { %5498 = vrot.lane.b32.xlu1 %v10763_v63, %s9374_s15  ;;  %s9212_s15 = sshll.u32 %s9383_s1, 4  ;;  %s9213_s15 = int_to_ptr.vmem [resolvable:$false] %s9212_s15 }
0x2d99   : > { %s9214_s13 = scalar_lea.vmem %s9213_s15, 256  ;;  %p9215_p8 = scmp.lt.s32.totalorder %s10895_s14, %s9213_s15 }
0x2d9a   : > { %p9216_p6 = scmp.lt.s32.totalorder %s9214_s13, %s9208_s10 }
0x2d9c   : > { %5722 = vrot.lane.b32.xlu1 %v10763_v63, %s9379_s16  ;;  %p9217_p2 = por %p9216_p6, %p9215_p8 }
0x2d9e   : > { %p9218_p11 = pnand %p9217_p2, %p9211_p5 }
0x2da1   : > { %v5324_v23 = vpop.xlane.xlu0 %5323 }
0x2da2   : > { %v5325_v24 = vsub.f32 %v5319_v17, %v5324_v23 }
0x2da4   : > { %v5326_v25 = vmul.f32 1.442695, %v5325_v24 }
0x2da6   : > { %8391 = vpow2.f32 %v5326_v25 }
0x2db0   : > { %v8392_v26 = vpop.eup %8391 }
0x2db1   : > { %v5328_v27 = vsel %vm1440_vm1, %v8392_v26, 0.0 }
0x2db2   : > { %5329 = vadd.xlane.f32.xlu0 %v5328_v27 }
0x2e14   : > { %v5489_v29 = vpop.xlane.xlu1 %5488 }
0x2e15   : > { %v5490_v30 = vsub.f32 %v5484_v60, %v5489_v29 }
0x2e17   : > { %v5491_v31 = vmul.f32 1.442695, %v5490_v30 }
0x2e18   : > { %v5499_v38 = vpop.permute.xlu1 %5498 }
0x2e19   : > { %8393 = vpow2.f32 %v5491_v31 }
0x2e1c   : > { %v5723_v45 = vpop.permute.xlu1 %5722 }
0x2e23   : > { %v8394_v32 = vpop.eup %8393 }
0x2e24   : > { %v5493_v33 = vsel %vm1440_vm1, %v8394_v32, 0.0 }
0x2e25   : > { %5494 = vadd.xlane.f32.xlu0 %v5493_v33 }
0x2e3b   : > { %5333 = vrot.lane.b32.xlu0 %v10763_v63, %s9373_s9  ;;  %s6643_s9 = scalar_lea.sflag [#allocation4], %s10286_s4 }
0x2e3f   : > { %5720 = vrot.lane.b32.xlu0 %v10770_v7, %s9379_s16  ;;  %v5330_v34 = vpop.xlane.xlu0 %5329 }
0x2e40   : > { %8395 = vrcp.f32 %v5330_v34 }
0x2e4a   : > { %v8396_v57 = vpop.eup %8395 }
0x2e4b   : > { %v5332_v36 = vmul.f32 %v8396_v57, %v8392_v26 }
0x2eb2   : > { %v5495_v35 = vpop.xlane.xlu0 %5494 }
0x2eb3   : > { %8397 = vrcp.f32 %v5495_v35 }
0x2eb6   : > { %v5334_v37 = vpop.permute.xlu0 %5333 }
0x2eb7   : > { %7812 = vmatpush3.msra.mxu0 %v5334_v37  ;;  %v8311_v37 = vld [vmem:[#allocation31 + $0x40] sm:$0xff]  }
0x2eb8   : > { %7814 = vmatmul.mubr.msk.f32.vlgmr.msra.gmra.mrb[54].mxu0 %vm1440_vm1, %v5332_v36  ;;  %7821 = vmatprep.subr.mxu0 %v9370_v0 }
0x2eb9   : > { %7822 = vmatpush3.msra.mxu0 %v5499_v38  ;;  %7823 = vmatprep.mubr.msk.f32.mxu0 %vm9371_vm0, %v9370_v0  ;;  %v8312_v38 = vld [vmem:[#allocation31 + $0x48] sm:$0xff]  }
0x2eba   : > { %7831 = vmatprep.subr.mxu0 %v9370_v0  ;;  %v5721_v47 = vpop.permute.xlu0 %5720 }
0x2ebd   : > { %v8398_v39 = vpop.eup %8397 }
0x2ebe   : > { %v5497_v28 = vmul.f32 %v8398_v39, %v8394_v32  ;;  %v7233_v32 = vld [vmem:[#allocation26 + $0x1] ss:$0 sm:$0xff] }
0x2ec0   : > { %7824 = vmatmul.mubr.msk.f32.vlgmr.msra.gmra.mrb[60].mxu0 %vm1440_vm1, %v5497_v28 }
0x2ec1   : > { %7833 = vmatprep.mubr.msk.f32.mxu0 %vm9371_vm0, %v9370_v0  ;;  %7832 = vmatpush3.msra.mxu0 %v5242_v40 }
0x2ec2   : > { %7841 = vmatprep.subr.mxu0 %v9370_v0 }
0x2f8b   : > { %v5405_v43 = vpop.f32.mrb[54].mxu0 }
0x2f8c   : > { %v7815_v16 = vpop.f32.mrb[55].mxu0  ;;  %7834 = vmatmul.mubr.msk.f32.vlgmr.msra.gmra.mrb[62].mxu0 %vm1440_vm1, %v5405_v43 }
0x2f8d   : > { %7843 = vmatprep.mubr.msk.f32.mxu0 %vm9371_vm0, %v9370_v0  ;;  %v8313_v16 = vld [vmem:[#allocation31 + $0x50] sm:$0xff]  }
0x2f93   : > { %v5570_v44 = vpop.f32.mrb[60].mxu0 }
0x2f94   : > { %v7825_v46 = vpop.f32.mrb[61].mxu0  ;;  %7829 = vmatmul.mubr.msk.f32.vlgmr.msra.gmra.mrb[50].mxu1 %vm1440_vm1, %v5570_v44  ;;  %v8315_v44 = vld [vmem:[#allocation31 + $0x60] sm:$0xff]  }
0x2f95   : > { %7837 = vmatpush3.xpose.msk.msra.mxu1 %vm1440_vm1, %v5723_v45  ;;  %7838 = vmatprep.mubr.msk.f32.mxu1 %vm9371_vm0, %v9370_v0  ;;  %v8316_v45 = vld [vmem:[#allocation31 + $0x68] sm:$0xff]   ;;  %v8317_v46 = vld [vmem:[#allocation31 + $0x70] sm:$0xff]  }
0x2f96   : > { %7846 = vmatprep.subr.mxu1 %v9370_v0 }
0x2f98   : > { %7839 = vmatmul.mubr.msk.f32.vlgmr.msra.gmra.mrb[52].mxu1 %vm1440_vm1, %v5721_v47  ;;  %v8318_v47 = vld [vmem:[#allocation31 + $0x78] sm:$0xff]  }
0x2f99   : > { %7848 = vmatprep.mubr.msk.f32.mxu1 %vm9371_vm0, %v9370_v0  ;;  %7847 = vmatpush3.msra.mxu1 %v5244_v8 }
0x2f9a   : > { %7856 = vmatprep.subr.mxu1 %v9370_v0 }
0x305f   : > { %v5716_v48 = vpop.f32.mrb[62].mxu0 }
0x3060   : > { %v7835_v49 = vpop.f32.mrb[63].mxu0 }
0x3061   : > { %v8320_v49 = vld [vmem:[#allocation34 + $0x48] sm:$0xff]  }
0x3067   : > { %v5643_v9 = vpop.f32.mrb[50].mxu1 }
0x3068   : > { %v5717_v50 = vadd.f32 %v5716_v48, %v5643_v9  ;;  %v7830_v51 = vpop.f32.mrb[51].mxu1  ;;  %v8319_v48 = vld [vmem:[#allocation34 + $0x40] sm:$0xff]   ;;  %v8321_v9 = vld [vmem:[#allocation34 + $0x50] sm:$0xff]  }
0x3069   : > { %v8323_v51 = vld [vmem:[#allocation34 + $0x60] sm:$0xff]  }
0x306b   : > { %v5794_v52 = vpop.f32.mrb[52].mxu1 }
0x306c   : > { %v5795_v53 = vadd.f32 %v10785_v13, %v5794_v52  ;;  %v7840_v54 = vpop.f32.mrb[53].mxu1  ;;  %v8324_v52 = vld [vmem:[#allocation34 + $0x68] sm:$0xff]  }
0x306e   : > { %v5798_v55 = vsel %vm1440_vm1, %v5795_v53, -inf }
0x306f   : > { %5799 = vmax.xlane.f32.xlu1 %v5798_v55 }
0x3080   : > { %5961 = vrot.lane.b32.xlu1 %v10763_v63, %s9380_s23 }
0x3084   : > { %5959 = vrot.lane.b32.xlu1 %v10770_v7, %s9380_s23 }
0x30fc   : > { %v5800_v56 = vpop.xlane.xlu1 %5799 }
0x30fd   : > { %v5801_v58 = vsub.f32 %v5795_v53, %v5800_v56 }
0x30ff   : > { %v5802_v59 = vmul.f32 1.442695, %v5801_v58  ;;  %v7234_v58 = vld [vmem:[#allocation28 + $0x1] ss:$0 sm:$0xff] }
0x3100   : > { %v5962_v5 = vpop.permute.xlu1 %5961 }
0x3101   : > { %8399 = vpow2.f32 %v5802_v59 }
0x3104   : > { %v5960_v7 = vpop.permute.xlu1 %5959 }
0x310b   : > { %v8400_v61 = vpop.eup %8399 }
0x310c   : > { %v5804_v62 = vsel %vm1440_vm1, %v8400_v61, 0.0 }
0x310d   : > { %5805 = vadd.xlane.f32.xlu0 %v5804_v62 }
0x3123   : > { %5809 = vrot.lane.b32.xlu0 %v10763_v63, %s9378_s21 }
0x319a   : > { %v5806_v1 = vpop.xlane.xlu0 %5805 }
0x319b   : > { %8401 = vrcp.f32 %v5806_v1 }
0x319e   : > { %v5810_v2 = vpop.permute.xlu0 %5809 }
0x319f   : > { %7842 = vmatpush3.msra.mxu0 %v5810_v2 }
0x31a0   : > { %7851 = vmatprep.subr.mxu0 %v9370_v0 }
0x31a5   : > { %v8402_v4 = vpop.eup %8401 }
0x31a6   : > { %v5808_v6 = vmul.f32 %v8402_v4, %v8400_v61  ;;  %v7235_v61 = vld [vmem:[#allocation29 + $0x1] ss:$0 sm:$0xff]  ;;  %v8325_v4 = vld [vmem:[#allocation34 + $0x70] sm:$0xff]  }
0x31a8   : > { %7844 = vmatmul.mubr.msk.f32.vlgmr.msra.gmra.mrb[64].mxu0 %vm1440_vm1, %v5808_v6  ;;  %v7236_v6 = vld [vmem:[#allocation32 + $0x1] ss:$0 sm:$0xff] }
0x31a9   : > { %7852 = vmatpush3.xpose.msk.msra.mxu0 %vm1440_vm1, %v5962_v5  ;;  %7853 = vmatprep.mubr.msk.f32.mxu0 %vm9371_vm0, %v9370_v0  ;;  %v8326_v5 = vld [vmem:[#allocation34 + $0x78] sm:$0xff]  }
0x31aa   : > { %7861 = vmatprep.subr.mxu0 %v9370_v0 }
0x31ac   : > { %7854 = vmatmul.mubr.msk.f32.vlgmr.msra.gmra.mrb[66].mxu0 %vm1440_vm1, %v5960_v7 }
0x31ad   : > { %7863 = vmatprep.mubr.msk.f32.mxu0 %vm9371_vm0, %v9370_v0 }
0x327b   : > { %v5881_v10 = vpop.f32.mrb[64].mxu0 }
0x327c   : > { %v7845_v11 = vpop.f32.mrb[65].mxu0  ;;  %7849 = vmatmul.mubr.msk.f32.vlgmr.msra.gmra.mrb[54].mxu1 %vm1440_vm1, %v5881_v10 }
0x327d   : > { %7858 = vmatprep.mubr.msk.f32.mxu1 %vm9371_vm0, %v9370_v0 }
0x327f   : > { %v6033_v14 = vpop.f32.mrb[66].mxu0 }
0x3280   : > { %v6034_v15 = vadd.f32 %v10785_v13, %v6033_v14  ;;  %v7855_v3 = vpop.f32.mrb[67].mxu0 }
0x3282   : > { %v6037_v17 = vsel %vm1440_vm1, %v6034_v15, -inf }
0x3283   : > { %6038 = vmax.xlane.f32.xlu0 %v6037_v17  ;;  %v7245_v17 = vld [vmem:[#allocation35 + $0x1] ss:$0 sm:$0xff] }
0x3299   : > { %6048 = vrot.lane.b32.xlu0 %v10763_v63, %s9376_s19  ;;  %v5245_v63 = vld [vmem:[#allocation25 + $0x38] sm:$0xff] }
0x329a   : > { %7862 = vmatpush3.msra.mxu0 %v5245_v63 }
0x329b   : > { %7886 = vmatprep.subr.bf16.mxu0 %v9370_v0 }
0x3310   : > { %v6039_v18 = vpop.xlane.xlu0 %6038 }
0x3311   : > { %v6040_v20 = vsub.f32 %v6034_v15, %v6039_v18 }
0x3313   : > { %v6041_v19 = vmul.f32 1.442695, %v6040_v20 }
0x3314   : > { %v6049_v60 = vpop.permute.xlu0 %6048 }
0x3315   : > { %8403 = vpow2.f32 %v6041_v19  ;;  %7857 = vmatpush3.msra.mxu1 %v6049_v60 }
0x3316   : > { %7866 = vmatprep.subr.bf16.mxu1 %v9370_v0 }
0x331f   : > { %v8404_v21 = vpop.eup %8403 }
0x3320   : > { %v6043_v22 = vsel %vm1440_vm1, %v8404_v21, 0.0 }
0x3321   : > { %6044 = vadd.xlane.f32.xlu1 %v6043_v22 }
0x334f   : > { %v5954_v13 = vpop.f32.mrb[54].mxu1 }
0x3350   : > { %v5958_v23 = vadd.f32 %v5954_v13, %v5717_v50  ;;  %v7850_v24 = vpop.f32.mrb[55].mxu1  ;;  %v8322_v50 = vld [vmem:[#allocation34 + $0x58] sm:$0xff]  }
0x33ae   : > { %v6045_v25 = vpop.xlane.xlu1 %6044 }
0x33af   : > { %8405 = vrcp.f32 %v6045_v25 }
0x33b9   : > { %v8406_v26 = vpop.eup %8405 }
0x33ba   : > { %v6047_v27 = vmul.f32 %v8406_v26, %v8404_v21 }
0x33bc   : > { %7859 = vmatmul.mubr.msk.f32.vlgmr.msra.gmra.mrb[56].mxu1 %vm1440_vm1, %v6047_v27 }
0x33bd   : > { %7882 = vmatprep.mubr.msk.bf16.mxu1 %vm9371_vm0, %v9370_v0  ;;  %7867 = vmatpush3.bf16.msra.mxu1 %v8311_v37  ;;  %v8327_v37 = vld [vmem:[#allocation43] sm:$0xff]  }
0x33be   : > { %7868 = vmatprep.subr.bf16.mxu1 %v9370_v0 }
0x33c1   : > { %7869 = vmatpush3.bf16.msra.mxu1 %v8312_v38  ;;  %v8328_v38 = vld [vmem:[#allocation43 + $0x8] sm:$0xff]  }
0x33c2   : > { %7870 = vmatprep.subr.bf16.mxu1 %v9370_v0 }
0x33c5   : > { %7871 = vmatpush3.bf16.msra.mxu1 %v8313_v16  ;;  %v8329_v16 = vld [vmem:[#allocation43 + $0x10] sm:$0xff]  }
0x33c6   : > { %7872 = vmatprep.subr.bf16.mxu1 %v9370_v0 }
0x348f   : > { %v6120_v29 = vpop.f32.mrb[56].mxu1 }
0x3490   : > { %v7860_v30 = vpop.f32.mrb[57].mxu1  ;;  %7864 = vmatmul.mubr.msk.f32.vlgmr.msra.gmra.mrb[68].mxu0 %vm1440_vm1, %v6120_v29 }
0x3491   : > { %7902 = vmatprep.mubr.msk.bf16.mxu0 %vm9371_vm0, %v9370_v0  ;;  %7887 = vmatpush3.bf16.msra.mxu0 %v8319_v48 }
0x3492   : > { %7888 = vmatprep.subr.bf16.mxu0 %v9370_v0 }
0x3495   : > { %7889 = vmatpush3.bf16.msra.mxu0 %v8320_v49 }
0x3496   : > { %7890 = vmatprep.subr.bf16.mxu0 %v9370_v0 }
0x3499   : > { %7891 = vmatpush3.bf16.msra.mxu0 %v8321_v9 }
0x349a   : > { %7892 = vmatprep.subr.bf16.mxu0 %v9370_v0 }
0x349d   : > { %7893 = vmatpush3.bf16.msra.mxu0 %v8322_v50  ;;  %v7256_v50 = vld [vmem:[#allocation40] ss:$0 sm:$0xff] }
0x349e   : > { %7894 = vmatprep.subr.bf16.mxu0 %v9370_v0 }
0x34a1   : > { %7895 = vmatpush3.bf16.msra.mxu0 %v8323_v51 }
0x34a2   : > { %7896 = vmatprep.subr.bf16.mxu0 %v9370_v0 }
0x34a5   : > { %7897 = vmatpush3.bf16.msra.mxu0 %v8324_v52  ;;  %v7257_v52 = vld [vmem:[#allocation41] ss:$0 sm:$0xff] }
0x34a6   : > { %7898 = vmatprep.subr.bf16.mxu0 %v9370_v0 }
0x34a9   : > { %7899 = vmatpush3.bf16.msra.mxu0 %v8325_v4 }
0x34aa   : > { %7900 = vmatprep.subr.bf16.mxu0 %v9370_v0 }
0x34ad   : > { %7901 = vmatpush3.bf16.msra.mxu0 %v8326_v5 }
0x3563   : > { %v6193_v31 = vpop.f32.mrb[68].mxu0 }
0x3564   : > { %v6197_v33 = vadd.f32 %v6193_v31, %v5958_v23  ;;  %v7865_v34 = vpop.f32.mrb[69].mxu0 }
0x3565   : > { %v7255_v34 = vld [vmem:[#allocation38 + $0x1] ss:$0 sm:$0xff] }
0x3566   : > { %v6206_v35 = vadd.f32 %v7233_v32, %v6197_v33  ;;  %v7254_v32 = vld [vmem:[#allocation37 + $0x1] ss:$0 sm:$0xff] }
0x3568   : > { %v6207_v57 = vadd.f32 %v6206_v35, %v10757_v12  ;;  %v8314_v12 = vld [vmem:[#allocation31 + $0x58] sm:$0xff]  }
0x3569   : > { %7873 = vmatpush3.bf16.msra.mxu1 %v8314_v12  ;;  %v8330_v12 = vld [vmem:[#allocation43 + $0x18] sm:$0xff]  }
0x356a   : > { %v6212_v36 = vmul.f32 %v10479_v42, %v6207_v57  ;;  %7874 = vmatprep.subr.bf16.mxu1 %v9370_v0 }
0x356c   : > { %6213 = vadd.xlane.f32.xlu1 %v6212_v36 }
0x356d   : > { %7875 = vmatpush3.bf16.msra.mxu1 %v8315_v44  ;;  %v8331_v44 = vld [vmem:[#allocation43 + $0x20] sm:$0xff]  }
0x356e   : > { %7876 = vmatprep.subr.bf16.mxu1 %v9370_v0 }
0x3571   : > { %7877 = vmatpush3.bf16.msra.mxu1 %v8316_v45  ;;  %v8332_v45 = vld [vmem:[#allocation43 + $0x28] sm:$0xff]  }
0x3572   : > { %7878 = vmatprep.subr.bf16.mxu1 %v9370_v0 }
0x3575   : > { %7879 = vmatpush3.bf16.msra.mxu1 %v8317_v46  ;;  %v8333_v46 = vld [vmem:[#allocation43 + $0x30] sm:$0xff]  }
0x3576   : > { %7880 = vmatprep.subr.bf16.mxu1 %v9370_v0 }
0x3579   : > { %7881 = vmatpush3.bf16.msra.mxu1 %v8318_v47 }
0x357a   : > { %7906 = vmatprep.subr.bf16.mxu1 %v9370_v0 }
0x35f9   : > { %v6214_v39 = vpop.xlane.xlu1 %6213 }
0x35fa   : > { %v6215_v28 = vmul.f32 0.03125, %v6214_v39 }
0x35fc   : > { %v6216_v40 = vsub.f32 %v6212_v36, %v6215_v28 }
0x35fe   : > { %v6217_v41 = vmul.f32 %v10479_v42, %v6216_v40 }
0x3600   : > { %v6218_v43 = vmul.f32 %v6217_v41, %v6217_v41 }
0x3602   : > { %6219 = vadd.xlane.f32.xlu1 %v6218_v43 }
0x368f   : > { %v6220_v53 = vpop.xlane.xlu1 %6219 }
0x3690   : > { %v6221_v54 = vmul.f32 0.03125, %v6220_v53 }
0x3692   : > { %v6222_v55 = vadd.f32 1e-05, %v6221_v54 }
0x3694   : > { %8407 = vrsqrt.f32 %v6222_v55 }
0x369e   : > { %v8408_v56 = vpop.eup %8407 }
0x369f   : > { %v6224_v59 = vmul.f32 %v8408_v56, %v6217_v41  ;;  %v7258_v56 = vld [vmem:[#allocation44] ss:$0 sm:$0xff] }
0x36a1   : > { %v6231_v62 = vmul.f32 %v7234_v58, %v6224_v59 }
0x36a3   : > { %v6238_v1 = vadd.f32 %v7235_v61, %v6231_v62 }
0x36a5   : > { %v6239_v2 = vpack.c.bf16 %v6238_v1, %v6238_v1 }
0x36a7   : > { %7883 = vmatmul.mubr.bf16.vlgmr.msra.gmra.mrb[60].mxu1 %v6239_v2 }
0x36a8   : > { %7922 = vmatprep.mubr.msk.bf16.mxu1 %vm9371_vm0, %v9370_v0  ;;  %7907 = vmatpush3.bf16.msra.mxu1 %v8327_v37 }
0x36a9   : > { %7908 = vmatprep.subr.bf16.mxu1 %v9370_v0 }
0x36ac   : > { %7909 = vmatpush3.bf16.msra.mxu1 %v8328_v38 }
0x36ad   : > { %7910 = vmatprep.subr.bf16.mxu1 %v9370_v0 }
0x36b0   : > { %7911 = vmatpush3.bf16.msra.mxu1 %v8329_v16 }
0x36b1   : > { %7912 = vmatprep.subr.bf16.mxu1 %v9370_v0 }
0x36b4   : > { %7913 = vmatpush3.bf16.msra.mxu1 %v8330_v12 }
0x36b5   : > { %7914 = vmatprep.subr.bf16.mxu1 %v9370_v0 }
0x36b8   : > { %7915 = vmatpush3.bf16.msra.mxu1 %v8331_v44 }
0x36b9   : > { %7916 = vmatprep.subr.bf16.mxu1 %v9370_v0 }
0x36bc   : > { %7917 = vmatpush3.bf16.msra.mxu1 %v8332_v45 }
0x36bd   : > { %7918 = vmatprep.subr.bf16.mxu1 %v9370_v0 }
0x36c0   : > { %7919 = vmatpush3.bf16.msra.mxu1 %v8333_v46 }
0x36c1   : > { %7920 = vmatprep.subr.bf16.mxu1 %v9370_v0 }
0x377a   : > { %v6347_v7 = vpop.f32.mrb[60].mxu1 }
0x377b   : > { %v6348_v8 = vadd.f32 %v7236_v6, %v6347_v7  ;;  %v7884_v10 = vpop.f32.mrb[61].mxu1 }
0x377c   : > { %v6350_v11 = vpop.f32.mrb[62].mxu1 }
0x377d   : > { %v6353_v14 = vmax.f32 %v6348_v8, 0.0  ;;  %v7885_v15 = vpop.f32.mrb[63].mxu1 }
0x377f   : > { %v6354_v3 = vpack.c.bf16 %v6353_v14, %v6353_v14 }
0x3781   : > { %7903 = vmatmul.mubr.bf16.vlgmr.msra.gmra.mrb[72].mxu0 %v6354_v3 }
0x3854   : > { %v6462_v18 = vpop.f32.mrb[72].mxu0 }
0x3855   : > { %v6463_v20 = vadd.f32 %v7245_v17, %v6462_v18  ;;  %v7904_v19 = vpop.f32.mrb[73].mxu0 }
0x3856   : > { %v6465_v60 = vpop.f32.mrb[74].mxu0 }
0x3857   : > { %v6468_v21 = vadd.f32 %v6463_v20, %v6238_v1  ;;  %v7905_v22 = vpop.f32.mrb[75].mxu0 }
0x3859   : > { %v6473_v13 = vmul.f32 %v10479_v42, %v6468_v21 }
0x385b   : > { %6474 = vadd.xlane.f32.xlu1 %v6473_v13 }
0x38e8   : > { %v6475_v23 = vpop.xlane.xlu1 %6474 }
0x38e9   : > { %v6476_v24 = vmul.f32 0.03125, %v6475_v23 }
0x38eb   : > { %v6477_v25 = vsub.f32 %v6473_v13, %v6476_v24 }
0x38ed   : > { %v6478_v26 = vmul.f32 %v10479_v42, %v6477_v25 }
0x38ef   : > { %v6479_v27 = vmul.f32 %v6478_v26, %v6478_v26 }
0x38f1   : > { %6480 = vadd.xlane.f32.xlu1 %v6479_v27 }
0x397e   : > { %v6481_v63 = vpop.xlane.xlu1 %6480 }
0x397f   : > { %v6482_v29 = vmul.f32 0.03125, %v6481_v63 }
0x3981   : > { %v6483_v30 = vadd.f32 1e-05, %v6482_v29 }
0x3983   : > { %8409 = vrsqrt.f32 %v6483_v30 }
0x398d   : > { %v8410_v31 = vpop.eup %8409 }
0x398e   : > { %v6485_v33 = vmul.f32 %v8410_v31, %v6478_v26 }
0x3990   : > { %v6492_v35 = vmul.f32 %v7254_v32, %v6485_v33 }
0x3992   : > { %v6499_v57 = vadd.f32 %v7255_v34, %v6492_v35 }
0x3994   : > { %v6502_v36 = vmul.f32 %v10479_v42, %v6499_v57 }
0x3996   : > { %6503 = vadd.xlane.f32.xlu0 %v6502_v36 }
0x3a23   : > { %v6504_v39 = vpop.xlane.xlu0 %6503 }
0x3a24   : > { %v6505_v28 = vmul.f32 0.03125, %v6504_v39 }
0x3a26   : > { %v6506_v40 = vsub.f32 %v6502_v36, %v6505_v28 }
0x3a28   : > { %v6507_v41 = vmul.f32 %v10479_v42, %v6506_v40  ;;  %v8334_v42 = vld [vmem:[#allocation43 + $0x38] sm:$0xff]  }
0x3a29   : > { %7921 = vmatpush3.bf16.msra.mxu1 %v8334_v42 }
0x3a2a   : > { %v6508_v43 = vmul.f32 %v6507_v41, %v6507_v41 }
0x3a2c   : > { %6509 = vadd.xlane.f32.xlu1 %v6508_v43 }
0x3ab9   : > { %v6510_v47 = vpop.xlane.xlu1 %6509 }
0x3aba   : > { %v6511_v48 = vmul.f32 0.03125, %v6510_v47 }
0x3abc   : > { %v6512_v49 = vadd.f32 1e-05, %v6511_v48 }
0x3abe   : > { %8411 = vrsqrt.f32 %v6512_v49 }
0x3ac8   : > { %v8412_v9 = vpop.eup %8411 }
0x3ac9   : > { %v6514_v51 = vmul.f32 %v8412_v9, %v6507_v41 }
0x3acb   : > { %v6521_v53 = vmul.f32 %v7256_v50, %v6514_v51 }
0x3acd   : > { %v6528_v54 = vadd.f32 %v7257_v52, %v6521_v53 }
0x3acf   : > { %v6529_v55 = vpack.c.bf16 %v6528_v54, %v6528_v54 }
0x3ad1   : > { %7923 = vmatmul.mubr.bf16.vlgmr.msra.gmra.mrb[64].mxu1 %v6529_v55 }
0x3ba4   : > { %v6635_v0 = vpop.f32.mrb[64].mxu1 }
0x3ba5   : > { %v6636_v58 = vadd.f32 %v7258_v56, %v6635_v0  ;;  %v7924_v59 = vpop.f32.mrb[65].mxu1 }
0x3ba6   : > { %v6638_v61 = vpop.f32.mrb[66].mxu1 }
0x3ba7   : > { %6641 = vst [vmem:[%s1310_s11] sm:$0xff] %v6636_v58  ;;  %v7925_v62 = vpop.f32.mrb[67].mxu1 }
0x3ba8   : > { %9221 = shalt.err (!%p9218_p11)
}
0x3ba9   : > { %s9222_s4 = scalar_lea.hbm %s10893_s12, 128  ;;  %s9226_s21 = scalar_lea.hbm %s11145_s29, 256 }
0x3baa   : > { %p9223_p10 = scmp.ne.s32.totalorder %s10893_s12, %s9222_s4  ;;  %p9227_p13 = scmp.lt.u32.totalorder %s10893_s12, %s11145_s29 }
0x3bab   : > { %p9228_p0 = scmp.lt.u32.totalorder %s9226_s21, %s9222_s4  ;;  %p9230_p3 = scmp.lt.u32.totalorder %s9222_s4, %s10893_s12 }
0x3bac   : > { %p9224_p7 = pnand %p9223_p10, %p11146_p1 }
0x3bad   : > { %p9229_p12 = por %p9228_p0, %p9227_p13 }
0x3bae   : > { %p9225_p4 = pneg %p9224_p7 }
0x3baf   : > { %p9231_p9 = por %p9230_p3, %p9229_p12 }
0x3bb1   : > { %p9232_p5 = pnand %p9231_p9, %p9225_p4 }
0x3bb3   : > { %9235 = shalt.err (!%p9232_p5)
}
0x3bb4   : > { %8030 = dma.vmem_to_hbm [thread:$0]  (%p11146_p1), %s10895_s14, 128, %s10893_s12, %s6643_s9  }
0x3bb5 PF: > { %s11147_s2 = sld [smem:[#allocation64_spill]]  ;;  %s11148_s7 = sld [smem:[#allocation69_spill]] }
0x3bb6   : > { %p11150_p6 = scmp.ge.s32.totalorder %s9334_s30, 2 }
0x3bbb   : > { %s6668_s26 = sand.u32 1, %s11147_s2   ;;  %p11149_p8 = scmp.ne.s32.totalorder %s11148_s7, 0 }
0x3bbc   : > { %s6669_s11 = scalar_lea.sflag [#allocation4], %s6668_s26 }
0x3bbd   : > { %p8119_p2 = pnand %p11150_p6, %p11149_p8 }
0x3bbf   : > { %9317 = dma.done.wait (!%p8119_p2), %s6669_s11, 128  }
0x3bc0   : > { %9319 = vsyncadd (!%p8119_p2), %s6669_s11, 4294967168  ;;  %s11151_s30 = sld [smem:[#allocation67_spill]]  ;;  %s11152_s0 = sld [smem:[#allocation65_spill]] }
0x3bc1   : > { %s11153_s9 = sld [smem:[#allocation68_spill]]  ;;  %s11154_s8 = smov %s9326_s5 }
0x3bc6   : > { %p59_p11 = scmp.ge.s32.totalorder %s11151_s30, 4   ;;  %s11155_s5 = smov %s11152_s0 }
0x3bc8   :  { %61 = sbr.rel (!%p59_p11) target bundleno = 51 (0x33), region = 330 }
0x3bcf   :  { %6674 = vsyncpa [#allocation3], 1 }
0x3bd0   :  { %6676 = vsyncpa [#allocation3 + $0x1], 1 }
0x3bd1   :  { %6677 = vsyncpa [#allocation6], 1 }
0x3bd2   :  { %6679 = vsyncpa [#allocation6 + $0x1], 1 }
0x3bd3   :  { %6680 = vsyncpa [#allocation9], 1 }
0x3bd4   :  { %6682 = vsyncpa [#allocation9 + $0x1], 1 }
0x3bd5   :  { %6683 = vsyncpa [#allocation12], 1 }
0x3bd6   :  { %6684 = vsyncpa [#allocation15], 1 }
0x3bd7   :  { %6685 = vsyncpa [#allocation18], 1 }
0x3bd8   :  { %6686 = vsyncpa [#allocation21], 1 }
0x3bd9   :  { %6687 = vsyncpa [#allocation24], 1 }
0x3bda   :  { %6688 = vsyncpa [#allocation27], 1 }
0x3bdb   :  { %6689 = vsyncpa [#allocation30], 1 }
0x3bdc   :  { %6690 = vsyncpa [#allocation33], 1 }
0x3bdd   :  { %6691 = vsyncpa [#allocation36], 1 }
0x3bde   :  { %6692 = vsyncpa [#allocation39], 1 }
0x3bdf   :  { %6693 = vsyncpa [#allocation42], 1 }
0x3be0   :  { %6694 = vsyncpa [#allocation45], 1 }
0x3be1   :  { %6695 = vsyncpa [#allocation4], 1 }
0x3be2   :  { %6697 = vsyncpa [#allocation4 + $0x1], 1 }

</bundles_post_ra>
